<compile_context>
chip_gen: v7x
topology: tpu7x:2x2x1
jax: 0.10.0
libtpu: 0.0.40
codegen_flags: <defaults>
</compile_context>

<pallas_src>
import numpy as np
import jax
import jax.numpy as jnp
from jax.experimental import pallas as pl
from jax.experimental.pallas import tpu as pltpu

NEG_SLOPE = 0.2
MASK_BIAS = -1e30


# ---------------------------------------------------------------------------
# helpers (wrapper side, plain JAX / numpy)
# ---------------------------------------------------------------------------
def _full_spec(shape):
    """BlockSpec covering the whole array for a grid=(1,) call."""
    return pl.BlockSpec(shape, lambda i, _n=len(shape): (0,) * _n)


def _dst_edge_types(nt, edge_types):
    """Incoming edge types of node type nt, in metadata order."""
    return [et for et in edge_types if et[2] == nt]


def _lin_dst_matrix(lin_dst):
    """[H, D] -> [H*D, H] so that (x_proj @ M)[:, h] == sum_d x_proj[:, h*D+d]*lin_dst[h, d]."""
    H, D = lin_dst.shape
    eye = jnp.eye(H, dtype=lin_dst.dtype)
    return (lin_dst[:, :, None] * eye[:, None, :]).reshape(H * D, H)


def _np_block_eye(n_blocks, rows_per_block, cols_per_block, dtype=np.float32):
    """Block pattern: 1 where row//rows_per_block == col//cols_per_block."""
    r = np.arange(n_blocks * rows_per_block)[:, None] // rows_per_block
    c = np.arange(n_blocks * cols_per_block)[None, :] // cols_per_block
    return (r == c).astype(dtype)


def _np_adst_expand(c_aug, off, heads, n_src, dtype=np.float32):
    """[C_aug, H*Ns] selector: picks folded alpha_dst column (off+h) and
    broadcasts it over head-h's Ns-lane block."""
    m = np.zeros((c_aug, heads * n_src), dtype)
    for h in range(heads):
        m[off + h, h * n_src:(h + 1) * n_src] = 1.0
    return m


# ---------------------------------------------------------------------------
# The single fused kernel: full HAN forward (conv1 -> ReLU -> conv2)
# ---------------------------------------------------------------------------
def _make_han_kernel(metadata, heads, head_dim, neg_slope, num_layers):
    node_types, edge_types = metadata
    hidden = heads * head_dim

    def kernel(*refs):
        it = iter(refs)
        # ---- unpack refs (order fixed by the wrapper) ----
        x = {nt: next(it)[...] for nt in node_types}                       # bf16
        bias = {et: next(it)[...].astype(jnp.float32) for et in edge_types}  # [Nd,H*Ns]
        valid = {et: next(it)[...] for et in edge_types}                   # [Nd,1] f32
        rmat = {et: next(it)[...] for et in edge_types}                    # [H,H*Ns] bf16
        adst_exp = {et: next(it)[...] for et in edge_types}                # [Caug,H*Ns] bf16
        blockmask = {nt: next(it)[...] for nt in node_types}               # [H*N,H*D] f32
        rep_d = next(it)[...]                                              # [H,H*D] bf16
        layers = []
        for _ in range(num_layers):
            lp = {
                'w': {nt: next(it) for nt in node_types},        # bf16 [in, C_aug]
                'b': {nt: next(it) for nt in node_types},        # f32  [1, C_aug]
                'lin_src': {et: next(it) for et in edge_types},  # bf16 [1, H*D]
            }
            lp['k_w'] = next(it)                                 # bf16 [hid, hid]
            lp['k_b'] = next(it)                                 # f32  [1, hid]
            lp['q'] = next(it)                                   # f32  [1, hid]
            layers.append(lp)
        out_refs = {nt: next(it) for nt in node_types}

        h_dict = x
        for li, lp in enumerate(layers):
            last_layer = li == num_layers - 1

            # (1) projection (+ folded alpha_dst columns): ONE bf16 matmul / type
            proj, proj_b, rhs_cache = {}, {}, {}
            for nt in node_types:
                hb = h_dict[nt].astype(jnp.bfloat16)
                proj[nt] = (jnp.dot(hb, lp['w'][nt][...],
                                    preferred_element_type=jnp.float32)
                            + lp['b'][nt][...])
                proj_b[nt] = proj[nt].astype(jnp.bfloat16)

            def get_rhs(src, _proj=proj, _cache=rhs_cache):
                # Block-arranged src features [H*Ns, H*D]: row block h keeps only
                # head-h's columns of xs -> one matmul aggregates all heads.
                # Shared across edge types with the same src node type.
                if src not in _cache:
                    xs = _proj[src][:, :hidden]                 # f32 prefix slice
                    tiled = jnp.concatenate([xs] * heads, axis=0)
                    _cache[src] = (tiled * blockmask[src]).astype(jnp.bfloat16)
                return _cache[src]

            # (2) per-edge-type multi-head attention, heads batched along lanes
            per_dst = {nt: [] for nt in node_types}
            for et in edge_types:
                src, _, dst = et
                rhs_b = get_rhs(src)                            # [H*Ns, H*D] bf16

                # alpha_src for all heads in ONE dot -> [1, H*Ns]; the broadcast
                # over dst rows is free in the add below.
                a_src = jax.lax.dot_general(
                    lp['lin_src'][et][...], rhs_b,
                    dimension_numbers=(((1,), (1,)), ((), ())),
                    preferred_element_type=jnp.float32)
                # alpha_dst: folded projection columns, selected + lane-broadcast
                # per head by one 0/1 matmul -> [Nd, H*Ns]
                a_dst = jnp.dot(proj_b[dst], adst_exp[et],
                                preferred_element_type=jnp.float32)

                s = a_dst + a_src
                s = jnp.where(s >= 0.0, s, neg_slope * s)       # leaky_relu
                s = s + bias[et]                                # -1e30 off-edge

                # Per-row max over ALL heads is >= every head's max, so it is a
                # safe softmax shift (each head still renormalizes with its own
                # denominator); off-edge lanes underflow to exactly 0 in exp.
                m = jnp.max(s, axis=-1, keepdims=True)
                p = jnp.exp(s - m)
                p_b = p.astype(jnp.bfloat16)

                # per-head denominators via a 0/1 matmul -> [Nd, H]
                denom = jax.lax.dot_general(
                    p_b, rmat[et],
                    dimension_numbers=(((1,), (1,)), ((), ())),
                    preferred_element_type=jnp.float32)
                inv = pl.reciprocal(jnp.maximum(denom, 1e-20), approx=True)
                inv_hd = jnp.dot(inv.astype(jnp.bfloat16), rep_d,
                                 preferred_element_type=jnp.float32)  # [Nd, H*D]

                # ONE stacked aggregation matmul for all heads -> [Nd, H*D]
                out_un = jnp.dot(p_b, rhs_b,
                                 preferred_element_type=jnp.float32)
                # normalize per head; zero rows with no incoming edges
                out_et = out_un * (inv_hd * valid[et])
                per_dst[dst].append(jnp.maximum(out_et, 0.0))   # per-edge-type ReLU

            # (3) semantic ("metapath") attention per destination node type
            kw = lp['k_w'][...]
            kb = lp['k_b'][...]
            q = lp['q'][...]
            h_next = {}
            for nt in node_types:
                outs = per_dst[nt]
                scores = []
                for o in outs:
                    t = jnp.tanh(jnp.dot(o.astype(jnp.bfloat16), kw,
                                         preferred_element_type=jnp.float32) + kb)
                    mean_t = jnp.sum(t, axis=0, keepdims=True) * (1.0 / o.shape[0])
                    scores.append(jnp.sum(q * mean_t, axis=-1, keepdims=True))
                smax = scores[0]
                for sc in scores[1:]:
                    smax = jnp.maximum(smax, sc)
                exps = [jnp.exp(sc - smax) for sc in scores]
                total = exps[0]
                for e in exps[1:]:
                    total = total + e
                inv_total = pl.reciprocal(total, approx=True)   # EUP, not VPU div
                acc = (exps[0] * inv_total) * outs[0]
                for e, o in zip(exps[1:], outs[1:]):
                    acc = acc + (e * inv_total) * o
                if not last_layer:
                    acc = jnp.maximum(acc, 0.0)                 # fused inter-layer ReLU
                h_next[nt] = acc
            h_dict = h_next

        # single full-width store per node type (lane density bound by hidden=32)
        for nt in node_types:
            out_refs[nt][...] = h_dict[nt]

    return kernel


# ---------------------------------------------------------------------------
# HAN forward wrapper: one pallas_call for the whole model
# ---------------------------------------------------------------------------
def han_forward(params, x_dict, edge_index_dict, metadata, heads,
                hidden_channels, neg_slope=NEG_SLOPE):
    node_types, edge_types = metadata
    assert hidden_channels % heads == 0
    head_dim = hidden_channels // heads
    num_layers = 2

    for nt in node_types:
        assert any(et[2] == nt for et in edge_types), (
            f"node type {nt!r} receives no edge types (HANConv output None is "
            f"not supported by the fused kernel)")

    n_nodes = {nt: x_dict[nt].shape[0] for nt in node_types}
    dst_ets = {nt: _dst_edge_types(nt, edge_types) for nt in node_types}
    c_aug = {nt: hidden_channels + heads * len(dst_ets[nt]) for nt in node_types}
    adst_off = {}
    for nt in node_types:
        for k, et in enumerate(dst_ets[nt]):
            adst_off[et] = hidden_channels + k * heads

    # ---- edge masks -> additive bias (bf16, head-tiled) + row validity ------
    bias_tiled, valid = {}, {}
    for et in edge_types:
        src, _, dst = et
        ei = edge_index_dict[et]                                   # [2, E]
        mask = (jnp.zeros((n_nodes[dst], n_nodes[src]), jnp.float32)
                .at[ei[1], ei[0]].set(1.0))
        bias = jnp.where(mask > 0.0, 0.0, MASK_BIAS)
        bias_tiled[et] = jnp.tile(bias, (1, heads)).astype(jnp.bfloat16)
        valid[et] = (jnp.max(mask, axis=1, keepdims=True) > 0.0).astype(jnp.float32)

    # ---- tiny 0/1 selector constants (shared by both conv layers) -----------
    rmats = {et: jnp.asarray(_np_block_eye(heads, 1, n_nodes[et[0]]),
                             np.float32).astype(jnp.bfloat16)
             for et in edge_types}
    adst_exps = {et: jnp.asarray(
        _np_adst_expand(c_aug[et[2]], adst_off[et], heads, n_nodes[et[0]]),
        np.float32).astype(jnp.bfloat16) for et in edge_types}
    blockmasks = {nt: jnp.asarray(_np_block_eye(heads, n_nodes[nt], head_dim),
                                  np.float32) for nt in node_types}
    rep_d = jnp.asarray(_np_block_eye(heads, 1, head_dim),
                        np.float32).astype(jnp.bfloat16)

    # ---- per-layer projection weights with folded alpha_dst columns ---------
    def augment_proj(p_layer):
        w_aug, b_aug = {}, {}
        for nt in node_types:
            w = p_layer['proj'][nt]['w']
            b = p_layer['proj'][nt]['b']
            w_cols, b_cols = [w], [b]
            for et in dst_ets[nt]:
                m = _lin_dst_matrix(p_layer['lin_dst']['__'.join(et)])  # [H*D, H]
                w_cols.append(w @ m)
                b_cols.append(b @ m)
            w_aug[nt] = jnp.concatenate(w_cols, axis=1).astype(jnp.bfloat16)
            b_aug[nt] = jnp.concatenate(b_cols, axis=1).astype(jnp.float32)
        return w_aug, b_aug

    # ---- flatten all kernel inputs in the fixed order the kernel expects ----
    args = []
    for nt in node_types:
        args.append(x_dict[nt].astype(jnp.bfloat16))
    for et in edge_types:
        args.append(bias_tiled[et])
    for et in edge_types:
        args.append(valid[et])
    for et in edge_types:
        args.append(rmats[et])
    for et in edge_types:
        args.append(adst_exps[et])
    for nt in node_types:
        args.append(blockmasks[nt])
    args.append(rep_d)
    for layer_key in ('conv1', 'conv2'):
        p = params[layer_key]
        w_aug, b_aug = augment_proj(p)
        for nt in node_types:
            args.append(w_aug[nt])
        for nt in node_types:
            args.append(b_aug[nt])
        for et in edge_types:
            args.append(p['lin_src']['__'.join(et)].reshape(1, -1)
                        .astype(jnp.bfloat16))
        args.append(p['k_lin_w'].astype(jnp.bfloat16))
        args.append(p['k_lin_b'].astype(jnp.float32))
        args.append(p['q'].astype(jnp.float32))

    out_shapes = tuple(
        jax.ShapeDtypeStruct((n_nodes[nt], hidden_channels), jnp.float32)
        for nt in node_types)

    kernel = _make_han_kernel(metadata, heads, head_dim, neg_slope, num_layers)

    outs = pl.pallas_call(
        kernel,
        out_shape=out_shapes,
        grid=(1,),
        in_specs=[_full_spec(a.shape) for a in args],
        out_specs=tuple(_full_spec(s.shape) for s in out_shapes),
        compiler_params=pltpu.CompilerParams(
            dimension_semantics=("arbitrary",),
            vmem_limit_bytes=64 * 1024 * 1024),
    )(*args)

    return {nt: o for nt, o in zip(node_types, outs)}


# ---------------------------------------------------------------------------
# Deterministic parameter init (synthetic, matches HANConv param shapes)
# ---------------------------------------------------------------------------
def init_han_params(key, in_channels, hidden_channels, heads, metadata):
    node_types, edge_types = metadata
    head_dim = hidden_channels // heads
    keys = iter(jax.random.split(key, 64))

    def conv_params(in_c):
        p = {'proj': {}, 'lin_src': {}, 'lin_dst': {}}
        for nt in node_types:
            p['proj'][nt] = {
                'w': 0.1 * jax.random.normal(next(keys), (in_c, hidden_channels),
                                             jnp.float32),
                'b': jnp.zeros((1, hidden_channels), jnp.float32),
            }
        for et in edge_types:
            k = '__'.join(et)
            p['lin_src'][k] = 0.1 * jax.random.normal(
                next(keys), (heads, head_dim), jnp.float32)
            p['lin_dst'][k] = 0.1 * jax.random.normal(
                next(keys), (heads, head_dim), jnp.float32)
        p['k_lin_w'] = 0.1 * jax.random.normal(
            next(keys), (hidden_channels, hidden_channels), jnp.float32)
        p['k_lin_b'] = jnp.zeros((1, hidden_channels), jnp.float32)
        p['q'] = 0.1 * jax.random.normal(next(keys), (1, hidden_channels),
                                         jnp.float32)
        return p

    return {'conv1': conv_params(in_channels),
            'conv2': conv_params(hidden_channels)}


# ---------------------------------------------------------------------------
if __name__ == "__main__":
    metadata = (
        ['author', 'paper'],
        [('author', 'writes', 'paper'),
         ('paper', 'written_by', 'author'),
         ('paper', 'cites', 'paper')],
    )
    in_channels, hidden_channels, out_channels, heads = 8, 32, 32, 4
    n_author, n_paper = 8, 16
    n_nodes = {'author': n_author, 'paper': n_paper}

    key = jax.random.PRNGKey(0)
    k_xa, k_xp, k_e1, k_e2, k_e3, k_params = jax.random.split(key, 6)

    x_dict = {
        'author': jax.random.normal(k_xa, (n_author, in_channels), jnp.float32),
        'paper': jax.random.normal(k_xp, (n_paper, in_channels), jnp.float32),
    }

    def make_edge_index(k, n_src, n_dst, p=0.35):
        m = np.asarray(jax.random.bernoulli(k, p, (n_dst, n_src)))
        dst, src = np.nonzero(m)
        if dst.size == 0:
            src, dst = np.array([0]), np.array([0])
        return jnp.asarray(np.stack([src, dst]).astype(np.int32))

    edge_index_dict = {
        ('author', 'writes', 'paper'): make_edge_index(k_e1, n_author, n_paper),
        ('paper', 'written_by', 'author'): make_edge_index(k_e2, n_paper, n_author),
        ('paper', 'cites', 'paper'): make_edge_index(k_e3, n_paper, n_paper),
    }

    params = init_han_params(k_params, in_channels, hidden_channels, heads,
                             metadata)

    out = han_forward(params, x_dict, edge_index_dict, metadata, heads,
                      hidden_channels)
    for nt, v in out.items():
        jax.block_until_ready(v)
        assert v.shape == (n_nodes[nt], hidden_channels), (nt, v.shape)
        assert bool(jnp.all(jnp.isfinite(v)))

    print("KERNEL_OK")
</pallas_src>

<mosaic_0001>
module attributes {stable_mosaic.version = 11 : i64} {
  func.func @kernel(%arg0: i32, %arg1: memref<8x8xbf16, #tpu.memory_space<vmem>>, %arg2: memref<16x8xbf16, #tpu.memory_space<vmem>>, %arg3: memref<16x32xbf16, #tpu.memory_space<vmem>>, %arg4: memref<8x64xbf16, #tpu.memory_space<vmem>>, %arg5: memref<16x64xbf16, #tpu.memory_space<vmem>>, %arg6: memref<16x1xf32, #tpu.memory_space<vmem>>, %arg7: memref<8x1xf32, #tpu.memory_space<vmem>>, %arg8: memref<16x1xf32, #tpu.memory_space<vmem>>, %arg9: memref<4x32xbf16, #tpu.memory_space<vmem>>, %arg10: memref<4x64xbf16, #tpu.memory_space<vmem>>, %arg11: memref<4x64xbf16, #tpu.memory_space<vmem>>, %arg12: memref<40x32xbf16, #tpu.memory_space<vmem>>, %arg13: memref<36x64xbf16, #tpu.memory_space<vmem>>, %arg14: memref<40x64xbf16, #tpu.memory_space<vmem>>, %arg15: memref<32x32xf32, #tpu.memory_space<vmem>>, %arg16: memref<64x32xf32, #tpu.memory_space<vmem>>, %arg17: memref<4x32xbf16, #tpu.memory_space<vmem>>, %arg18: memref<8x36xbf16, #tpu.memory_space<vmem>>, %arg19: memref<8x40xbf16, #tpu.memory_space<vmem>>, %arg20: memref<1x36xf32, #tpu.memory_space<vmem>>, %arg21: memref<1x40xf32, #tpu.memory_space<vmem>>, %arg22: memref<1x32xbf16, #tpu.memory_space<vmem>>, %arg23: memref<1x32xbf16, #tpu.memory_space<vmem>>, %arg24: memref<1x32xbf16, #tpu.memory_space<vmem>>, %arg25: memref<32x32xbf16, #tpu.memory_space<vmem>>, %arg26: memref<1x32xf32, #tpu.memory_space<vmem>>, %arg27: memref<1x32xf32, #tpu.memory_space<vmem>>, %arg28: memref<32x36xbf16, #tpu.memory_space<vmem>>, %arg29: memref<32x40xbf16, #tpu.memory_space<vmem>>, %arg30: memref<1x36xf32, #tpu.memory_space<vmem>>, %arg31: memref<1x40xf32, #tpu.memory_space<vmem>>, %arg32: memref<1x32xbf16, #tpu.memory_space<vmem>>, %arg33: memref<1x32xbf16, #tpu.memory_space<vmem>>, %arg34: memref<1x32xbf16, #tpu.memory_space<vmem>>, %arg35: memref<32x32xbf16, #tpu.memory_space<vmem>>, %arg36: memref<1x32xf32, #tpu.memory_space<vmem>>, %arg37: memref<1x32xf32, #tpu.memory_space<vmem>>, %arg38: memref<8x32xf32, #tpu.memory_space<vmem>>, %arg39: memref<16x32xf32, #tpu.memory_space<vmem>>) attributes {dimension_semantics = [#tpu.dimension_semantics<arbitrary>], iteration_bounds = array<i64: 1>, scalar_prefetch = 0 : i64, scratch_operands = 0 : i64, tpu.core_type = #tpu.core_type<tc>, window_params = [{pipeline_mode = #tpu.pipeline_mode<synchronous>, transform_indices = @transform_0, window_bounds = array<i64: 8, 8>}, {pipeline_mode = #tpu.pipeline_mode<synchronous>, transform_indices = @transform_1, window_bounds = array<i64: 16, 8>}, {pipeline_mode = #tpu.pipeline_mode<synchronous>, transform_indices = @transform_2, window_bounds = array<i64: 16, 32>}, {pipeline_mode = #tpu.pipeline_mode<synchronous>, transform_indices = @transform_3, window_bounds = array<i64: 8, 64>}, {pipeline_mode = #tpu.pipeline_mode<synchronous>, transform_indices = @transform_4, window_bounds = array<i64: 16, 64>}, {pipeline_mode = #tpu.pipeline_mode<synchronous>, transform_indices = @transform_5, window_bounds = array<i64: 16, 1>}, {pipeline_mode = #tpu.pipeline_mode<synchronous>, transform_indices = @transform_6, window_bounds = array<i64: 8, 1>}, {pipeline_mode = #tpu.pipeline_mode<synchronous>, transform_indices = @transform_7, window_bounds = array<i64: 16, 1>}, {pipeline_mode = #tpu.pipeline_mode<synchronous>, transform_indices = @transform_8, window_bounds = array<i64: 4, 32>}, {pipeline_mode = #tpu.pipeline_mode<synchronous>, transform_indices = @transform_9, window_bounds = array<i64: 4, 64>}, {pipeline_mode = #tpu.pipeline_mode<synchronous>, transform_indices = @transform_10, window_bounds = array<i64: 4, 64>}, {pipeline_mode = #tpu.pipeline_mode<synchronous>, transform_indices = @transform_11, window_bounds = array<i64: 40, 32>}, {pipeline_mode = #tpu.pipeline_mode<synchronous>, transform_indices = @transform_12, window_bounds = array<i64: 36, 64>}, {pipeline_mode = #tpu.pipeline_mode<synchronous>, transform_indices = @transform_13, window_bounds = array<i64: 40, 64>}, {pipeline_mode = #tpu.pipeline_mode<synchronous>, transform_indices = @transform_14, window_bounds = array<i64: 32, 32>}, {pipeline_mode = #tpu.pipeline_mode<synchronous>, transform_indices = @transform_15, window_bounds = array<i64: 64, 32>}, {pipeline_mode = #tpu.pipeline_mode<synchronous>, transform_indices = @transform_16, window_bounds = array<i64: 4, 32>}, {pipeline_mode = #tpu.pipeline_mode<synchronous>, transform_indices = @transform_17, window_bounds = array<i64: 8, 36>}, {pipeline_mode = #tpu.pipeline_mode<synchronous>, transform_indices = @transform_18, window_bounds = array<i64: 8, 40>}, {pipeline_mode = #tpu.pipeline_mode<synchronous>, transform_indices = @transform_19, window_bounds = array<i64: 1, 36>}, {pipeline_mode = #tpu.pipeline_mode<synchronous>, transform_indices = @transform_20, window_bounds = array<i64: 1, 40>}, {pipeline_mode = #tpu.pipeline_mode<synchronous>, transform_indices = @transform_21, window_bounds = array<i64: 1, 32>}, {pipeline_mode = #tpu.pipeline_mode<synchronous>, transform_indices = @transform_22, window_bounds = array<i64: 1, 32>}, {pipeline_mode = #tpu.pipeline_mode<synchronous>, transform_indices = @transform_23, window_bounds = array<i64: 1, 32>}, {pipeline_mode = #tpu.pipeline_mode<synchronous>, transform_indices = @transform_24, window_bounds = array<i64: 32, 32>}, {pipeline_mode = #tpu.pipeline_mode<synchronous>, transform_indices = @transform_25, window_bounds = array<i64: 1, 32>}, {pipeline_mode = #tpu.pipeline_mode<synchronous>, transform_indices = @transform_26, window_bounds = array<i64: 1, 32>}, {pipeline_mode = #tpu.pipeline_mode<synchronous>, transform_indices = @transform_27, window_bounds = array<i64: 32, 36>}, {pipeline_mode = #tpu.pipeline_mode<synchronous>, transform_indices = @transform_28, window_bounds = array<i64: 32, 40>}, {pipeline_mode = #tpu.pipeline_mode<synchronous>, transform_indices = @transform_29, window_bounds = array<i64: 1, 36>}, {pipeline_mode = #tpu.pipeline_mode<synchronous>, transform_indices = @transform_30, window_bounds = array<i64: 1, 40>}, {pipeline_mode = #tpu.pipeline_mode<synchronous>, transform_indices = @transform_31, window_bounds = array<i64: 1, 32>}, {pipeline_mode = #tpu.pipeline_mode<synchronous>, transform_indices = @transform_32, window_bounds = array<i64: 1, 32>}, {pipeline_mode = #tpu.pipeline_mode<synchronous>, transform_indices = @transform_33, window_bounds = array<i64: 1, 32>}, {pipeline_mode = #tpu.pipeline_mode<synchronous>, transform_indices = @transform_34, window_bounds = array<i64: 32, 32>}, {pipeline_mode = #tpu.pipeline_mode<synchronous>, transform_indices = @transform_35, window_bounds = array<i64: 1, 32>}, {pipeline_mode = #tpu.pipeline_mode<synchronous>, transform_indices = @transform_36, window_bounds = array<i64: 1, 32>}, {pipeline_mode = #tpu.pipeline_mode<synchronous>, transform_indices = @transform_37, window_bounds = array<i64: 8, 32>}, {pipeline_mode = #tpu.pipeline_mode<synchronous>, transform_indices = @transform_38, window_bounds = array<i64: 16, 32>}]} {
    %c0 = arith.constant 0 : index
    %c0_0 = arith.constant 0 : index
    %0 = vector.load %arg1[%c0, %c0_0] : memref<8x8xbf16, #tpu.memory_space<vmem>>, vector<8x8xbf16>
    %c0_1 = arith.constant 0 : index
    %c0_2 = arith.constant 0 : index
    %1 = vector.load %arg2[%c0_1, %c0_2] : memref<16x8xbf16, #tpu.memory_space<vmem>>, vector<16x8xbf16>
    %c0_3 = arith.constant 0 : index
    %c0_4 = arith.constant 0 : index
    %2 = vector.load %arg3[%c0_3, %c0_4] : memref<16x32xbf16, #tpu.memory_space<vmem>>, vector<16x32xbf16>
    %3 = arith.extf %2 : vector<16x32xbf16> to vector<16x32xf32>
    %c0_5 = arith.constant 0 : index
    %c0_6 = arith.constant 0 : index
    %4 = vector.load %arg4[%c0_5, %c0_6] : memref<8x64xbf16, #tpu.memory_space<vmem>>, vector<8x64xbf16>
    %5 = arith.extf %4 : vector<8x64xbf16> to vector<8x64xf32>
    %c0_7 = arith.constant 0 : index
    %c0_8 = arith.constant 0 : index
    %6 = vector.load %arg5[%c0_7, %c0_8] : memref<16x64xbf16, #tpu.memory_space<vmem>>, vector<16x64xbf16>
    %7 = arith.extf %6 : vector<16x64xbf16> to vector<16x64xf32>
    %c0_9 = arith.constant 0 : index
    %c0_10 = arith.constant 0 : index
    %8 = vector.load %arg6[%c0_9, %c0_10] : memref<16x1xf32, #tpu.memory_space<vmem>>, vector<16x1xf32>
    %c0_11 = arith.constant 0 : index
    %c0_12 = arith.constant 0 : index
    %9 = vector.load %arg7[%c0_11, %c0_12] : memref<8x1xf32, #tpu.memory_space<vmem>>, vector<8x1xf32>
    %c0_13 = arith.constant 0 : index
    %c0_14 = arith.constant 0 : index
    %10 = vector.load %arg8[%c0_13, %c0_14] : memref<16x1xf32, #tpu.memory_space<vmem>>, vector<16x1xf32>
    %c0_15 = arith.constant 0 : index
    %c0_16 = arith.constant 0 : index
    %11 = vector.load %arg9[%c0_15, %c0_16] : memref<4x32xbf16, #tpu.memory_space<vmem>>, vector<4x32xbf16>
    %c0_17 = arith.constant 0 : index
    %c0_18 = arith.constant 0 : index
    %12 = vector.load %arg10[%c0_17, %c0_18] : memref<4x64xbf16, #tpu.memory_space<vmem>>, vector<4x64xbf16>
    %c0_19 = arith.constant 0 : index
    %c0_20 = arith.constant 0 : index
    %13 = vector.load %arg11[%c0_19, %c0_20] : memref<4x64xbf16, #tpu.memory_space<vmem>>, vector<4x64xbf16>
    %c0_21 = arith.constant 0 : index
    %c0_22 = arith.constant 0 : index
    %14 = vector.load %arg12[%c0_21, %c0_22] : memref<40x32xbf16, #tpu.memory_space<vmem>>, vector<40x32xbf16>
    %c0_23 = arith.constant 0 : index
    %c0_24 = arith.constant 0 : index
    %15 = vector.load %arg13[%c0_23, %c0_24] : memref<36x64xbf16, #tpu.memory_space<vmem>>, vector<36x64xbf16>
    %c0_25 = arith.constant 0 : index
    %c0_26 = arith.constant 0 : index
    %16 = vector.load %arg14[%c0_25, %c0_26] : memref<40x64xbf16, #tpu.memory_space<vmem>>, vector<40x64xbf16>
    %c0_27 = arith.constant 0 : index
    %c0_28 = arith.constant 0 : index
    %17 = vector.load %arg15[%c0_27, %c0_28] : memref<32x32xf32, #tpu.memory_space<vmem>>, vector<32x32xf32>
    %c0_29 = arith.constant 0 : index
    %c0_30 = arith.constant 0 : index
    %18 = vector.load %arg16[%c0_29, %c0_30] : memref<64x32xf32, #tpu.memory_space<vmem>>, vector<64x32xf32>
    %c0_31 = arith.constant 0 : index
    %c0_32 = arith.constant 0 : index
    %19 = vector.load %arg17[%c0_31, %c0_32] : memref<4x32xbf16, #tpu.memory_space<vmem>>, vector<4x32xbf16>
    %c0_33 = arith.constant 0 : index
    %c0_34 = arith.constant 0 : index
    %20 = vector.load %arg18[%c0_33, %c0_34] : memref<8x36xbf16, #tpu.memory_space<vmem>>, vector<8x36xbf16>
    %cst = arith.constant dense<0.000000e+00> : vector<8x36xf32>
    %21 = tpu.matmul %0, %20, %cst {dimension_numbers = #tpu.dot_dimension_numbers<[1], [0], [0], [1], [0, 0, 1, 1], [], []>} : vector<8x8xbf16>, vector<8x36xbf16>, vector<8x36xf32> -> vector<8x36xf32>
    %c0_35 = arith.constant 0 : index
    %c0_36 = arith.constant 0 : index
    %22 = vector.load %arg20[%c0_35, %c0_36] : memref<1x36xf32, #tpu.memory_space<vmem>>, vector<1x36xf32>
    %23 = vector.broadcast %22 : vector<1x36xf32> to vector<8x36xf32>
    %24 = arith.addf %21, %23 : vector<8x36xf32>
    %25 = arith.truncf %24 : vector<8x36xf32> to vector<8x36xbf16>
    %c0_37 = arith.constant 0 : index
    %c0_38 = arith.constant 0 : index
    %26 = vector.load %arg19[%c0_37, %c0_38] : memref<8x40xbf16, #tpu.memory_space<vmem>>, vector<8x40xbf16>
    %cst_39 = arith.constant dense<0.000000e+00> : vector<16x40xf32>
    %27 = tpu.matmul %1, %26, %cst_39 {dimension_numbers = #tpu.dot_dimension_numbers<[1], [0], [0], [1], [0, 0, 1, 1], [], []>} : vector<16x8xbf16>, vector<8x40xbf16>, vector<16x40xf32> -> vector<16x40xf32>
    %c0_40 = arith.constant 0 : index
    %c0_41 = arith.constant 0 : index
    %28 = vector.load %arg21[%c0_40, %c0_41] : memref<1x40xf32, #tpu.memory_space<vmem>>, vector<1x40xf32>
    %29 = vector.broadcast %28 : vector<1x40xf32> to vector<16x40xf32>
    %30 = arith.addf %27, %29 : vector<16x40xf32>
    %31 = arith.truncf %30 : vector<16x40xf32> to vector<16x40xbf16>
    %32 = vector.extract_strided_slice %24 {offsets = [0, 0], sizes = [8, 32], strides = [1, 1]} : vector<8x36xf32> to vector<8x32xf32>
    %33 = tpu.concatenate %32, %32, %32, %32 in 0 : vector<8x32xf32>, vector<8x32xf32>, vector<8x32xf32>, vector<8x32xf32> -> vector<32x32xf32>
    %34 = arith.mulf %33, %17 : vector<32x32xf32>
    %35 = arith.truncf %34 : vector<32x32xf32> to vector<32x32xbf16>
    %c0_42 = arith.constant 0 : index
    %c0_43 = arith.constant 0 : index
    %36 = vector.load %arg22[%c0_42, %c0_43] : memref<1x32xbf16, #tpu.memory_space<vmem>>, vector<1x32xbf16>
    %cst_44 = arith.constant dense<0.000000e+00> : vector<1x32xf32>
    %37 = tpu.matmul %36, %35, %cst_44 {dimension_numbers = #tpu.dot_dimension_numbers<[1], [1], [0], [0], [0, 0, 1, 0], [], []>} : vector<1x32xbf16>, vector<32x32xbf16>, vector<1x32xf32> -> vector<1x32xf32>
    %cst_45 = arith.constant dense<0.000000e+00> : vector<16x32xf32>
    %38 = tpu.matmul %31, %14, %cst_45 {dimension_numbers = #tpu.dot_dimension_numbers<[1], [0], [0], [1], [0, 0, 1, 1], [], []>} : vector<16x40xbf16>, vector<40x32xbf16>, vector<16x32xf32> -> vector<16x32xf32>
    %39 = vector.broadcast %37 : vector<1x32xf32> to vector<16x32xf32>
    %40 = arith.addf %38, %39 : vector<16x32xf32>
    %cst_46 = arith.constant 0.000000e+00 : f32
    %41 = vector.broadcast %cst_46 : f32 to vector<16x32xf32>
    %42 = arith.cmpf oge, %40, %41 : vector<16x32xf32>
    %cst_47 = arith.constant 2.000000e-01 : f32
    %43 = vector.broadcast %cst_47 : f32 to vector<16x32xf32>
    %44 = arith.mulf %43, %40 : vector<16x32xf32>
    %45 = arith.select %42, %40, %44 : vector<16x32xi1>, vector<16x32xf32>
    %46 = arith.addf %45, %3 : vector<16x32xf32>
    %cst_48 = arith.constant dense<0xFF800000> : vector<16xf32>
    %47 = vector.multi_reduction <maximumf>, %46, %cst_48 [1] : vector<16x32xf32> to vector<16xf32>
    %48 = vector.shape_cast %47 : vector<16xf32> to vector<16x1xf32>
    %49 = vector.broadcast %48 : vector<16x1xf32> to vector<16x32xf32>
    %50 = arith.subf %46, %49 : vector<16x32xf32>
    %51 = math.exp %50 : vector<16x32xf32>
    %52 = arith.truncf %51 : vector<16x32xf32> to vector<16x32xbf16>
    %cst_49 = arith.constant dense<0.000000e+00> : vector<16x4xf32>
    %53 = tpu.matmul %52, %11, %cst_49 {dimension_numbers = #tpu.dot_dimension_numbers<[1], [1], [0], [0], [0, 0, 1, 0], [], []>} : vector<16x32xbf16>, vector<4x32xbf16>, vector<16x4xf32> -> vector<16x4xf32>
    %cst_50 = arith.constant 9.99999968E-21 : f32
    %54 = vector.broadcast %cst_50 : f32 to vector<16x4xf32>
    %55 = arith.maximumf %53, %54 : vector<16x4xf32>
    %56 = tpu.reciprocal %55 {approx = true} : vector<16x4xf32> -> vector<16x4xf32>
    %57 = arith.truncf %56 : vector<16x4xf32> to vector<16x4xbf16>
    %cst_51 = arith.constant dense<0.000000e+00> : vector<16x32xf32>
    %58 = tpu.matmul %57, %19, %cst_51 {dimension_numbers = #tpu.dot_dimension_numbers<[1], [0], [0], [1], [0, 0, 1, 1], [], []>} : vector<16x4xbf16>, vector<4x32xbf16>, vector<16x32xf32> -> vector<16x32xf32>
    %cst_52 = arith.constant dense<0.000000e+00> : vector<16x32xf32>
    %59 = tpu.matmul %52, %35, %cst_52 {dimension_numbers = #tpu.dot_dimension_numbers<[1], [0], [0], [1], [0, 0, 1, 1], [], []>} : vector<16x32xbf16>, vector<32x32xbf16>, vector<16x32xf32> -> vector<16x32xf32>
    %60 = vector.broadcast %8 : vector<16x1xf32> to vector<16x32xf32>
    %61 = arith.mulf %58, %60 : vector<16x32xf32>
    %62 = arith.mulf %59, %61 : vector<16x32xf32>
    %cst_53 = arith.constant 0.000000e+00 : f32
    %63 = vector.broadcast %cst_53 : f32 to vector<16x32xf32>
    %64 = arith.maximumf %62, %63 : vector<16x32xf32>
    %65 = vector.extract_strided_slice %30 {offsets = [0, 0], sizes = [16, 32], strides = [1, 1]} : vector<16x40xf32> to vector<16x32xf32>
    %66 = tpu.concatenate %65, %65, %65, %65 in 0 : vector<16x32xf32>, vector<16x32xf32>, vector<16x32xf32>, vector<16x32xf32> -> vector<64x32xf32>
    %67 = arith.mulf %66, %18 : vector<64x32xf32>
    %68 = arith.truncf %67 : vector<64x32xf32> to vector<64x32xbf16>
    %c0_54 = arith.constant 0 : index
    %c0_55 = arith.constant 0 : index
    %69 = vector.load %arg23[%c0_54, %c0_55] : memref<1x32xbf16, #tpu.memory_space<vmem>>, vector<1x32xbf16>
    %cst_56 = arith.constant dense<0.000000e+00> : vector<1x64xf32>
    %70 = tpu.matmul %69, %68, %cst_56 {dimension_numbers = #tpu.dot_dimension_numbers<[1], [1], [0], [0], [0, 0, 1, 0], [], []>} : vector<1x32xbf16>, vector<64x32xbf16>, vector<1x64xf32> -> vector<1x64xf32>
    %cst_57 = arith.constant dense<0.000000e+00> : vector<8x64xf32>
    %71 = tpu.matmul %25, %15, %cst_57 {dimension_numbers = #tpu.dot_dimension_numbers<[1], [0], [0], [1], [0, 0, 1, 1], [], []>} : vector<8x36xbf16>, vector<36x64xbf16>, vector<8x64xf32> -> vector<8x64xf32>
    %72 = vector.broadcast %70 : vector<1x64xf32> to vector<8x64xf32>
    %73 = arith.addf %71, %72 : vector<8x64xf32>
    %cst_58 = arith.constant 0.000000e+00 : f32
    %74 = vector.broadcast %cst_58 : f32 to vector<8x64xf32>
    %75 = arith.cmpf oge, %73, %74 : vector<8x64xf32>
    %cst_59 = arith.constant 2.000000e-01 : f32
    %76 = vector.broadcast %cst_59 : f32 to vector<8x64xf32>
    %77 = arith.mulf %76, %73 : vector<8x64xf32>
    %78 = arith.select %75, %73, %77 : vector<8x64xi1>, vector<8x64xf32>
    %79 = arith.addf %78, %5 : vector<8x64xf32>
    %cst_60 = arith.constant dense<0xFF800000> : vector<8xf32>
    %80 = vector.multi_reduction <maximumf>, %79, %cst_60 [1] : vector<8x64xf32> to vector<8xf32>
    %81 = vector.shape_cast %80 : vector<8xf32> to vector<8x1xf32>
    %82 = vector.broadcast %81 : vector<8x1xf32> to vector<8x64xf32>
    %83 = arith.subf %79, %82 : vector<8x64xf32>
    %84 = math.exp %83 : vector<8x64xf32>
    %85 = arith.truncf %84 : vector<8x64xf32> to vector<8x64xbf16>
    %cst_61 = arith.constant dense<0.000000e+00> : vector<8x4xf32>
    %86 = tpu.matmul %85, %12, %cst_61 {dimension_numbers = #tpu.dot_dimension_numbers<[1], [1], [0], [0], [0, 0, 1, 0], [], []>} : vector<8x64xbf16>, vector<4x64xbf16>, vector<8x4xf32> -> vector<8x4xf32>
    %cst_62 = arith.constant 9.99999968E-21 : f32
    %87 = vector.broadcast %cst_62 : f32 to vector<8x4xf32>
    %88 = arith.maximumf %86, %87 : vector<8x4xf32>
    %89 = tpu.reciprocal %88 {approx = true} : vector<8x4xf32> -> vector<8x4xf32>
    %90 = arith.truncf %89 : vector<8x4xf32> to vector<8x4xbf16>
    %cst_63 = arith.constant dense<0.000000e+00> : vector<8x32xf32>
    %91 = tpu.matmul %90, %19, %cst_63 {dimension_numbers = #tpu.dot_dimension_numbers<[1], [0], [0], [1], [0, 0, 1, 1], [], []>} : vector<8x4xbf16>, vector<4x32xbf16>, vector<8x32xf32> -> vector<8x32xf32>
    %cst_64 = arith.constant dense<0.000000e+00> : vector<8x32xf32>
    %92 = tpu.matmul %85, %68, %cst_64 {dimension_numbers = #tpu.dot_dimension_numbers<[1], [0], [0], [1], [0, 0, 1, 1], [], []>} : vector<8x64xbf16>, vector<64x32xbf16>, vector<8x32xf32> -> vector<8x32xf32>
    %93 = vector.broadcast %9 : vector<8x1xf32> to vector<8x32xf32>
    %94 = arith.mulf %91, %93 : vector<8x32xf32>
    %95 = arith.mulf %92, %94 : vector<8x32xf32>
    %cst_65 = arith.constant 0.000000e+00 : f32
    %96 = vector.broadcast %cst_65 : f32 to vector<8x32xf32>
    %97 = arith.maximumf %95, %96 : vector<8x32xf32>
    %c0_66 = arith.constant 0 : index
    %c0_67 = arith.constant 0 : index
    %98 = vector.load %arg24[%c0_66, %c0_67] : memref<1x32xbf16, #tpu.memory_space<vmem>>, vector<1x32xbf16>
    %cst_68 = arith.constant dense<0.000000e+00> : vector<1x64xf32>
    %99 = tpu.matmul %98, %68, %cst_68 {dimension_numbers = #tpu.dot_dimension_numbers<[1], [1], [0], [0], [0, 0, 1, 0], [], []>} : vector<1x32xbf16>, vector<64x32xbf16>, vector<1x64xf32> -> vector<1x64xf32>
    %cst_69 = arith.constant dense<0.000000e+00> : vector<16x64xf32>
    %100 = tpu.matmul %31, %16, %cst_69 {dimension_numbers = #tpu.dot_dimension_numbers<[1], [0], [0], [1], [0, 0, 1, 1], [], []>} : vector<16x40xbf16>, vector<40x64xbf16>, vector<16x64xf32> -> vector<16x64xf32>
    %101 = vector.broadcast %99 : vector<1x64xf32> to vector<16x64xf32>
    %102 = arith.addf %100, %101 : vector<16x64xf32>
    %cst_70 = arith.constant 0.000000e+00 : f32
    %103 = vector.broadcast %cst_70 : f32 to vector<16x64xf32>
    %104 = arith.cmpf oge, %102, %103 : vector<16x64xf32>
    %cst_71 = arith.constant 2.000000e-01 : f32
    %105 = vector.broadcast %cst_71 : f32 to vector<16x64xf32>
    %106 = arith.mulf %105, %102 : vector<16x64xf32>
    %107 = arith.select %104, %102, %106 : vector<16x64xi1>, vector<16x64xf32>
    %108 = arith.addf %107, %7 : vector<16x64xf32>
    %cst_72 = arith.constant dense<0xFF800000> : vector<16xf32>
    %109 = vector.multi_reduction <maximumf>, %108, %cst_72 [1] : vector<16x64xf32> to vector<16xf32>
    %110 = vector.shape_cast %109 : vector<16xf32> to vector<16x1xf32>
    %111 = vector.broadcast %110 : vector<16x1xf32> to vector<16x64xf32>
    %112 = arith.subf %108, %111 : vector<16x64xf32>
    %113 = math.exp %112 : vector<16x64xf32>
    %114 = arith.truncf %113 : vector<16x64xf32> to vector<16x64xbf16>
    %cst_73 = arith.constant dense<0.000000e+00> : vector<16x4xf32>
    %115 = tpu.matmul %114, %13, %cst_73 {dimension_numbers = #tpu.dot_dimension_numbers<[1], [1], [0], [0], [0, 0, 1, 0], [], []>} : vector<16x64xbf16>, vector<4x64xbf16>, vector<16x4xf32> -> vector<16x4xf32>
    %cst_74 = arith.constant 9.99999968E-21 : f32
    %116 = vector.broadcast %cst_74 : f32 to vector<16x4xf32>
    %117 = arith.maximumf %115, %116 : vector<16x4xf32>
    %118 = tpu.reciprocal %117 {approx = true} : vector<16x4xf32> -> vector<16x4xf32>
    %119 = arith.truncf %118 : vector<16x4xf32> to vector<16x4xbf16>
    %cst_75 = arith.constant dense<0.000000e+00> : vector<16x32xf32>
    %120 = tpu.matmul %119, %19, %cst_75 {dimension_numbers = #tpu.dot_dimension_numbers<[1], [0], [0], [1], [0, 0, 1, 1], [], []>} : vector<16x4xbf16>, vector<4x32xbf16>, vector<16x32xf32> -> vector<16x32xf32>
    %cst_76 = arith.constant dense<0.000000e+00> : vector<16x32xf32>
    %121 = tpu.matmul %114, %68, %cst_76 {dimension_numbers = #tpu.dot_dimension_numbers<[1], [0], [0], [1], [0, 0, 1, 1], [], []>} : vector<16x64xbf16>, vector<64x32xbf16>, vector<16x32xf32> -> vector<16x32xf32>
    %122 = vector.broadcast %10 : vector<16x1xf32> to vector<16x32xf32>
    %123 = arith.mulf %120, %122 : vector<16x32xf32>
    %124 = arith.mulf %121, %123 : vector<16x32xf32>
    %cst_77 = arith.constant 0.000000e+00 : f32
    %125 = vector.broadcast %cst_77 : f32 to vector<16x32xf32>
    %126 = arith.maximumf %124, %125 : vector<16x32xf32>
    %c0_78 = arith.constant 0 : index
    %c0_79 = arith.constant 0 : index
    %127 = vector.load %arg25[%c0_78, %c0_79] : memref<32x32xbf16, #tpu.memory_space<vmem>>, vector<32x32xbf16>
    %c0_80 = arith.constant 0 : index
    %c0_81 = arith.constant 0 : index
    %128 = vector.load %arg26[%c0_80, %c0_81] : memref<1x32xf32, #tpu.memory_space<vmem>>, vector<1x32xf32>
    %c0_82 = arith.constant 0 : index
    %c0_83 = arith.constant 0 : index
    %129 = vector.load %arg27[%c0_82, %c0_83] : memref<1x32xf32, #tpu.memory_space<vmem>>, vector<1x32xf32>
    %130 = arith.truncf %97 : vector<8x32xf32> to vector<8x32xbf16>
    %cst_84 = arith.constant dense<0.000000e+00> : vector<8x32xf32>
    %131 = tpu.matmul %130, %127, %cst_84 {dimension_numbers = #tpu.dot_dimension_numbers<[1], [0], [0], [1], [0, 0, 1, 1], [], []>} : vector<8x32xbf16>, vector<32x32xbf16>, vector<8x32xf32> -> vector<8x32xf32>
    %132 = vector.broadcast %128 : vector<1x32xf32> to vector<8x32xf32>
    %133 = arith.addf %131, %132 : vector<8x32xf32>
    %134 = math.tanh %133 : vector<8x32xf32>
    %cst_85 = arith.constant dense<0.000000e+00> : vector<32xf32>
    %135 = vector.multi_reduction <add>, %134, %cst_85 [0] : vector<8x32xf32> to vector<32xf32>
    %136 = vector.shape_cast %135 : vector<32xf32> to vector<1x32xf32>
    %cst_86 = arith.constant 1.250000e-01 : f32
    %137 = vector.broadcast %cst_86 : f32 to vector<1x32xf32>
    %138 = arith.mulf %136, %137 : vector<1x32xf32>
    %139 = arith.mulf %129, %138 : vector<1x32xf32>
    %cst_87 = arith.constant dense<0.000000e+00> : vector<1xf32>
    %140 = vector.multi_reduction <add>, %139, %cst_87 [1] : vector<1x32xf32> to vector<1xf32>
    %141 = vector.shape_cast %140 : vector<1xf32> to vector<1x1xf32>
    %142 = arith.subf %141, %141 : vector<1x1xf32>
    %143 = math.exp %142 : vector<1x1xf32>
    %144 = tpu.reciprocal %143 {approx = true} : vector<1x1xf32> -> vector<1x1xf32>
    %145 = arith.mulf %143, %144 : vector<1x1xf32>
    %146 = vector.broadcast %145 : vector<1x1xf32> to vector<8x32xf32>
    %147 = arith.mulf %146, %97 : vector<8x32xf32>
    %cst_88 = arith.constant 0.000000e+00 : f32
    %148 = vector.broadcast %cst_88 : f32 to vector<8x32xf32>
    %149 = arith.maximumf %147, %148 : vector<8x32xf32>
    %150 = arith.truncf %64 : vector<16x32xf32> to vector<16x32xbf16>
    %cst_89 = arith.constant dense<0.000000e+00> : vector<16x32xf32>
    %151 = tpu.matmul %150, %127, %cst_89 {dimension_numbers = #tpu.dot_dimension_numbers<[1], [0], [0], [1], [0, 0, 1, 1], [], []>} : vector<16x32xbf16>, vector<32x32xbf16>, vector<16x32xf32> -> vector<16x32xf32>
    %152 = vector.broadcast %128 : vector<1x32xf32> to vector<16x32xf32>
    %153 = arith.addf %151, %152 : vector<16x32xf32>
    %154 = math.tanh %153 : vector<16x32xf32>
    %cst_90 = arith.constant dense<0.000000e+00> : vector<32xf32>
    %155 = vector.multi_reduction <add>, %154, %cst_90 [0] : vector<16x32xf32> to vector<32xf32>
    %156 = vector.shape_cast %155 : vector<32xf32> to vector<1x32xf32>
    %cst_91 = arith.constant 6.250000e-02 : f32
    %157 = vector.broadcast %cst_91 : f32 to vector<1x32xf32>
    %158 = arith.mulf %156, %157 : vector<1x32xf32>
    %159 = arith.mulf %129, %158 : vector<1x32xf32>
    %cst_92 = arith.constant dense<0.000000e+00> : vector<1xf32>
    %160 = vector.multi_reduction <add>, %159, %cst_92 [1] : vector<1x32xf32> to vector<1xf32>
    %161 = vector.shape_cast %160 : vector<1xf32> to vector<1x1xf32>
    %162 = arith.truncf %126 : vector<16x32xf32> to vector<16x32xbf16>
    %cst_93 = arith.constant dense<0.000000e+00> : vector<16x32xf32>
    %163 = tpu.matmul %162, %127, %cst_93 {dimension_numbers = #tpu.dot_dimension_numbers<[1], [0], [0], [1], [0, 0, 1, 1], [], []>} : vector<16x32xbf16>, vector<32x32xbf16>, vector<16x32xf32> -> vector<16x32xf32>
    %164 = vector.broadcast %128 : vector<1x32xf32> to vector<16x32xf32>
    %165 = arith.addf %163, %164 : vector<16x32xf32>
    %166 = math.tanh %165 : vector<16x32xf32>
    %cst_94 = arith.constant dense<0.000000e+00> : vector<32xf32>
    %167 = vector.multi_reduction <add>, %166, %cst_94 [0] : vector<16x32xf32> to vector<32xf32>
    %168 = vector.shape_cast %167 : vector<32xf32> to vector<1x32xf32>
    %cst_95 = arith.constant 6.250000e-02 : f32
    %169 = vector.broadcast %cst_95 : f32 to vector<1x32xf32>
    %170 = arith.mulf %168, %169 : vector<1x32xf32>
    %171 = arith.mulf %129, %170 : vector<1x32xf32>
    %cst_96 = arith.constant dense<0.000000e+00> : vector<1xf32>
    %172 = vector.multi_reduction <add>, %171, %cst_96 [1] : vector<1x32xf32> to vector<1xf32>
    %173 = vector.shape_cast %172 : vector<1xf32> to vector<1x1xf32>
    %174 = arith.maximumf %161, %173 : vector<1x1xf32>
    %175 = arith.subf %161, %174 : vector<1x1xf32>
    %176 = math.exp %175 : vector<1x1xf32>
    %177 = arith.subf %173, %174 : vector<1x1xf32>
    %178 = math.exp %177 : vector<1x1xf32>
    %179 = arith.addf %176, %178 : vector<1x1xf32>
    %180 = tpu.reciprocal %179 {approx = true} : vector<1x1xf32> -> vector<1x1xf32>
    %181 = arith.mulf %176, %180 : vector<1x1xf32>
    %182 = vector.broadcast %181 : vector<1x1xf32> to vector<16x32xf32>
    %183 = arith.mulf %182, %64 : vector<16x32xf32>
    %184 = arith.mulf %178, %180 : vector<1x1xf32>
    %185 = vector.broadcast %184 : vector<1x1xf32> to vector<16x32xf32>
    %186 = arith.mulf %185, %126 : vector<16x32xf32>
    %187 = arith.addf %183, %186 : vector<16x32xf32>
    %cst_97 = arith.constant 0.000000e+00 : f32
    %188 = vector.broadcast %cst_97 : f32 to vector<16x32xf32>
    %189 = arith.maximumf %187, %188 : vector<16x32xf32>
    %190 = arith.truncf %149 : vector<8x32xf32> to vector<8x32xbf16>
    %c0_98 = arith.constant 0 : index
    %c0_99 = arith.constant 0 : index
    %191 = vector.load %arg28[%c0_98, %c0_99] : memref<32x36xbf16, #tpu.memory_space<vmem>>, vector<32x36xbf16>
    %cst_100 = arith.constant dense<0.000000e+00> : vector<8x36xf32>
    %192 = tpu.matmul %190, %191, %cst_100 {dimension_numbers = #tpu.dot_dimension_numbers<[1], [0], [0], [1], [0, 0, 1, 1], [], []>} : vector<8x32xbf16>, vector<32x36xbf16>, vector<8x36xf32> -> vector<8x36xf32>
    %c0_101 = arith.constant 0 : index
    %c0_102 = arith.constant 0 : index
    %193 = vector.load %arg30[%c0_101, %c0_102] : memref<1x36xf32, #tpu.memory_space<vmem>>, vector<1x36xf32>
    %194 = vector.broadcast %193 : vector<1x36xf32> to vector<8x36xf32>
    %195 = arith.addf %192, %194 : vector<8x36xf32>
    %196 = arith.truncf %195 : vector<8x36xf32> to vector<8x36xbf16>
    %197 = arith.truncf %189 : vector<16x32xf32> to vector<16x32xbf16>
    %c0_103 = arith.constant 0 : index
    %c0_104 = arith.constant 0 : index
    %198 = vector.load %arg29[%c0_103, %c0_104] : memref<32x40xbf16, #tpu.memory_space<vmem>>, vector<32x40xbf16>
    %cst_105 = arith.constant dense<0.000000e+00> : vector<16x40xf32>
    %199 = tpu.matmul %197, %198, %cst_105 {dimension_numbers = #tpu.dot_dimension_numbers<[1], [0], [0], [1], [0, 0, 1, 1], [], []>} : vector<16x32xbf16>, vector<32x40xbf16>, vector<16x40xf32> -> vector<16x40xf32>
    %c0_106 = arith.constant 0 : index
    %c0_107 = arith.constant 0 : index
    %200 = vector.load %arg31[%c0_106, %c0_107] : memref<1x40xf32, #tpu.memory_space<vmem>>, vector<1x40xf32>
    %201 = vector.broadcast %200 : vector<1x40xf32> to vector<16x40xf32>
    %202 = arith.addf %199, %201 : vector<16x40xf32>
    %203 = arith.truncf %202 : vector<16x40xf32> to vector<16x40xbf16>
    %204 = vector.extract_strided_slice %195 {offsets = [0, 0], sizes = [8, 32], strides = [1, 1]} : vector<8x36xf32> to vector<8x32xf32>
    %205 = tpu.concatenate %204, %204, %204, %204 in 0 : vector<8x32xf32>, vector<8x32xf32>, vector<8x32xf32>, vector<8x32xf32> -> vector<32x32xf32>
    %206 = arith.mulf %205, %17 : vector<32x32xf32>
    %207 = arith.truncf %206 : vector<32x32xf32> to vector<32x32xbf16>
    %c0_108 = arith.constant 0 : index
    %c0_109 = arith.constant 0 : index
    %208 = vector.load %arg32[%c0_108, %c0_109] : memref<1x32xbf16, #tpu.memory_space<vmem>>, vector<1x32xbf16>
    %cst_110 = arith.constant dense<0.000000e+00> : vector<1x32xf32>
    %209 = tpu.matmul %208, %207, %cst_110 {dimension_numbers = #tpu.dot_dimension_numbers<[1], [1], [0], [0], [0, 0, 1, 0], [], []>} : vector<1x32xbf16>, vector<32x32xbf16>, vector<1x32xf32> -> vector<1x32xf32>
    %cst_111 = arith.constant dense<0.000000e+00> : vector<16x32xf32>
    %210 = tpu.matmul %203, %14, %cst_111 {dimension_numbers = #tpu.dot_dimension_numbers<[1], [0], [0], [1], [0, 0, 1, 1], [], []>} : vector<16x40xbf16>, vector<40x32xbf16>, vector<16x32xf32> -> vector<16x32xf32>
    %211 = vector.broadcast %209 : vector<1x32xf32> to vector<16x32xf32>
    %212 = arith.addf %210, %211 : vector<16x32xf32>
    %cst_112 = arith.constant 0.000000e+00 : f32
    %213 = vector.broadcast %cst_112 : f32 to vector<16x32xf32>
    %214 = arith.cmpf oge, %212, %213 : vector<16x32xf32>
    %cst_113 = arith.constant 2.000000e-01 : f32
    %215 = vector.broadcast %cst_113 : f32 to vector<16x32xf32>
    %216 = arith.mulf %215, %212 : vector<16x32xf32>
    %217 = arith.select %214, %212, %216 : vector<16x32xi1>, vector<16x32xf32>
    %218 = arith.addf %217, %3 : vector<16x32xf32>
    %cst_114 = arith.constant dense<0xFF800000> : vector<16xf32>
    %219 = vector.multi_reduction <maximumf>, %218, %cst_114 [1] : vector<16x32xf32> to vector<16xf32>
    %220 = vector.shape_cast %219 : vector<16xf32> to vector<16x1xf32>
    %221 = vector.broadcast %220 : vector<16x1xf32> to vector<16x32xf32>
    %222 = arith.subf %218, %221 : vector<16x32xf32>
    %223 = math.exp %222 : vector<16x32xf32>
    %224 = arith.truncf %223 : vector<16x32xf32> to vector<16x32xbf16>
    %cst_115 = arith.constant dense<0.000000e+00> : vector<16x4xf32>
    %225 = tpu.matmul %224, %11, %cst_115 {dimension_numbers = #tpu.dot_dimension_numbers<[1], [1], [0], [0], [0, 0, 1, 0], [], []>} : vector<16x32xbf16>, vector<4x32xbf16>, vector<16x4xf32> -> vector<16x4xf32>
    %cst_116 = arith.constant 9.99999968E-21 : f32
    %226 = vector.broadcast %cst_116 : f32 to vector<16x4xf32>
    %227 = arith.maximumf %225, %226 : vector<16x4xf32>
    %228 = tpu.reciprocal %227 {approx = true} : vector<16x4xf32> -> vector<16x4xf32>
    %229 = arith.truncf %228 : vector<16x4xf32> to vector<16x4xbf16>
    %cst_117 = arith.constant dense<0.000000e+00> : vector<16x32xf32>
    %230 = tpu.matmul %229, %19, %cst_117 {dimension_numbers = #tpu.dot_dimension_numbers<[1], [0], [0], [1], [0, 0, 1, 1], [], []>} : vector<16x4xbf16>, vector<4x32xbf16>, vector<16x32xf32> -> vector<16x32xf32>
    %cst_118 = arith.constant dense<0.000000e+00> : vector<16x32xf32>
    %231 = tpu.matmul %224, %207, %cst_118 {dimension_numbers = #tpu.dot_dimension_numbers<[1], [0], [0], [1], [0, 0, 1, 1], [], []>} : vector<16x32xbf16>, vector<32x32xbf16>, vector<16x32xf32> -> vector<16x32xf32>
    %232 = vector.broadcast %8 : vector<16x1xf32> to vector<16x32xf32>
    %233 = arith.mulf %230, %232 : vector<16x32xf32>
    %234 = arith.mulf %231, %233 : vector<16x32xf32>
    %cst_119 = arith.constant 0.000000e+00 : f32
    %235 = vector.broadcast %cst_119 : f32 to vector<16x32xf32>
    %236 = arith.maximumf %234, %235 : vector<16x32xf32>
    %237 = vector.extract_strided_slice %202 {offsets = [0, 0], sizes = [16, 32], strides = [1, 1]} : vector<16x40xf32> to vector<16x32xf32>
    %238 = tpu.concatenate %237, %237, %237, %237 in 0 : vector<16x32xf32>, vector<16x32xf32>, vector<16x32xf32>, vector<16x32xf32> -> vector<64x32xf32>
    %239 = arith.mulf %238, %18 : vector<64x32xf32>
    %240 = arith.truncf %239 : vector<64x32xf32> to vector<64x32xbf16>
    %c0_120 = arith.constant 0 : index
    %c0_121 = arith.constant 0 : index
    %241 = vector.load %arg33[%c0_120, %c0_121] : memref<1x32xbf16, #tpu.memory_space<vmem>>, vector<1x32xbf16>
    %cst_122 = arith.constant dense<0.000000e+00> : vector<1x64xf32>
    %242 = tpu.matmul %241, %240, %cst_122 {dimension_numbers = #tpu.dot_dimension_numbers<[1], [1], [0], [0], [0, 0, 1, 0], [], []>} : vector<1x32xbf16>, vector<64x32xbf16>, vector<1x64xf32> -> vector<1x64xf32>
    %cst_123 = arith.constant dense<0.000000e+00> : vector<8x64xf32>
    %243 = tpu.matmul %196, %15, %cst_123 {dimension_numbers = #tpu.dot_dimension_numbers<[1], [0], [0], [1], [0, 0, 1, 1], [], []>} : vector<8x36xbf16>, vector<36x64xbf16>, vector<8x64xf32> -> vector<8x64xf32>
    %244 = vector.broadcast %242 : vector<1x64xf32> to vector<8x64xf32>
    %245 = arith.addf %243, %244 : vector<8x64xf32>
    %cst_124 = arith.constant 0.000000e+00 : f32
    %246 = vector.broadcast %cst_124 : f32 to vector<8x64xf32>
    %247 = arith.cmpf oge, %245, %246 : vector<8x64xf32>
    %cst_125 = arith.constant 2.000000e-01 : f32
    %248 = vector.broadcast %cst_125 : f32 to vector<8x64xf32>
    %249 = arith.mulf %248, %245 : vector<8x64xf32>
    %250 = arith.select %247, %245, %249 : vector<8x64xi1>, vector<8x64xf32>
    %251 = arith.addf %250, %5 : vector<8x64xf32>
    %cst_126 = arith.constant dense<0xFF800000> : vector<8xf32>
    %252 = vector.multi_reduction <maximumf>, %251, %cst_126 [1] : vector<8x64xf32> to vector<8xf32>
    %253 = vector.shape_cast %252 : vector<8xf32> to vector<8x1xf32>
    %254 = vector.broadcast %253 : vector<8x1xf32> to vector<8x64xf32>
    %255 = arith.subf %251, %254 : vector<8x64xf32>
    %256 = math.exp %255 : vector<8x64xf32>
    %257 = arith.truncf %256 : vector<8x64xf32> to vector<8x64xbf16>
    %cst_127 = arith.constant dense<0.000000e+00> : vector<8x4xf32>
    %258 = tpu.matmul %257, %12, %cst_127 {dimension_numbers = #tpu.dot_dimension_numbers<[1], [1], [0], [0], [0, 0, 1, 0], [], []>} : vector<8x64xbf16>, vector<4x64xbf16>, vector<8x4xf32> -> vector<8x4xf32>
    %cst_128 = arith.constant 9.99999968E-21 : f32
    %259 = vector.broadcast %cst_128 : f32 to vector<8x4xf32>
    %260 = arith.maximumf %258, %259 : vector<8x4xf32>
    %261 = tpu.reciprocal %260 {approx = true} : vector<8x4xf32> -> vector<8x4xf32>
    %262 = arith.truncf %261 : vector<8x4xf32> to vector<8x4xbf16>
    %cst_129 = arith.constant dense<0.000000e+00> : vector<8x32xf32>
    %263 = tpu.matmul %262, %19, %cst_129 {dimension_numbers = #tpu.dot_dimension_numbers<[1], [0], [0], [1], [0, 0, 1, 1], [], []>} : vector<8x4xbf16>, vector<4x32xbf16>, vector<8x32xf32> -> vector<8x32xf32>
    %cst_130 = arith.constant dense<0.000000e+00> : vector<8x32xf32>
    %264 = tpu.matmul %257, %240, %cst_130 {dimension_numbers = #tpu.dot_dimension_numbers<[1], [0], [0], [1], [0, 0, 1, 1], [], []>} : vector<8x64xbf16>, vector<64x32xbf16>, vector<8x32xf32> -> vector<8x32xf32>
    %265 = vector.broadcast %9 : vector<8x1xf32> to vector<8x32xf32>
    %266 = arith.mulf %263, %265 : vector<8x32xf32>
    %267 = arith.mulf %264, %266 : vector<8x32xf32>
    %cst_131 = arith.constant 0.000000e+00 : f32
    %268 = vector.broadcast %cst_131 : f32 to vector<8x32xf32>
    %269 = arith.maximumf %267, %268 : vector<8x32xf32>
    %c0_132 = arith.constant 0 : index
    %c0_133 = arith.constant 0 : index
    %270 = vector.load %arg34[%c0_132, %c0_133] : memref<1x32xbf16, #tpu.memory_space<vmem>>, vector<1x32xbf16>
    %cst_134 = arith.constant dense<0.000000e+00> : vector<1x64xf32>
    %271 = tpu.matmul %270, %240, %cst_134 {dimension_numbers = #tpu.dot_dimension_numbers<[1], [1], [0], [0], [0, 0, 1, 0], [], []>} : vector<1x32xbf16>, vector<64x32xbf16>, vector<1x64xf32> -> vector<1x64xf32>
    %cst_135 = arith.constant dense<0.000000e+00> : vector<16x64xf32>
    %272 = tpu.matmul %203, %16, %cst_135 {dimension_numbers = #tpu.dot_dimension_numbers<[1], [0], [0], [1], [0, 0, 1, 1], [], []>} : vector<16x40xbf16>, vector<40x64xbf16>, vector<16x64xf32> -> vector<16x64xf32>
    %273 = vector.broadcast %271 : vector<1x64xf32> to vector<16x64xf32>
    %274 = arith.addf %272, %273 : vector<16x64xf32>
    %cst_136 = arith.constant 0.000000e+00 : f32
    %275 = vector.broadcast %cst_136 : f32 to vector<16x64xf32>
    %276 = arith.cmpf oge, %274, %275 : vector<16x64xf32>
    %cst_137 = arith.constant 2.000000e-01 : f32
    %277 = vector.broadcast %cst_137 : f32 to vector<16x64xf32>
    %278 = arith.mulf %277, %274 : vector<16x64xf32>
    %279 = arith.select %276, %274, %278 : vector<16x64xi1>, vector<16x64xf32>
    %280 = arith.addf %279, %7 : vector<16x64xf32>
    %cst_138 = arith.constant dense<0xFF800000> : vector<16xf32>
    %281 = vector.multi_reduction <maximumf>, %280, %cst_138 [1] : vector<16x64xf32> to vector<16xf32>
    %282 = vector.shape_cast %281 : vector<16xf32> to vector<16x1xf32>
    %283 = vector.broadcast %282 : vector<16x1xf32> to vector<16x64xf32>
    %284 = arith.subf %280, %283 : vector<16x64xf32>
    %285 = math.exp %284 : vector<16x64xf32>
    %286 = arith.truncf %285 : vector<16x64xf32> to vector<16x64xbf16>
    %cst_139 = arith.constant dense<0.000000e+00> : vector<16x4xf32>
    %287 = tpu.matmul %286, %13, %cst_139 {dimension_numbers = #tpu.dot_dimension_numbers<[1], [1], [0], [0], [0, 0, 1, 0], [], []>} : vector<16x64xbf16>, vector<4x64xbf16>, vector<16x4xf32> -> vector<16x4xf32>
    %cst_140 = arith.constant 9.99999968E-21 : f32
    %288 = vector.broadcast %cst_140 : f32 to vector<16x4xf32>
    %289 = arith.maximumf %287, %288 : vector<16x4xf32>
    %290 = tpu.reciprocal %289 {approx = true} : vector<16x4xf32> -> vector<16x4xf32>
    %291 = arith.truncf %290 : vector<16x4xf32> to vector<16x4xbf16>
    %cst_141 = arith.constant dense<0.000000e+00> : vector<16x32xf32>
    %292 = tpu.matmul %291, %19, %cst_141 {dimension_numbers = #tpu.dot_dimension_numbers<[1], [0], [0], [1], [0, 0, 1, 1], [], []>} : vector<16x4xbf16>, vector<4x32xbf16>, vector<16x32xf32> -> vector<16x32xf32>
    %cst_142 = arith.constant dense<0.000000e+00> : vector<16x32xf32>
    %293 = tpu.matmul %286, %240, %cst_142 {dimension_numbers = #tpu.dot_dimension_numbers<[1], [0], [0], [1], [0, 0, 1, 1], [], []>} : vector<16x64xbf16>, vector<64x32xbf16>, vector<16x32xf32> -> vector<16x32xf32>
    %294 = vector.broadcast %10 : vector<16x1xf32> to vector<16x32xf32>
    %295 = arith.mulf %292, %294 : vector<16x32xf32>
    %296 = arith.mulf %293, %295 : vector<16x32xf32>
    %cst_143 = arith.constant 0.000000e+00 : f32
    %297 = vector.broadcast %cst_143 : f32 to vector<16x32xf32>
    %298 = arith.maximumf %296, %297 : vector<16x32xf32>
    %c0_144 = arith.constant 0 : index
    %c0_145 = arith.constant 0 : index
    %299 = vector.load %arg35[%c0_144, %c0_145] : memref<32x32xbf16, #tpu.memory_space<vmem>>, vector<32x32xbf16>
    %c0_146 = arith.constant 0 : index
    %c0_147 = arith.constant 0 : index
    %300 = vector.load %arg36[%c0_146, %c0_147] : memref<1x32xf32, #tpu.memory_space<vmem>>, vector<1x32xf32>
    %c0_148 = arith.constant 0 : index
    %c0_149 = arith.constant 0 : index
    %301 = vector.load %arg37[%c0_148, %c0_149] : memref<1x32xf32, #tpu.memory_space<vmem>>, vector<1x32xf32>
    %302 = arith.truncf %269 : vector<8x32xf32> to vector<8x32xbf16>
    %cst_150 = arith.constant dense<0.000000e+00> : vector<8x32xf32>
    %303 = tpu.matmul %302, %299, %cst_150 {dimension_numbers = #tpu.dot_dimension_numbers<[1], [0], [0], [1], [0, 0, 1, 1], [], []>} : vector<8x32xbf16>, vector<32x32xbf16>, vector<8x32xf32> -> vector<8x32xf32>
    %304 = vector.broadcast %300 : vector<1x32xf32> to vector<8x32xf32>
    %305 = arith.addf %303, %304 : vector<8x32xf32>
    %306 = math.tanh %305 : vector<8x32xf32>
    %cst_151 = arith.constant dense<0.000000e+00> : vector<32xf32>
    %307 = vector.multi_reduction <add>, %306, %cst_151 [0] : vector<8x32xf32> to vector<32xf32>
    %308 = vector.shape_cast %307 : vector<32xf32> to vector<1x32xf32>
    %cst_152 = arith.constant 1.250000e-01 : f32
    %309 = vector.broadcast %cst_152 : f32 to vector<1x32xf32>
    %310 = arith.mulf %308, %309 : vector<1x32xf32>
    %311 = arith.mulf %301, %310 : vector<1x32xf32>
    %cst_153 = arith.constant dense<0.000000e+00> : vector<1xf32>
    %312 = vector.multi_reduction <add>, %311, %cst_153 [1] : vector<1x32xf32> to vector<1xf32>
    %313 = vector.shape_cast %312 : vector<1xf32> to vector<1x1xf32>
    %314 = arith.subf %313, %313 : vector<1x1xf32>
    %315 = math.exp %314 : vector<1x1xf32>
    %316 = tpu.reciprocal %315 {approx = true} : vector<1x1xf32> -> vector<1x1xf32>
    %317 = arith.mulf %315, %316 : vector<1x1xf32>
    %318 = vector.broadcast %317 : vector<1x1xf32> to vector<8x32xf32>
    %319 = arith.mulf %318, %269 : vector<8x32xf32>
    %320 = arith.truncf %236 : vector<16x32xf32> to vector<16x32xbf16>
    %cst_154 = arith.constant dense<0.000000e+00> : vector<16x32xf32>
    %321 = tpu.matmul %320, %299, %cst_154 {dimension_numbers = #tpu.dot_dimension_numbers<[1], [0], [0], [1], [0, 0, 1, 1], [], []>} : vector<16x32xbf16>, vector<32x32xbf16>, vector<16x32xf32> -> vector<16x32xf32>
    %322 = vector.broadcast %300 : vector<1x32xf32> to vector<16x32xf32>
    %323 = arith.addf %321, %322 : vector<16x32xf32>
    %324 = math.tanh %323 : vector<16x32xf32>
    %cst_155 = arith.constant dense<0.000000e+00> : vector<32xf32>
    %325 = vector.multi_reduction <add>, %324, %cst_155 [0] : vector<16x32xf32> to vector<32xf32>
    %326 = vector.shape_cast %325 : vector<32xf32> to vector<1x32xf32>
    %cst_156 = arith.constant 6.250000e-02 : f32
    %327 = vector.broadcast %cst_156 : f32 to vector<1x32xf32>
    %328 = arith.mulf %326, %327 : vector<1x32xf32>
    %329 = arith.mulf %301, %328 : vector<1x32xf32>
    %cst_157 = arith.constant dense<0.000000e+00> : vector<1xf32>
    %330 = vector.multi_reduction <add>, %329, %cst_157 [1] : vector<1x32xf32> to vector<1xf32>
    %331 = vector.shape_cast %330 : vector<1xf32> to vector<1x1xf32>
    %332 = arith.truncf %298 : vector<16x32xf32> to vector<16x32xbf16>
    %cst_158 = arith.constant dense<0.000000e+00> : vector<16x32xf32>
    %333 = tpu.matmul %332, %299, %cst_158 {dimension_numbers = #tpu.dot_dimension_numbers<[1], [0], [0], [1], [0, 0, 1, 1], [], []>} : vector<16x32xbf16>, vector<32x32xbf16>, vector<16x32xf32> -> vector<16x32xf32>
    %334 = vector.broadcast %300 : vector<1x32xf32> to vector<16x32xf32>
    %335 = arith.addf %333, %334 : vector<16x32xf32>
    %336 = math.tanh %335 : vector<16x32xf32>
    %cst_159 = arith.constant dense<0.000000e+00> : vector<32xf32>
    %337 = vector.multi_reduction <add>, %336, %cst_159 [0] : vector<16x32xf32> to vector<32xf32>
    %338 = vector.shape_cast %337 : vector<32xf32> to vector<1x32xf32>
    %cst_160 = arith.constant 6.250000e-02 : f32
    %339 = vector.broadcast %cst_160 : f32 to vector<1x32xf32>
    %340 = arith.mulf %338, %339 : vector<1x32xf32>
    %341 = arith.mulf %301, %340 : vector<1x32xf32>
    %cst_161 = arith.constant dense<0.000000e+00> : vector<1xf32>
    %342 = vector.multi_reduction <add>, %341, %cst_161 [1] : vector<1x32xf32> to vector<1xf32>
    %343 = vector.shape_cast %342 : vector<1xf32> to vector<1x1xf32>
    %344 = arith.maximumf %331, %343 : vector<1x1xf32>
    %345 = arith.subf %331, %344 : vector<1x1xf32>
    %346 = math.exp %345 : vector<1x1xf32>
    %347 = arith.subf %343, %344 : vector<1x1xf32>
    %348 = math.exp %347 : vector<1x1xf32>
    %349 = arith.addf %346, %348 : vector<1x1xf32>
    %350 = tpu.reciprocal %349 {approx = true} : vector<1x1xf32> -> vector<1x1xf32>
    %351 = arith.mulf %346, %350 : vector<1x1xf32>
    %352 = vector.broadcast %351 : vector<1x1xf32> to vector<16x32xf32>
    %353 = arith.mulf %352, %236 : vector<16x32xf32>
    %354 = arith.mulf %348, %350 : vector<1x1xf32>
    %355 = vector.broadcast %354 : vector<1x1xf32> to vector<16x32xf32>
    %356 = arith.mulf %355, %298 : vector<16x32xf32>
    %357 = arith.addf %353, %356 : vector<16x32xf32>
    %c0_162 = arith.constant 0 : index
    %c0_163 = arith.constant 0 : index
    %358 = vector.load %arg38[%c0_162, %c0_163] : memref<8x32xf32, #tpu.memory_space<vmem>>, vector<8x32xf32>
    tpu.vector_store %arg38[%c0_162, %c0_163], %319 {strides = array<i32>} : memref<8x32xf32, #tpu.memory_space<vmem>>, vector<8x32xf32>,
    %c0_164 = arith.constant 0 : index
    %c0_165 = arith.constant 0 : index
    %359 = vector.load %arg39[%c0_164, %c0_165] : memref<16x32xf32, #tpu.memory_space<vmem>>, vector<16x32xf32>
    tpu.vector_store %arg39[%c0_164, %c0_165], %357 {strides = array<i32>} : memref<16x32xf32, #tpu.memory_space<vmem>>, vector<16x32xf32>,
    return
  }
  func.func @transform_0(%arg0: i32) -> (i32, i32) {
    %c0_i32 = arith.constant 0 : i32
    %c0_i32_0 = arith.constant 0 : i32
    %c0_i32_1 = arith.constant 0 : i32
    return %c0_i32, %c0_i32_0 : i32, i32
  }
  func.func @transform_1(%arg0: i32) -> (i32, i32) {
    %c0_i32 = arith.constant 0 : i32
    %c0_i32_0 = arith.constant 0 : i32
    %c0_i32_1 = arith.constant 0 : i32
    return %c0_i32, %c0_i32_0 : i32, i32
  }
  func.func @transform_2(%arg0: i32) -> (i32, i32) {
    %c0_i32 = arith.constant 0 : i32
    %c0_i32_0 = arith.constant 0 : i32
    %c0_i32_1 = arith.constant 0 : i32
    return %c0_i32, %c0_i32_0 : i32, i32
  }
  func.func @transform_3(%arg0: i32) -> (i32, i32) {
    %c0_i32 = arith.constant 0 : i32
    %c0_i32_0 = arith.constant 0 : i32
    %c0_i32_1 = arith.constant 0 : i32
    return %c0_i32, %c0_i32_0 : i32, i32
  }
  func.func @transform_4(%arg0: i32) -> (i32, i32) {
    %c0_i32 = arith.constant 0 : i32
    %c0_i32_0 = arith.constant 0 : i32
    %c0_i32_1 = arith.constant 0 : i32
    return %c0_i32, %c0_i32_0 : i32, i32
  }
  func.func @transform_5(%arg0: i32) -> (i32, i32) {
    %c0_i32 = arith.constant 0 : i32
    %c0_i32_0 = arith.constant 0 : i32
    %c0_i32_1 = arith.constant 0 : i32
    return %c0_i32, %c0_i32_0 : i32, i32
  }
  func.func @transform_6(%arg0: i32) -> (i32, i32) {
    %c0_i32 = arith.constant 0 : i32
    %c0_i32_0 = arith.constant 0 : i32
    %c0_i32_1 = arith.constant 0 : i32
    return %c0_i32, %c0_i32_0 : i32, i32
  }
  func.func @transform_7(%arg0: i32) -> (i32, i32) {
    %c0_i32 = arith.constant 0 : i32
    %c0_i32_0 = arith.constant 0 : i32
    %c0_i32_1 = arith.constant 0 : i32
    return %c0_i32, %c0_i32_0 : i32, i32
  }
  func.func @transform_8(%arg0: i32) -> (i32, i32) {
    %c0_i32 = arith.constant 0 : i32
    %c0_i32_0 = arith.constant 0 : i32
    %c0_i32_1 = arith.constant 0 : i32
    return %c0_i32, %c0_i32_0 : i32, i32
  }
  func.func @transform_9(%arg0: i32) -> (i32, i32) {
    %c0_i32 = arith.constant 0 : i32
    %c0_i32_0 = arith.constant 0 : i32
    %c0_i32_1 = arith.constant 0 : i32
    return %c0_i32, %c0_i32_0 : i32, i32
  }
  func.func @transform_10(%arg0: i32) -> (i32, i32) {
    %c0_i32 = arith.constant 0 : i32
    %c0_i32_0 = arith.constant 0 : i32
    %c0_i32_1 = arith.constant 0 : i32
    return %c0_i32, %c0_i32_0 : i32, i32
  }
  func.func @transform_11(%arg0: i32) -> (i32, i32) {
    %c0_i32 = arith.constant 0 : i32
    %c0_i32_0 = arith.constant 0 : i32
    %c0_i32_1 = arith.constant 0 : i32
    return %c0_i32, %c0_i32_0 : i32, i32
  }
  func.func @transform_12(%arg0: i32) -> (i32, i32) {
    %c0_i32 = arith.constant 0 : i32
    %c0_i32_0 = arith.constant 0 : i32
    %c0_i32_1 = arith.constant 0 : i32
    return %c0_i32, %c0_i32_0 : i32, i32
  }
  func.func @transform_13(%arg0: i32) -> (i32, i32) {
    %c0_i32 = arith.constant 0 : i32
    %c0_i32_0 = arith.constant 0 : i32
    %c0_i32_1 = arith.constant 0 : i32
    return %c0_i32, %c0_i32_0 : i32, i32
  }
  func.func @transform_14(%arg0: i32) -> (i32, i32) {
    %c0_i32 = arith.constant 0 : i32
    %c0_i32_0 = arith.constant 0 : i32
    %c0_i32_1 = arith.constant 0 : i32
    return %c0_i32, %c0_i32_0 : i32, i32
  }
  func.func @transform_15(%arg0: i32) -> (i32, i32) {
    %c0_i32 = arith.constant 0 : i32
    %c0_i32_0 = arith.constant 0 : i32
    %c0_i32_1 = arith.constant 0 : i32
    return %c0_i32, %c0_i32_0 : i32, i32
  }
  func.func @transform_16(%arg0: i32) -> (i32, i32) {
    %c0_i32 = arith.constant 0 : i32
    %c0_i32_0 = arith.constant 0 : i32
    %c0_i32_1 = arith.constant 0 : i32
    return %c0_i32, %c0_i32_0 : i32, i32
  }
  func.func @transform_17(%arg0: i32) -> (i32, i32) {
    %c0_i32 = arith.constant 0 : i32
    %c0_i32_0 = arith.constant 0 : i32
    %c0_i32_1 = arith.constant 0 : i32
    return %c0_i32, %c0_i32_0 : i32, i32
  }
  func.func @transform_18(%arg0: i32) -> (i32, i32) {
    %c0_i32 = arith.constant 0 : i32
    %c0_i32_0 = arith.constant 0 : i32
    %c0_i32_1 = arith.constant 0 : i32
    return %c0_i32, %c0_i32_0 : i32, i32
  }
  func.func @transform_19(%arg0: i32) -> (i32, i32) {
    %c0_i32 = arith.constant 0 : i32
    %c0_i32_0 = arith.constant 0 : i32
    %c0_i32_1 = arith.constant 0 : i32
    return %c0_i32, %c0_i32_0 : i32, i32
  }
  func.func @transform_20(%arg0: i32) -> (i32, i32) {
    %c0_i32 = arith.constant 0 : i32
    %c0_i32_0 = arith.constant 0 : i32
    %c0_i32_1 = arith.constant 0 : i32
    return %c0_i32, %c0_i32_0 : i32, i32
  }
  func.func @transform_21(%arg0: i32) -> (i32, i32) {
    %c0_i32 = arith.constant 0 : i32
    %c0_i32_0 = arith.constant 0 : i32
    %c0_i32_1 = arith.constant 0 : i32
    return %c0_i32, %c0_i32_0 : i32, i32
  }
  func.func @transform_22(%arg0: i32) -> (i32, i32) {
    %c0_i32 = arith.constant 0 : i32
    %c0_i32_0 = arith.constant 0 : i32
    %c0_i32_1 = arith.constant 0 : i32
    return %c0_i32, %c0_i32_0 : i32, i32
  }
  func.func @transform_23(%arg0: i32) -> (i32, i32) {
    %c0_i32 = arith.constant 0 : i32
    %c0_i32_0 = arith.constant 0 : i32
    %c0_i32_1 = arith.constant 0 : i32
    return %c0_i32, %c0_i32_0 : i32, i32
  }
  func.func @transform_24(%arg0: i32) -> (i32, i32) {
    %c0_i32 = arith.constant 0 : i32
    %c0_i32_0 = arith.constant 0 : i32
    %c0_i32_1 = arith.constant 0 : i32
    return %c0_i32, %c0_i32_0 : i32, i32
  }
  func.func @transform_25(%arg0: i32) -> (i32, i32) {
    %c0_i32 = arith.constant 0 : i32
    %c0_i32_0 = arith.constant 0 : i32
    %c0_i32_1 = arith.constant 0 : i32
    return %c0_i32, %c0_i32_0 : i32, i32
  }
  func.func @transform_26(%arg0: i32) -> (i32, i32) {
    %c0_i32 = arith.constant 0 : i32
    %c0_i32_0 = arith.constant 0 : i32
    %c0_i32_1 = arith.constant 0 : i32
    return %c0_i32, %c0_i32_0 : i32, i32
  }
  func.func @transform_27(%arg0: i32) -> (i32, i32) {
    %c0_i32 = arith.constant 0 : i32
    %c0_i32_0 = arith.constant 0 : i32
    %c0_i32_1 = arith.constant 0 : i32
    return %c0_i32, %c0_i32_0 : i32, i32
  }
  func.func @transform_28(%arg0: i32) -> (i32, i32) {
    %c0_i32 = arith.constant 0 : i32
    %c0_i32_0 = arith.constant 0 : i32
    %c0_i32_1 = arith.constant 0 : i32
    return %c0_i32, %c0_i32_0 : i32, i32
  }
  func.func @transform_29(%arg0: i32) -> (i32, i32) {
    %c0_i32 = arith.constant 0 : i32
    %c0_i32_0 = arith.constant 0 : i32
    %c0_i32_1 = arith.constant 0 : i32
    return %c0_i32, %c0_i32_0 : i32, i32
  }
  func.func @transform_30(%arg0: i32) -> (i32, i32) {
    %c0_i32 = arith.constant 0 : i32
    %c0_i32_0 = arith.constant 0 : i32
    %c0_i32_1 = arith.constant 0 : i32
    return %c0_i32, %c0_i32_0 : i32, i32
  }
  func.func @transform_31(%arg0: i32) -> (i32, i32) {
    %c0_i32 = arith.constant 0 : i32
    %c0_i32_0 = arith.constant 0 : i32
    %c0_i32_1 = arith.constant 0 : i32
    return %c0_i32, %c0_i32_0 : i32, i32
  }
  func.func @transform_32(%arg0: i32) -> (i32, i32) {
    %c0_i32 = arith.constant 0 : i32
    %c0_i32_0 = arith.constant 0 : i32
    %c0_i32_1 = arith.constant 0 : i32
    return %c0_i32, %c0_i32_0 : i32, i32
  }
  func.func @transform_33(%arg0: i32) -> (i32, i32) {
    %c0_i32 = arith.constant 0 : i32
    %c0_i32_0 = arith.constant 0 : i32
    %c0_i32_1 = arith.constant 0 : i32
    return %c0_i32, %c0_i32_0 : i32, i32
  }
  func.func @transform_34(%arg0: i32) -> (i32, i32) {
    %c0_i32 = arith.constant 0 : i32
    %c0_i32_0 = arith.constant 0 : i32
    %c0_i32_1 = arith.constant 0 : i32
    return %c0_i32, %c0_i32_0 : i32, i32
  }
  func.func @transform_35(%arg0: i32) -> (i32, i32) {
    %c0_i32 = arith.constant 0 : i32
    %c0_i32_0 = arith.constant 0 : i32
    %c0_i32_1 = arith.constant 0 : i32
    return %c0_i32, %c0_i32_0 : i32, i32
  }
  func.func @transform_36(%arg0: i32) -> (i32, i32) {
    %c0_i32 = arith.constant 0 : i32
    %c0_i32_0 = arith.constant 0 : i32
    %c0_i32_1 = arith.constant 0 : i32
    return %c0_i32, %c0_i32_0 : i32, i32
  }
  func.func @transform_37(%arg0: i32) -> (i32, i32) {
    %c0_i32 = arith.constant 0 : i32
    %c0_i32_0 = arith.constant 0 : i32
    %c0_i32_1 = arith.constant 0 : i32
    return %c0_i32, %c0_i32_0 : i32, i32
  }
  func.func @transform_38(%arg0: i32) -> (i32, i32) {
    %c0_i32 = arith.constant 0 : i32
    %c0_i32_0 = arith.constant 0 : i32
    %c0_i32_1 = arith.constant 0 : i32
    return %c0_i32, %c0_i32_0 : i32, i32
  }
}

</mosaic_0001>

<bundles_post_ra>
// kernel: tpu_custom_call.1
= control target key start
LH: loop header
LB: loop body
LE: loop exit
PB: predicated region body
PF: predicated region fallthrough
CT: control target
= control target key end

     0   :  { %s4761_s6 = smov 1   ;;  %s4762_s10 = smov 2   ;;  %s5830_s0 = inlined_call_operand.smem [shape: u32[39], index: -1, kind: input, shape index: {}] }
   0x1   :  { %s4853_s5 = sld [smem:[%s5830_s0]]   ;;  %s4763_s14 = smov 3  }
   0x2   :  { %s4858_s9 = sld [smem:[%s5830_s0 + %s4761_s6]]   ;;  %s4764_s18 = smov 4  }
   0x3   :  { %s4863_s13 = sld [smem:[%s5830_s0 + %s4762_s10]]   ;;  %s4765_s22 = smov 5  }
   0x4   :  { %s4868_s17 = sld [smem:[%s5830_s0 + %s4763_s14]]   ;;  %s4766_s26 = smov 6  }
   0x5   :  { %s4873_s21 = sld [smem:[%s5830_s0 + %s4764_s18]]   ;;  %s4767_s30 = smov 7  }
   0x6   :  { %s4878_s25 = sld [smem:[%s5830_s0 + %s4765_s22]]   ;;  %s4768_s4 = smov 8  }
   0x7   :  { %5852 = sst [smem:[#allocation83_spill]] %s4853_s5  ;;  %s4769_s10 = smov 9  }
   0x8   :  { %s4883_s29 = sld [smem:[%s5830_s0 + %s4766_s26]]   ;;  %s4770_s15 = smov 10  }
   0x9   :  { %5853 = sst [smem:[#allocation84_spill]] %s4863_s13  ;;  %s4771_s20 = smov 11  }
   0xa   :  { %s4888_s3 = sld [smem:[%s5830_s0 + %s4767_s30]]   ;;  %s4772_s26 = smov 12  }
   0xb   :  { %5854 = sst [smem:[#allocation85_spill]] %s4873_s21  ;;  %s4773_s1 = smov 13  }
   0xc   :  { %s4893_s8 = sld [smem:[%s5830_s0 + %s4768_s4]]   ;;  %s4774_s7 = smov 14  }
   0xd   :  { %s4898_s14 = sld [smem:[%s5830_s0 + %s4769_s10]]   ;;  %s4776_s22 = smov 16  }
   0xe   :  { %5855 = sst [smem:[#allocation86_spill]] %s4883_s29  ;;  %s4777_s28 = smov 17  }
   0xf   :  { %s4903_s19 = sld [smem:[%s5830_s0 + %s4770_s15]]   ;;  %s4775_s15 = smov 15  }
  0x10   :  { %s4908_s24 = sld [smem:[%s5830_s0 + %s4771_s20]]  }
  0x11   :  { %s4913_s30 = sld [smem:[%s5830_s0 + %s4772_s26]]  }
  0x12   :  { %5856 = sst [smem:[#allocation87_spill]] %s4893_s8 }
  0x13   :  { %s4918_s6 = sld [smem:[%s5830_s0 + %s4773_s1]]  }
  0x14   :  { %s4923_s12 = sld [smem:[%s5830_s0 + %s4774_s7]]   ;;  %s4778_s7 = smov 18  }
  0x15   :  { %5857 = sst [smem:[#allocation88_spill]] %s4903_s19 }
  0x16   :  { %s4928_s20 = sld [smem:[%s5830_s0 + %s4775_s15]]   ;;  %s4779_s15 = smov 19  }
  0x17   :  { %5858 = sst [smem:[#allocation89_spill]] %s4913_s30 }
  0x18   :  { %s4933_s27 = sld [smem:[%s5830_s0 + %s4776_s22]]   ;;  %s4780_s22 = smov 20  }
  0x19   :  { %s4938_s4 = sld [smem:[%s5830_s0 + %s4777_s28]]   ;;  %s4781_s28 = smov 21  }
  0x1a   :  { %5859 = sst [smem:[#allocation90_spill]] %s4923_s12 }
  0x1b   :  { %s4943_s12 = sld [smem:[%s5830_s0 + %s4778_s7]]   ;;  %s4782_s7 = smov 22  }
  0x1c   :  { %s4948_s30 = sld [smem:[%s5830_s0 + %s4779_s15]]   ;;  %s4783_s15 = smov 23  }
  0x1d   :  { %s4958_s19 = sld [smem:[%s5830_s0 + %s4781_s28]]   ;;  %s4785_s28 = smov 25  }
  0x1e   :  { %5860 = sst [smem:[#allocation91_spill]] %s4933_s27 }
  0x1f   :  { %s4953_s27 = sld [smem:[%s5830_s0 + %s4780_s22]]   ;;  %s4784_s22 = smov 24  }
  0x20   :  { %s4968_s8 = sld [smem:[%s5830_s0 + %s4783_s15]]   ;;  %s4787_s15 = smov 27  }
  0x21   :  { %5861 = sst [smem:[#allocation92_spill]] %s4943_s12 }
  0x22   :  { %s4963_s12 = sld [smem:[%s5830_s0 + %s4782_s7]]   ;;  %s4786_s7 = smov 26  }
  0x23   :  { %s4978_s29 = sld [smem:[%s5830_s0 + %s4785_s28]]   ;;  %s4789_s28 = smov 29  }
  0x24   :  { %s4988_s21 = sld [smem:[%s5830_s0 + %s4787_s15]]   ;;  %s4791_s15 = smov 31  }
  0x25   :  { %5862 = sst [smem:[#allocation93_spill]] %s4953_s27 }
  0x26   :  { %s4973_s27 = sld [smem:[%s5830_s0 + %s4784_s22]]   ;;  %s4788_s22 = smov 28  }
  0x27   :  { %s4998_s13 = sld [smem:[%s5830_s0 + %s4789_s28]]   ;;  %s4793_s28 = smov 33  }
  0x28   :  { %5863 = sst [smem:[#allocation94_spill]] %s4963_s12 }
  0x29   :  { %s4983_s12 = sld [smem:[%s5830_s0 + %s4786_s7]]   ;;  %s4790_s7 = smov 30  }
  0x2a   :  { %s5008_s5 = sld [smem:[%s5830_s0 + %s4791_s15]]   ;;  %s4795_s15 = smov 35  }
  0x2c   :  { %5864 = sst [smem:[#allocation95_spill]] %s4973_s27 }
  0x2d   :  { %s4993_s27 = sld [smem:[%s5830_s0 + %s4788_s22]]   ;;  %s4792_s22 = smov 32  }
  0x2e   :  { %5867 = sst [smem:[#allocation98_spill]] %s4998_s13 }
  0x2f   :  { %5865 = sst [smem:[#allocation96_spill]] %s4983_s12 }
  0x30   :  { %s5003_s12 = sld [smem:[%s5830_s0 + %s4790_s7]]   ;;  %s4794_s7 = smov 34  }
  0x31   :  { %5869 = sst [smem:[#allocation100_spill]] %s5008_s5 }
  0x32   :  { %s5018_s13 = sld [smem:[%s5830_s0 + %s4793_s28]]   ;;  %s4797_s28 = smov 37  }
  0x33   :  { %5866 = sst [smem:[#allocation97_spill]] %s4993_s27 }
  0x34   :  { %s5013_s27 = sld [smem:[%s5830_s0 + %s4792_s22]]   ;;  %s4796_s22 = smov 36  }
  0x35   :  { %s5028_s5 = sld [smem:[%s5830_s0 + %s4795_s15]]  }
  0x36   :  { %5868 = sst [smem:[#allocation99_spill]] %s5003_s12 }
  0x37   :  { %s5023_s12 = sld [smem:[%s5830_s0 + %s4794_s7]]   ;;  %s4798_s7 = smov 38  }
  0x38   :  { %5871 = sst [smem:[#allocation102_spill]] %s5018_s13 }
  0x39   :  { %s5038_s13 = sld [smem:[%s5830_s0 + %s4797_s28]]  }
  0x3a   :  { %5870 = sst [smem:[#allocation101_spill]] %s5013_s27 }
  0x3b   :  { %s5033_s27 = sld [smem:[%s5830_s0 + %s4796_s22]]  }
  0x3d   :  { %5872 = sst [smem:[#allocation103_spill]] %s5023_s12 }
  0x3e   :  { %s5043_s12 = sld [smem:[%s5830_s0 + %s4798_s7]]  }
  0x3f   :  { %83 = vsyncpa [#allocation3], 0 }
  0x40   :  { %84 = vsyncpa [#allocation6], 0 }
  0x41   :  { %85 = vsyncpa [#allocation9], 0 }
  0x42   :  { %86 = vsyncpa [#allocation12], 0 }
  0x43   :  { %87 = vsyncpa [#allocation15], 0 }
  0x44   :  { %88 = vsyncpa [#allocation18], 0 }
  0x45   :  { %89 = vsyncpa [#allocation21], 0 }
  0x46   :  { %90 = vsyncpa [#allocation24], 0 }
  0x47   :  { %91 = vsyncpa [#allocation27], 0 }
  0x48   :  { %92 = vsyncpa [#allocation30], 0 }
  0x49   :  { %93 = vsyncpa [#allocation33], 0 }
  0x4a   :  { %94 = vsyncpa [#allocation36], 0 }
  0x4b   :  { %95 = vsyncpa [#allocation39], 0 }
  0x4c   :  { %96 = vsyncpa [#allocation42], 0 }
  0x4d   :  { %97 = vsyncpa [#allocation45], 0 }
  0x4e   :  { %98 = vsyncpa [#allocation48], 0 }
  0x4f   :  { %99 = vsyncpa [#allocation51], 0 }
  0x50   :  { %100 = vsyncpa [#allocation54], 0 }
  0x51   :  { %101 = vsyncpa [#allocation57], 0 }
  0x52   :  { %102 = vsyncpa [#allocation4], 0 }
  0x53   :  { %103 = vsyncpa [#allocation61], 0  ;;  %s4799_s0 = smov [#allocation5]   ;;  %s3861_s16 = scalar_lea.hbm %s4858_s9, 128 }
  0x54   :  { %s119_s15 = sshll.u32 %s4799_s0, 4  ;;  %p3862_p0 = scmp.ne.s32.totalorder %s4858_s9, %s3861_s16  ;;  %s120_s15 = int_to_ptr.vmem [resolvable:$true] %s119_s15 }
  0x55   :  { %p3865_p1 = scmp.lt.u32.totalorder %s3861_s16, %s4858_s9 }
  0x57   :  { %p3867_p2 = pnand %p3865_p1, %p3862_p0 }
  0x59   :  { %3870 = shalt.err (!%p3867_p2)
}
  0x5a   :  { %s3871_s18 = scalar_lea.vmem %s120_s15, 128  ;;  %p3876_p4 = scmp.lt.s32.totalorder %s120_s15, %s120_s15 }
  0x5b   :  { %p3872_p3 = scmp.ne.s32.totalorder %s120_s15, %s3871_s18  ;;  %p3877_p5 = scmp.lt.s32.totalorder %s3871_s18, %s3871_s18 }
  0x5d   :  { %p3878_p6 = por %p3877_p5, %p3876_p4 }
  0x5f   :  { %p3879_p7 = pnand %p3878_p6, %p3872_p3 }
  0x61   :  { %3882 = shalt.err (!%p3879_p7)
}
  0x62   :  { %s4800_s22 = smov 64   ;;  %s4801_s23 = smov 4  }
  0x63   :  { %125 = dma.hbm_to_vmem [thread:$0]  %s4858_s9, 128, %s120_s15, [#allocation6], %s4800_s22, %s4800_s22, %s4801_s23  }
  0x64   :  { %s4802_s26 = smov [#allocation8]   ;;  %s4803_s1 = smov [#allocation11]  }
  0x65   :  { %s144_s28 = sshll.u32 %s4802_s26, 4  ;;  %s165_s2 = sshll.u32 %s4803_s1, 4  ;;  %s145_s28 = int_to_ptr.vmem [resolvable:$true] %s144_s28  ;;  %s166_s2 = int_to_ptr.vmem [resolvable:$true] %s165_s2 }
  0x66   :  { %s3883_s7 = scalar_lea.hbm %s4868_s17, 64 }
  0x67   :  { %p3884_p8 = scmp.ne.s32.totalorder %s4868_s17, %s3883_s7  ;;  %p3887_p9 = scmp.lt.u32.totalorder %s3883_s7, %s4868_s17 }
  0x69   :  { %p3889_p10 = pnand %p3887_p9, %p3884_p8 }
  0x6b   :  { %3892 = shalt.err (!%p3889_p10)
}
  0x6c   :  { %s3893_s10 = scalar_lea.vmem %s145_s28, 64  ;;  %p3898_p12 = scmp.lt.s32.totalorder %s145_s28, %s145_s28 }
  0x6d   :  { %p3894_p11 = scmp.ne.s32.totalorder %s145_s28, %s3893_s10  ;;  %p3899_p13 = scmp.lt.s32.totalorder %s3893_s10, %s3893_s10 }
  0x6f   :  { %p3900_p0 = por %p3899_p13, %p3898_p12 }
  0x71   :  { %p3901_p1 = pnand %p3900_p0, %p3894_p11 }
  0x73   :  { %3904 = shalt.err (!%p3901_p1)
}
  0x74   :  { %147 = dma.hbm_to_vmem [thread:$0]  %s4868_s17, 64, %s145_s28, [#allocation9]  }
  0x75   :  { %s3905_s9 = scalar_lea.hbm %s4878_s25, 256 }
  0x76   :  { %p3906_p2 = scmp.ne.s32.totalorder %s4878_s25, %s3905_s9  ;;  %p3909_p3 = scmp.lt.u32.totalorder %s3905_s9, %s4878_s25 }
  0x78   :  { %p3911_p4 = pnand %p3909_p3, %p3906_p2 }
  0x7a   :  { %3914 = shalt.err (!%p3911_p4)
}
  0x7b   :  { %s3915_s11 = scalar_lea.vmem %s166_s2, 256  ;;  %p3920_p6 = scmp.lt.s32.totalorder %s166_s2, %s166_s2 }
  0x7c   :  { %p3916_p5 = scmp.ne.s32.totalorder %s166_s2, %s3915_s11  ;;  %p3921_p7 = scmp.lt.s32.totalorder %s3915_s11, %s3915_s11 }
  0x7e   :  { %p3922_p8 = por %p3921_p7, %p3920_p6 }
  0x80   :  { %p3923_p9 = pnand %p3922_p8, %p3916_p5 }
  0x82   :  { %3926 = shalt.err (!%p3923_p9)
}
  0x83   :  { %s4804_s0 = smov 128   ;;  %s4805_s15 = smov 8  }
  0x84   :  { %171 = dma.hbm_to_vmem [thread:$0]  %s4878_s25, 256, %s166_s2, [#allocation12], %s4804_s0, %s4804_s0, %s4805_s15  }
  0x85   :  { %s4806_s17 = smov [#allocation14]   ;;  %s4807_s18 = smov [#allocation17]  }
  0x86   :  { %s187_s16 = sshll.u32 %s4806_s17, 4  ;;  %s210_s26 = sshll.u32 %s4807_s18, 4  ;;  %s188_s16 = int_to_ptr.vmem [resolvable:$true] %s187_s16  ;;  %s211_s26 = int_to_ptr.vmem [resolvable:$true] %s210_s26 }
  0x87   :  { %s3927_s28 = scalar_lea.hbm %s4888_s3, 256 }
  0x88   :  { %p3928_p10 = scmp.ne.s32.totalorder %s4888_s3, %s3927_s28  ;;  %p3931_p11 = scmp.lt.u32.totalorder %s3927_s28, %s4888_s3 }
  0x8a   :  { %p3933_p12 = pnand %p3931_p11, %p3928_p10 }
  0x8c   :  { %3936 = shalt.err (!%p3933_p12)
}
  0x8d   :  { %s3937_s1 = scalar_lea.vmem %s188_s16, 256  ;;  %p3942_p0 = scmp.lt.s32.totalorder %s188_s16, %s188_s16 }
  0x8e   :  { %p3938_p13 = scmp.ne.s32.totalorder %s188_s16, %s3937_s1  ;;  %p3943_p1 = scmp.lt.s32.totalorder %s3937_s1, %s3937_s1 }
  0x90   :  { %p3944_p2 = por %p3943_p1, %p3942_p0 }
  0x92   :  { %p3945_p3 = pnand %p3944_p2, %p3938_p13 }
  0x94   :  { %3948 = shalt.err (!%p3945_p3)
}
  0x95   :  { %193 = dma.hbm_to_vmem [thread:$0]  %s4888_s3, 256, %s188_s16, [#allocation15], %s4804_s0, %s4804_s0, %s4805_s15  }
  0x96   :  { %s3949_s25 = scalar_lea.hbm %s4898_s14, 32 }
  0x97   :  { %p3950_p4 = scmp.ne.s32.totalorder %s4898_s14, %s3949_s25  ;;  %p3953_p5 = scmp.lt.u32.totalorder %s3949_s25, %s4898_s14 }
  0x99   :  { %p3955_p6 = pnand %p3953_p5, %p3950_p4 }
  0x9b   :  { %3958 = shalt.err (!%p3955_p6)
}
  0x9c   :  { %s3959_s2 = scalar_lea.vmem %s211_s26, 32  ;;  %p3964_p8 = scmp.lt.s32.totalorder %s211_s26, %s211_s26 }
  0x9d   :  { %p3960_p7 = scmp.ne.s32.totalorder %s211_s26, %s3959_s2  ;;  %p3965_p9 = scmp.lt.s32.totalorder %s3959_s2, %s3959_s2 }
  0x9f   :  { %p3966_p10 = por %p3965_p9, %p3964_p8 }
  0xa1   :  { %p3967_p11 = pnand %p3966_p10, %p3960_p7 }
  0xa3   :  { %3970 = shalt.err (!%p3967_p11)
}
  0xa4   :  { %213 = dma.hbm_to_vmem [thread:$0]  %s4898_s14, 32, %s211_s26, [#allocation18]  }
  0xa5   :  { %s4808_s7 = smov [#allocation20]   ;;  %s4809_s10 = smov [#allocation23]  }
  0xa6   :  { %s229_s3 = sshll.u32 %s4808_s7, 4  ;;  %s253_s9 = sshll.u32 %s4809_s10, 4  ;;  %s230_s3 = int_to_ptr.vmem [resolvable:$true] %s229_s3  ;;  %s254_s9 = int_to_ptr.vmem [resolvable:$true] %s253_s9 }
  0xa7   :  { %s3971_s11 = scalar_lea.hbm %s4908_s24, 320 }
  0xa8   :  { %p3972_p12 = scmp.ne.s32.totalorder %s4908_s24, %s3971_s11  ;;  %p3975_p13 = scmp.lt.u32.totalorder %s3971_s11, %s4908_s24 }
  0xaa   :  { %p3977_p0 = pnand %p3975_p13, %p3972_p12 }
  0xac   :  { %3980 = shalt.err (!%p3977_p0)
}
  0xad   :  { %s3981_s17 = scalar_lea.vmem %s230_s3, 320  ;;  %p3986_p2 = scmp.lt.s32.totalorder %s230_s3, %s230_s3 }
  0xae   :  { %p3982_p1 = scmp.ne.s32.totalorder %s230_s3, %s3981_s17  ;;  %p3987_p3 = scmp.lt.s32.totalorder %s3981_s17, %s3981_s17 }
  0xb0   :  { %p3988_p4 = por %p3987_p3, %p3986_p2 }
  0xb2   :  { %p3989_p5 = pnand %p3988_p4, %p3982_p1 }
  0xb4   :  { %3992 = shalt.err (!%p3989_p5)
}
  0xb5   :  { %235 = dma.hbm_to_vmem [thread:$0]  %s4908_s24, 320, %s230_s3, [#allocation21], %s4800_s22, %s4800_s22, %s4801_s23  }
  0xb6   :  { %s3993_s14 = scalar_lea.hbm %s4918_s6, 320 }
  0xb7   :  { %p3994_p6 = scmp.ne.s32.totalorder %s4918_s6, %s3993_s14  ;;  %p3997_p7 = scmp.lt.u32.totalorder %s3993_s14, %s4918_s6 }
  0xb9   :  { %p3999_p8 = pnand %p3997_p7, %p3994_p6 }
  0xbb   :  { %4002 = shalt.err (!%p3999_p8)
}
  0xbc   :  { %s4003_s16 = scalar_lea.vmem %s254_s9, 320  ;;  %p4008_p10 = scmp.lt.s32.totalorder %s254_s9, %s254_s9 }
  0xbd   :  { %p4004_p9 = scmp.ne.s32.totalorder %s254_s9, %s4003_s16  ;;  %p4009_p11 = scmp.lt.s32.totalorder %s4003_s16, %s4003_s16 }
  0xbf   :  { %p4010_p12 = por %p4009_p11, %p4008_p10 }
  0xc1   :  { %p4011_p13 = pnand %p4010_p12, %p4004_p9 }
  0xc3   :  { %4014 = shalt.err (!%p4011_p13)
}
  0xc4   :  { %259 = dma.hbm_to_vmem [thread:$0]  %s4918_s6, 320, %s254_s9, [#allocation24], %s4800_s22, %s4800_s22, %s4801_s23  }
  0xc5   :  { %s4810_s24 = smov [#allocation26]   ;;  %s4811_s26 = smov [#allocation29]  }
  0xc6   :  { %s277_s18 = sshll.u32 %s4810_s24, 4  ;;  %s300_s28 = sshll.u32 %s4811_s26, 4  ;;  %s278_s18 = int_to_ptr.vmem [resolvable:$true] %s277_s18  ;;  %s301_s28 = int_to_ptr.vmem [resolvable:$true] %s300_s28 }
  0xc7   :  { %s4015_s1 = scalar_lea.hbm %s4928_s20, 1024 }
  0xc8   :  { %p4016_p0 = scmp.ne.s32.totalorder %s4928_s20, %s4015_s1  ;;  %p4019_p1 = scmp.lt.u32.totalorder %s4015_s1, %s4928_s20 }
  0xca   :  { %p4021_p2 = pnand %p4019_p1, %p4016_p0 }
  0xcc   :  { %4024 = shalt.err (!%p4021_p2)
}
  0xcd   :  { %s4025_s25 = scalar_lea.vmem %s278_s18, 1024  ;;  %p4030_p4 = scmp.lt.s32.totalorder %s278_s18, %s278_s18 }
  0xce   :  { %p4026_p3 = scmp.ne.s32.totalorder %s278_s18, %s4025_s25  ;;  %p4031_p5 = scmp.lt.s32.totalorder %s4025_s25, %s4025_s25 }
  0xd0   :  { %p4032_p6 = por %p4031_p5, %p4030_p4 }
  0xd2   :  { %p4033_p7 = pnand %p4032_p6, %p4026_p3 }
  0xd4   :  { %4036 = shalt.err (!%p4033_p7)
}
  0xd5   :  { %283 = dma.hbm_to_vmem [thread:$0]  %s4928_s20, 1024, %s278_s18, [#allocation27], %s4804_s0, %s4804_s0, %s4805_s15  }
  0xd6   :  { %s4037_s6 = scalar_lea.hbm %s4938_s4, 64 }
  0xd7   :  { %p4038_p8 = scmp.ne.s32.totalorder %s4938_s4, %s4037_s6  ;;  %p4041_p9 = scmp.lt.u32.totalorder %s4037_s6, %s4938_s4 }
  0xd9   :  { %p4043_p10 = pnand %p4041_p9, %p4038_p8 }
  0xdb   :  { %4046 = shalt.err (!%p4043_p10)
}
  0xdc   :  { %s4047_s2 = scalar_lea.vmem %s301_s28, 64  ;;  %p4052_p12 = scmp.lt.s32.totalorder %s301_s28, %s301_s28 }
  0xdd   :  { %p4048_p11 = scmp.ne.s32.totalorder %s301_s28, %s4047_s2  ;;  %p4053_p13 = scmp.lt.s32.totalorder %s4047_s2, %s4047_s2 }
  0xdf   :  { %p4054_p0 = por %p4053_p13, %p4052_p12 }
  0xe1   :  { %p4055_p1 = pnand %p4054_p0, %p4048_p11 }
  0xe3   :  { %4058 = shalt.err (!%p4055_p1)
}
  0xe4   :  { %303 = dma.hbm_to_vmem [thread:$0]  %s4938_s4, 64, %s301_s28, [#allocation30]  }
  0xe5   :  { %s4812_s7 = smov [#allocation32]   ;;  %s4813_s3 = smov [#allocation35]  }
  0xe6   :  { %s320_s20 = sshll.u32 %s4812_s7, 4  ;;  %s340_s10 = sshll.u32 %s4813_s3, 4  ;;  %s321_s20 = int_to_ptr.vmem [resolvable:$true] %s320_s20  ;;  %s341_s10 = int_to_ptr.vmem [resolvable:$true] %s340_s10 }
  0xe7   :  { %s4059_s9 = scalar_lea.hbm %s4948_s30, 16 }
  0xe8   :  { %p4060_p2 = scmp.ne.s32.totalorder %s4948_s30, %s4059_s9  ;;  %p4063_p3 = scmp.lt.u32.totalorder %s4059_s9, %s4948_s30 }
  0xea   :  { %p4065_p4 = pnand %p4063_p3, %p4060_p2 }
  0xec   :  { %4068 = shalt.err (!%p4065_p4)
}
  0xed   :  { %s4069_s11 = scalar_lea.vmem %s321_s20, 16  ;;  %s4073_s17 = scalar_lea.vmem %s321_s20, 32 }
  0xee   :  { %p4070_p5 = scmp.ne.s32.totalorder %s321_s20, %s4069_s11  ;;  %p4074_p6 = scmp.lt.s32.totalorder %s321_s20, %s321_s20 }
  0xef   :  { %p4075_p7 = scmp.lt.s32.totalorder %s4073_s17, %s4069_s11 }
  0xf1   :  { %p4076_p8 = por %p4075_p7, %p4074_p6 }
  0xf3   :  { %p4077_p9 = pnand %p4076_p8, %p4070_p5 }
  0xf5   :  { %4080 = shalt.err (!%p4077_p9)
}
  0xf6   :  { %323 = dma.hbm_to_vmem [thread:$0]  %s4948_s30, 16, %s321_s20, [#allocation33]  }
  0xf7   :  { %s4081_s4 = scalar_lea.hbm %s4958_s19, 16 }
  0xf8   :  { %p4082_p10 = scmp.ne.s32.totalorder %s4958_s19, %s4081_s4  ;;  %p4085_p11 = scmp.lt.u32.totalorder %s4081_s4, %s4958_s19 }
  0xfa   :  { %p4087_p12 = pnand %p4085_p11, %p4082_p10 }
  0xfc   :  { %4090 = shalt.err (!%p4087_p12)
}
  0xfd   :  { %s4091_s14 = scalar_lea.vmem %s341_s10, 16  ;;  %s4095_s16 = scalar_lea.vmem %s341_s10, 32 }
  0xfe   :  { %p4092_p13 = scmp.ne.s32.totalorder %s341_s10, %s4091_s14  ;;  %p4096_p0 = scmp.lt.s32.totalorder %s341_s10, %s341_s10 }
  0xff   :  { %p4097_p1 = scmp.lt.s32.totalorder %s4095_s16, %s4091_s14 }
 0x101   :  { %p4098_p2 = por %p4097_p1, %p4096_p0 }
 0x103   :  { %p4099_p3 = pnand %p4098_p2, %p4092_p13 }
 0x105   :  { %4102 = shalt.err (!%p4099_p3)
}
 0x106   :  { %343 = dma.hbm_to_vmem [thread:$0]  %s4958_s19, 16, %s341_s10, [#allocation36]  }
 0x107   :  { %s4814_s30 = smov [#allocation38]   ;;  %s4815_s18 = smov [#allocation41]  }
 0x108   :  { %s360_s24 = sshll.u32 %s4814_s30, 4  ;;  %s382_s26 = sshll.u32 %s4815_s18, 4  ;;  %s361_s24 = int_to_ptr.vmem [resolvable:$true] %s360_s24  ;;  %s383_s26 = int_to_ptr.vmem [resolvable:$true] %s382_s26 }
 0x109   :  { %s4103_s28 = scalar_lea.hbm %s4968_s8, 16 }
 0x10a   :  { %p4104_p4 = scmp.ne.s32.totalorder %s4968_s8, %s4103_s28  ;;  %p4107_p5 = scmp.lt.u32.totalorder %s4103_s28, %s4968_s8 }
 0x10c   :  { %p4109_p6 = pnand %p4107_p5, %p4104_p4 }
 0x10e   :  { %4112 = shalt.err (!%p4109_p6)
}
 0x10f   :  { %s4113_s1 = scalar_lea.vmem %s361_s24, 16  ;;  %s4117_s25 = scalar_lea.vmem %s361_s24, 32 }
 0x110   :  { %p4114_p7 = scmp.ne.s32.totalorder %s361_s24, %s4113_s1  ;;  %p4118_p8 = scmp.lt.s32.totalorder %s361_s24, %s361_s24 }
 0x111   :  { %p4119_p9 = scmp.lt.s32.totalorder %s4117_s25, %s4113_s1 }
 0x113   :  { %p4120_p10 = por %p4119_p9, %p4118_p8 }
 0x115   :  { %p4121_p11 = pnand %p4120_p10, %p4114_p7 }
 0x117   :  { %4124 = shalt.err (!%p4121_p11)
}
 0x118   :  { %363 = dma.hbm_to_vmem [thread:$0]  %s4968_s8, 16, %s361_s24, [#allocation39]  }
 0x119   :  { %s4125_s19 = scalar_lea.hbm %s4978_s29, 16 }
 0x11a   :  { %p4126_p12 = scmp.ne.s32.totalorder %s4978_s29, %s4125_s19  ;;  %p4129_p13 = scmp.lt.u32.totalorder %s4125_s19, %s4978_s29 }
 0x11c   :  { %p4131_p0 = pnand %p4129_p13, %p4126_p12 }
 0x11e   :  { %4134 = shalt.err (!%p4131_p0)
}
 0x11f   :  { %s4135_s6 = scalar_lea.vmem %s383_s26, 16  ;;  %s4139_s2 = scalar_lea.vmem %s383_s26, 32 }
 0x120   :  { %p4136_p1 = scmp.ne.s32.totalorder %s383_s26, %s4135_s6  ;;  %p4140_p2 = scmp.lt.s32.totalorder %s383_s26, %s383_s26 }
 0x121   :  { %p4141_p3 = scmp.lt.s32.totalorder %s4139_s2, %s4135_s6 }
 0x123   :  { %p4142_p4 = por %p4141_p3, %p4140_p2 }
 0x125   :  { %p4143_p5 = pnand %p4142_p4, %p4136_p1 }
 0x127   :  { %4146 = shalt.err (!%p4143_p5)
}
 0x128   :  { %385 = dma.hbm_to_vmem [thread:$0]  %s4978_s29, 16, %s383_s26, [#allocation42]  }
 0x129   :  { %s4816_s8 = smov [#allocation44]   ;;  %s4817_s20 = smov [#allocation47]  }
 0x12a   :  { %s401_s7 = sshll.u32 %s4816_s8, 4  ;;  %s426_s3 = sshll.u32 %s4817_s20, 4  ;;  %s402_s7 = int_to_ptr.vmem [resolvable:$true] %s401_s7  ;;  %s427_s3 = int_to_ptr.vmem [resolvable:$true] %s426_s3 }
 0x12b   :  { %s4147_s10 = scalar_lea.hbm %s4988_s21, 256 }
 0x12c   :  { %p4148_p6 = scmp.ne.s32.totalorder %s4988_s21, %s4147_s10  ;;  %p4151_p7 = scmp.lt.u32.totalorder %s4147_s10, %s4988_s21 }
 0x12e   :  { %p4153_p8 = pnand %p4151_p7, %p4148_p6 }
 0x130   :  { %4156 = shalt.err (!%p4153_p8)
}
 0x131   :  { %s4157_s9 = scalar_lea.vmem %s402_s7, 256  ;;  %p4162_p10 = scmp.lt.s32.totalorder %s402_s7, %s402_s7 }
 0x132   :  { %p4158_p9 = scmp.ne.s32.totalorder %s402_s7, %s4157_s9  ;;  %p4163_p11 = scmp.lt.s32.totalorder %s4157_s9, %s4157_s9 }
 0x134   :  { %p4164_p12 = por %p4163_p11, %p4162_p10 }
 0x136   :  { %p4165_p13 = pnand %p4164_p12, %p4158_p9 }
 0x138   :  { %4168 = shalt.err (!%p4165_p13)
}
 0x139   :  { %s5873_s29 = sld [smem:[#allocation98_spill]] }
 0x13a   :  { %407 = dma.hbm_to_vmem [thread:$0]  %s4988_s21, 256, %s402_s7, [#allocation45], %s4800_s22, %s4800_s22, %s4801_s23  }
 0x13f   :  { %s4169_s11 = scalar_lea.hbm %s5873_s29, 16 }
 0x140   :  { %p4170_p0 = scmp.ne.s32.totalorder %s5873_s29, %s4169_s11  ;;  %p4173_p1 = scmp.lt.u32.totalorder %s4169_s11, %s5873_s29 }
 0x142   :  { %p4175_p2 = pnand %p4173_p1, %p4170_p0 }
 0x144   :  { %4178 = shalt.err (!%p4175_p2)
}
 0x145   :  { %s4179_s17 = scalar_lea.vmem %s427_s3, 16  ;;  %s4183_s4 = scalar_lea.vmem %s427_s3, 32 }
 0x146   :  { %p4180_p3 = scmp.ne.s32.totalorder %s427_s3, %s4179_s17  ;;  %p4184_p4 = scmp.lt.s32.totalorder %s427_s3, %s427_s3 }
 0x147   :  { %p4185_p5 = scmp.lt.s32.totalorder %s4183_s4, %s4179_s17 }
 0x149   :  { %p4186_p6 = por %p4185_p5, %p4184_p4 }
 0x14b   :  { %p4187_p7 = pnand %p4186_p6, %p4180_p3 }
 0x14d   :  { %4190 = shalt.err (!%p4187_p7)
}
 0x14e   :  { %s5874_s14 = sld [smem:[#allocation100_spill]]  ;;  %s4818_s21 = smov [#allocation50]  }
 0x14f   :  { %429 = dma.hbm_to_vmem [thread:$0]  %s5873_s29, 16, %s427_s3, [#allocation48]  }
 0x150   :  { %s446_s16 = sshll.u32 %s4818_s21, 4  ;;  %s4819_s30 = smov [#allocation53]   ;;  %s447_s16 = int_to_ptr.vmem [resolvable:$true] %s446_s16 }
 0x151   :  { %s466_s24 = sshll.u32 %s4819_s30, 4  ;;  %s467_s24 = int_to_ptr.vmem [resolvable:$true] %s466_s24 }
 0x154   :  { %s4191_s18 = scalar_lea.hbm %s5874_s14, 16 }
 0x155   :  { %p4192_p8 = scmp.ne.s32.totalorder %s5874_s14, %s4191_s18  ;;  %p4195_p9 = scmp.lt.u32.totalorder %s4191_s18, %s5874_s14 }
 0x157   :  { %p4197_p10 = pnand %p4195_p9, %p4192_p8 }
 0x159   :  { %4200 = shalt.err (!%p4197_p10)
}
 0x15a   :  { %s4201_s26 = scalar_lea.vmem %s447_s16, 16  ;;  %s4205_s28 = scalar_lea.vmem %s447_s16, 32 }
 0x15b   :  { %p4202_p11 = scmp.ne.s32.totalorder %s447_s16, %s4201_s26  ;;  %p4206_p12 = scmp.lt.s32.totalorder %s447_s16, %s447_s16 }
 0x15c   :  { %p4207_p13 = scmp.lt.s32.totalorder %s4205_s28, %s4201_s26 }
 0x15e   :  { %p4208_p0 = por %p4207_p13, %p4206_p12 }
 0x160   :  { %p4209_p1 = pnand %p4208_p0, %p4202_p11 }
 0x162   :  { %4212 = shalt.err (!%p4209_p1)
}
 0x163   :  { %s5875_s1 = sld [smem:[#allocation102_spill]] }
 0x164   :  { %449 = dma.hbm_to_vmem [thread:$0]  %s5874_s14, 16, %s447_s16, [#allocation51]  }
 0x169   :  { %s4213_s25 = scalar_lea.hbm %s5875_s1, 16 }
 0x16a   :  { %p4214_p2 = scmp.ne.s32.totalorder %s5875_s1, %s4213_s25  ;;  %p4217_p3 = scmp.lt.u32.totalorder %s4213_s25, %s5875_s1 }
 0x16c   :  { %p4219_p4 = pnand %p4217_p3, %p4214_p2 }
 0x16e   :  { %4222 = shalt.err (!%p4219_p4)
}
 0x16f   :  { %s4223_s19 = scalar_lea.vmem %s467_s24, 16  ;;  %s4227_s6 = scalar_lea.vmem %s467_s24, 32 }
 0x170   :  { %p4224_p5 = scmp.ne.s32.totalorder %s467_s24, %s4223_s19  ;;  %p4228_p6 = scmp.lt.s32.totalorder %s467_s24, %s467_s24 }
 0x171   :  { %p4229_p7 = scmp.lt.s32.totalorder %s4227_s6, %s4223_s19 }
 0x173   :  { %p4230_p8 = por %p4229_p7, %p4228_p6 }
 0x175   :  { %p4231_p9 = pnand %p4230_p8, %p4224_p5 }
 0x177   :  { %4234 = shalt.err (!%p4231_p9)
}
 0x178   :  { %469 = dma.hbm_to_vmem [thread:$0]  %s5875_s1, 16, %s467_s24, [#allocation54]  }
 0x179   :  { %s4820_s2 = smov [#allocation56]   ;;  %s4821_s7 = smov [#allocation2]  }
 0x17a   :  { %s488_s8 = sshll.u32 %s4820_s2, 4  ;;  %s110_s20 = sshll.u32 %s4821_s7, 4  ;;  %s489_s8 = int_to_ptr.vmem [resolvable:$true] %s488_s8  ;;  %s111_s20 = int_to_ptr.vmem [resolvable:$true] %s110_s20 }
 0x17b   :  { %s4235_s3 = scalar_lea.hbm %s5028_s5, 16 }
 0x17c   :  { %p4236_p10 = scmp.ne.s32.totalorder %s5028_s5, %s4235_s3  ;;  %p4239_p11 = scmp.lt.u32.totalorder %s4235_s3, %s5028_s5 }
 0x17e   :  { %p4241_p12 = pnand %p4239_p11, %p4236_p10 }
 0x180   :  { %4244 = shalt.err (!%p4241_p12)
}
 0x181   :  { %s4245_s10 = scalar_lea.vmem %s489_s8, 16  ;;  %s4249_s9 = scalar_lea.vmem %s489_s8, 32 }
 0x182   :  { %p4246_p13 = scmp.ne.s32.totalorder %s489_s8, %s4245_s10  ;;  %p4250_p0 = scmp.lt.s32.totalorder %s489_s8, %s489_s8 }
 0x183   :  { %p4251_p1 = scmp.lt.s32.totalorder %s4249_s9, %s4245_s10 }
 0x185   :  { %p4252_p2 = por %p4251_p1, %p4250_p0 }
 0x187   :  { %p4253_p3 = pnand %p4252_p2, %p4246_p13 }
 0x189   :  { %4256 = shalt.err (!%p4253_p3)
}
 0x18a   :  { %s5876_s29 = sld [smem:[#allocation83_spill]] }
 0x18b   :  { %491 = dma.hbm_to_vmem [thread:$0]  %s5028_s5, 16, %s489_s8, [#allocation57]  }
 0x190   :  { %s4257_s11 = scalar_lea.hbm %s5876_s29, 64 }
 0x191   :  { %p4258_p4 = scmp.ne.s32.totalorder %s5876_s29, %s4257_s11  ;;  %p4261_p5 = scmp.lt.u32.totalorder %s4257_s11, %s5876_s29 }
 0x193   :  { %p4263_p6 = pnand %p4261_p5, %p4258_p4 }
 0x195   :  { %4266 = shalt.err (!%p4263_p6)
}
 0x196   :  { %s4267_s17 = scalar_lea.vmem %s111_s20, 64  ;;  %p4272_p8 = scmp.lt.s32.totalorder %s111_s20, %s111_s20 }
 0x197   :  { %p4268_p7 = scmp.ne.s32.totalorder %s111_s20, %s4267_s17  ;;  %p4273_p9 = scmp.lt.s32.totalorder %s4267_s17, %s4267_s17 }
 0x199   :  { %p4274_p10 = por %p4273_p9, %p4272_p8 }
 0x19b   :  { %p4275_p11 = pnand %p4274_p10, %p4268_p7 }
 0x19d   :  { %4278 = shalt.err (!%p4275_p11)
}
 0x19e   :  { %s5877_s4 = sld [smem:[#allocation84_spill]]  ;;  %s4822_s14 = smov [#allocation7]  }
 0x19f   :  { %113 = dma.hbm_to_vmem [thread:$0]  %s5876_s29, 64, %s111_s20, [#allocation3]  }
 0x1a0   :  { %s131_s5 = sshll.u32 %s4822_s14, 4  ;;  %s4823_s21 = smov [#allocation10]   ;;  %s132_s5 = int_to_ptr.vmem [resolvable:$true] %s131_s5 }
 0x1a1   :  { %s153_s16 = sshll.u32 %s4823_s21, 4  ;;  %s154_s16 = int_to_ptr.vmem [resolvable:$true] %s153_s16 }
 0x1a4   :  { %s4279_s30 = scalar_lea.hbm %s5877_s4, 128 }
 0x1a5   :  { %p4280_p12 = scmp.ne.s32.totalorder %s5877_s4, %s4279_s30  ;;  %p4283_p13 = scmp.lt.u32.totalorder %s4279_s30, %s5877_s4 }
 0x1a7   :  { %p4285_p0 = pnand %p4283_p13, %p4280_p12 }
 0x1a9   :  { %4288 = shalt.err (!%p4285_p0)
}
 0x1aa   :  { %s4289_s24 = scalar_lea.vmem %s132_s5, 128  ;;  %p4294_p2 = scmp.lt.s32.totalorder %s132_s5, %s132_s5 }
 0x1ab   :  { %p4290_p1 = scmp.ne.s32.totalorder %s132_s5, %s4289_s24  ;;  %p4295_p3 = scmp.lt.s32.totalorder %s4289_s24, %s4289_s24 }
 0x1ad   :  { %p4296_p4 = por %p4295_p3, %p4294_p2 }
 0x1af   :  { %p4297_p5 = pnand %p4296_p4, %p4290_p1 }
 0x1b1   :  { %4300 = shalt.err (!%p4297_p5)
}
 0x1b2   :  { %s5878_s18 = sld [smem:[#allocation85_spill]] }
 0x1b3   :  { %137 = dma.hbm_to_vmem [thread:$0]  %s5877_s4, 128, %s132_s5, [#allocation6], %s4800_s22, %s4800_s22, %s4801_s23  }
 0x1b8   :  { %s4301_s26 = scalar_lea.hbm %s5878_s18, 128 }
 0x1b9   :  { %p4302_p6 = scmp.ne.s32.totalorder %s5878_s18, %s4301_s26  ;;  %p4305_p7 = scmp.lt.u32.totalorder %s4301_s26, %s5878_s18 }
 0x1bb   :  { %p4307_p8 = pnand %p4305_p7, %p4302_p6 }
 0x1bd   :  { %4310 = shalt.err (!%p4307_p8)
}
 0x1be   :  { %s4311_s28 = scalar_lea.vmem %s154_s16, 128  ;;  %p4316_p10 = scmp.lt.s32.totalorder %s154_s16, %s154_s16 }
 0x1bf   :  { %p4312_p9 = scmp.ne.s32.totalorder %s154_s16, %s4311_s28  ;;  %p4317_p11 = scmp.lt.s32.totalorder %s4311_s28, %s4311_s28 }
 0x1c1   :  { %p4318_p12 = por %p4317_p11, %p4316_p10 }
 0x1c3   :  { %p4319_p13 = pnand %p4318_p12, %p4312_p9 }
 0x1c5   :  { %4322 = shalt.err (!%p4319_p13)
}
 0x1c6   :  { %s5879_s1 = sld [smem:[#allocation86_spill]]  ;;  %s4824_s25 = smov [#allocation13]  }
 0x1c7   :  { %159 = dma.hbm_to_vmem [thread:$0]  %s5878_s18, 128, %s154_s16, [#allocation9], %s4800_s22, %s4800_s22, %s4801_s23  }
 0x1c8   :  { %s178_s19 = sshll.u32 %s4824_s25, 4  ;;  %s4825_s6 = smov [#allocation16]   ;;  %s179_s19 = int_to_ptr.vmem [resolvable:$true] %s178_s19 }
 0x1c9   :  { %s200_s2 = sshll.u32 %s4825_s6, 4  ;;  %s201_s2 = int_to_ptr.vmem [resolvable:$true] %s200_s2 }
 0x1cc   :  { %s4323_s8 = scalar_lea.hbm %s5879_s1, 128 }
 0x1cd   :  { %p4324_p0 = scmp.ne.s32.totalorder %s5879_s1, %s4323_s8  ;;  %p4327_p1 = scmp.lt.u32.totalorder %s4323_s8, %s5879_s1 }
 0x1cf   :  { %p4329_p2 = pnand %p4327_p1, %p4324_p0 }
 0x1d1   :  { %4332 = shalt.err (!%p4329_p2)
}
 0x1d2   :  { %s4333_s7 = scalar_lea.vmem %s179_s19, 128  ;;  %p4338_p4 = scmp.lt.s32.totalorder %s179_s19, %s179_s19 }
 0x1d3   :  { %p4334_p3 = scmp.ne.s32.totalorder %s179_s19, %s4333_s7  ;;  %p4339_p5 = scmp.lt.s32.totalorder %s4333_s7, %s4333_s7 }
 0x1d5   :  { %p4340_p6 = por %p4339_p5, %p4338_p4 }
 0x1d7   :  { %p4341_p7 = pnand %p4340_p6, %p4334_p3 }
 0x1d9   :  { %4344 = shalt.err (!%p4341_p7)
}
 0x1da   :  { %s5880_s20 = sld [smem:[#allocation87_spill]] }
 0x1db   :  { %181 = dma.hbm_to_vmem [thread:$0]  %s5879_s1, 128, %s179_s19, [#allocation12]  }
 0x1e0   :  { %s4345_s3 = scalar_lea.hbm %s5880_s20, 32 }
 0x1e1   :  { %p4346_p8 = scmp.ne.s32.totalorder %s5880_s20, %s4345_s3  ;;  %p4349_p9 = scmp.lt.u32.totalorder %s4345_s3, %s5880_s20 }
 0x1e3   :  { %p4351_p10 = pnand %p4349_p9, %p4346_p8 }
 0x1e5   :  { %4354 = shalt.err (!%p4351_p10)
}
 0x1e6   :  { %s4355_s10 = scalar_lea.vmem %s201_s2, 32  ;;  %p4360_p12 = scmp.lt.s32.totalorder %s201_s2, %s201_s2 }
 0x1e7   :  { %p4356_p11 = scmp.ne.s32.totalorder %s201_s2, %s4355_s10  ;;  %p4361_p13 = scmp.lt.s32.totalorder %s4355_s10, %s4355_s10 }
 0x1e9   :  { %p4362_p0 = por %p4361_p13, %p4360_p12 }
 0x1eb   :  { %p4363_p1 = pnand %p4362_p0, %p4356_p11 }
 0x1ed   :  { %4366 = shalt.err (!%p4363_p1)
}
 0x1ee   :  { %s5881_s9 = sld [smem:[#allocation88_spill]]  ;;  %s4826_s29 = smov [#allocation19]  }
 0x1ef   :  { %203 = dma.hbm_to_vmem [thread:$0]  %s5880_s20, 32, %s201_s2, [#allocation15]  }
 0x1f0   :  { %s220_s11 = sshll.u32 %s4826_s29, 4  ;;  %s4827_s17 = smov [#allocation22]   ;;  %s221_s11 = int_to_ptr.vmem [resolvable:$true] %s220_s11 }
 0x1f1   :  { %s241_s4 = sshll.u32 %s4827_s17, 4  ;;  %s242_s4 = int_to_ptr.vmem [resolvable:$true] %s241_s4 }
 0x1f4   :  { %s4367_s14 = scalar_lea.hbm %s5881_s9, 32 }
 0x1f5   :  { %p4368_p2 = scmp.ne.s32.totalorder %s5881_s9, %s4367_s14  ;;  %p4371_p3 = scmp.lt.u32.totalorder %s4367_s14, %s5881_s9 }
 0x1f7   :  { %p4373_p4 = pnand %p4371_p3, %p4368_p2 }
 0x1f9   :  { %4376 = shalt.err (!%p4373_p4)
}
 0x1fa   :  { %s4377_s5 = scalar_lea.vmem %s221_s11, 32  ;;  %p4382_p6 = scmp.lt.s32.totalorder %s221_s11, %s221_s11 }
 0x1fb   :  { %p4378_p5 = scmp.ne.s32.totalorder %s221_s11, %s4377_s5  ;;  %p4383_p7 = scmp.lt.s32.totalorder %s4377_s5, %s4377_s5 }
 0x1fd   :  { %p4384_p8 = por %p4383_p7, %p4382_p6 }
 0x1ff   :  { %p4385_p9 = pnand %p4384_p8, %p4378_p5 }
 0x201   :  { %4388 = shalt.err (!%p4385_p9)
}
 0x202   :  { %s5882_s21 = sld [smem:[#allocation89_spill]] }
 0x203   :  { %223 = dma.hbm_to_vmem [thread:$0]  %s5881_s9, 32, %s221_s11, [#allocation18]  }
 0x208   :  { %s4389_s16 = scalar_lea.hbm %s5882_s21, 320 }
 0x209   :  { %p4390_p10 = scmp.ne.s32.totalorder %s5882_s21, %s4389_s16  ;;  %p4393_p11 = scmp.lt.u32.totalorder %s4389_s16, %s5882_s21 }
 0x20b   :  { %p4395_p12 = pnand %p4393_p11, %p4390_p10 }
 0x20d   :  { %4398 = shalt.err (!%p4395_p12)
}
 0x20e   :  { %s4399_s30 = scalar_lea.vmem %s242_s4, 320  ;;  %p4404_p0 = scmp.lt.s32.totalorder %s242_s4, %s242_s4 }
 0x20f   :  { %p4400_p13 = scmp.ne.s32.totalorder %s242_s4, %s4399_s30  ;;  %p4405_p1 = scmp.lt.s32.totalorder %s4399_s30, %s4399_s30 }
 0x211   :  { %p4406_p2 = por %p4405_p1, %p4404_p0 }
 0x213   :  { %p4407_p3 = pnand %p4406_p2, %p4400_p13 }
 0x215   :  { %4410 = shalt.err (!%p4407_p3)
}
 0x216   :  { %s5883_s24 = sld [smem:[#allocation90_spill]]  ;;  %s4828_s18 = smov [#allocation25]  }
 0x217   :  { %247 = dma.hbm_to_vmem [thread:$0]  %s5882_s21, 320, %s242_s4, [#allocation21], %s4800_s22, %s4800_s22, %s4801_s23  }
 0x218   :  { %s265_s26 = sshll.u32 %s4828_s18, 4  ;;  %s4829_s28 = smov [#allocation28]   ;;  %s266_s26 = int_to_ptr.vmem [resolvable:$true] %s265_s26 }
 0x219   :  { %s290_s1 = sshll.u32 %s4829_s28, 4  ;;  %s291_s1 = int_to_ptr.vmem [resolvable:$true] %s290_s1 }
 0x21c   :  { %s4411_s25 = scalar_lea.hbm %s5883_s24, 512 }
 0x21d   :  { %p4412_p4 = scmp.ne.s32.totalorder %s5883_s24, %s4411_s25  ;;  %p4415_p5 = scmp.lt.u32.totalorder %s4411_s25, %s5883_s24 }
 0x21f   :  { %p4417_p6 = pnand %p4415_p5, %p4412_p4 }
 0x221   :  { %4420 = shalt.err (!%p4417_p6)
}
 0x222   :  { %s4421_s19 = scalar_lea.vmem %s266_s26, 512  ;;  %p4426_p8 = scmp.lt.s32.totalorder %s266_s26, %s266_s26 }
 0x223   :  { %p4422_p7 = scmp.ne.s32.totalorder %s266_s26, %s4421_s19  ;;  %p4427_p9 = scmp.lt.s32.totalorder %s4421_s19, %s4421_s19 }
 0x225   :  { %p4428_p10 = por %p4427_p9, %p4426_p8 }
 0x227   :  { %p4429_p11 = pnand %p4428_p10, %p4422_p7 }
 0x229   :  { %4432 = shalt.err (!%p4429_p11)
}
 0x22a   :  { %s5884_s6 = sld [smem:[#allocation91_spill]] }
 0x22b   :  { %271 = dma.hbm_to_vmem [thread:$0]  %s5883_s24, 512, %s266_s26, [#allocation24], %s4804_s0, %s4804_s0, %s4805_s15  }
 0x230   :  { %s4433_s2 = scalar_lea.hbm %s5884_s6, 32 }
 0x231   :  { %p4434_p12 = scmp.ne.s32.totalorder %s5884_s6, %s4433_s2  ;;  %p4437_p13 = scmp.lt.u32.totalorder %s4433_s2, %s5884_s6 }
 0x233   :  { %p4439_p0 = pnand %p4437_p13, %p4434_p12 }
 0x235   :  { %4442 = shalt.err (!%p4439_p0)
}
 0x236   :  { %s4443_s8 = scalar_lea.vmem %s291_s1, 32  ;;  %p4448_p2 = scmp.lt.s32.totalorder %s291_s1, %s291_s1 }
 0x237   :  { %p4444_p1 = scmp.ne.s32.totalorder %s291_s1, %s4443_s8  ;;  %p4449_p3 = scmp.lt.s32.totalorder %s4443_s8, %s4443_s8 }
 0x239   :  { %p4450_p4 = por %p4449_p3, %p4448_p2 }
 0x23b   :  { %p4451_p5 = pnand %p4450_p4, %p4444_p1 }
 0x23d   :  { %4454 = shalt.err (!%p4451_p5)
}
 0x23e   :  { %s5885_s7 = sld [smem:[#allocation92_spill]]  ;;  %s4830_s20 = smov [#allocation31]  }
 0x23f   :  { %293 = dma.hbm_to_vmem [thread:$0]  %s5884_s6, 32, %s291_s1, [#allocation27]  }
 0x240   :  { %s310_s3 = sshll.u32 %s4830_s20, 4  ;;  %s4831_s10 = smov [#allocation34]   ;;  %s311_s3 = int_to_ptr.vmem [resolvable:$true] %s310_s3 }
 0x241   :  { %s330_s9 = sshll.u32 %s4831_s10, 4  ;;  %s331_s9 = int_to_ptr.vmem [resolvable:$true] %s330_s9 }
 0x244   :  { %s4455_s29 = scalar_lea.hbm %s5885_s7, 64 }
 0x245   :  { %p4456_p6 = scmp.ne.s32.totalorder %s5885_s7, %s4455_s29  ;;  %p4459_p7 = scmp.lt.u32.totalorder %s4455_s29, %s5885_s7 }
 0x247   :  { %p4461_p8 = pnand %p4459_p7, %p4456_p6 }
 0x249   :  { %4464 = shalt.err (!%p4461_p8)
}
 0x24a   :  { %s4465_s11 = scalar_lea.vmem %s311_s3, 64  ;;  %p4470_p10 = scmp.lt.s32.totalorder %s311_s3, %s311_s3 }
 0x24b   :  { %p4466_p9 = scmp.ne.s32.totalorder %s311_s3, %s4465_s11  ;;  %p4471_p11 = scmp.lt.s32.totalorder %s4465_s11, %s4465_s11 }
 0x24d   :  { %p4472_p12 = por %p4471_p11, %p4470_p10 }
 0x24f   :  { %p4473_p13 = pnand %p4472_p12, %p4466_p9 }
 0x251   :  { %4476 = shalt.err (!%p4473_p13)
}
 0x252   :  { %s5886_s17 = sld [smem:[#allocation93_spill]] }
 0x253   :  { %313 = dma.hbm_to_vmem [thread:$0]  %s5885_s7, 64, %s311_s3, [#allocation30]  }
 0x258   :  { %s4477_s4 = scalar_lea.hbm %s5886_s17, 16 }
 0x259   :  { %p4478_p0 = scmp.ne.s32.totalorder %s5886_s17, %s4477_s4  ;;  %p4481_p1 = scmp.lt.u32.totalorder %s4477_s4, %s5886_s17 }
 0x25b   :  { %p4483_p2 = pnand %p4481_p1, %p4478_p0 }
 0x25d   :  { %4486 = shalt.err (!%p4483_p2)
}
 0x25e   :  { %s4487_s14 = scalar_lea.vmem %s331_s9, 16  ;;  %s4491_s5 = scalar_lea.vmem %s331_s9, 32 }
 0x25f   :  { %p4488_p3 = scmp.ne.s32.totalorder %s331_s9, %s4487_s14  ;;  %p4492_p4 = scmp.lt.s32.totalorder %s331_s9, %s331_s9 }
 0x260   :  { %p4493_p5 = scmp.lt.s32.totalorder %s4491_s5, %s4487_s14 }
 0x262   :  { %p4494_p6 = por %p4493_p5, %p4492_p4 }
 0x264   :  { %p4495_p7 = pnand %p4494_p6, %p4488_p3 }
 0x266   :  { %4498 = shalt.err (!%p4495_p7)
}
 0x267   :  { %s5887_s21 = sld [smem:[#allocation94_spill]]  ;;  %s4832_s16 = smov [#allocation37]  }
 0x268   :  { %333 = dma.hbm_to_vmem [thread:$0]  %s5886_s17, 16, %s331_s9, [#allocation33]  }
 0x269   :  { %s350_s30 = sshll.u32 %s4832_s16, 4  ;;  %s4833_s24 = smov [#allocation40]   ;;  %s351_s30 = int_to_ptr.vmem [resolvable:$true] %s350_s30 }
 0x26a   :  { %s369_s18 = sshll.u32 %s4833_s24, 4  ;;  %s370_s18 = int_to_ptr.vmem [resolvable:$true] %s369_s18 }
 0x26d   :  { %s4499_s26 = scalar_lea.hbm %s5887_s21, 16 }
 0x26e   :  { %p4500_p8 = scmp.ne.s32.totalorder %s5887_s21, %s4499_s26  ;;  %p4503_p9 = scmp.lt.u32.totalorder %s4499_s26, %s5887_s21 }
 0x270   :  { %p4505_p10 = pnand %p4503_p9, %p4500_p8 }
 0x272   :  { %4508 = shalt.err (!%p4505_p10)
}
 0x273   :  { %s4509_s28 = scalar_lea.vmem %s351_s30, 16  ;;  %s4513_s1 = scalar_lea.vmem %s351_s30, 32 }
 0x274   :  { %p4510_p11 = scmp.ne.s32.totalorder %s351_s30, %s4509_s28  ;;  %p4514_p12 = scmp.lt.s32.totalorder %s351_s30, %s351_s30 }
 0x275   :  { %p4515_p13 = scmp.lt.s32.totalorder %s4513_s1, %s4509_s28 }
 0x277   :  { %p4516_p0 = por %p4515_p13, %p4514_p12 }
 0x279   :  { %p4517_p1 = pnand %p4516_p0, %p4510_p11 }
 0x27b   :  { %4520 = shalt.err (!%p4517_p1)
}
 0x27c   :  { %s5888_s25 = sld [smem:[#allocation95_spill]] }
 0x27d   :  { %353 = dma.hbm_to_vmem [thread:$0]  %s5887_s21, 16, %s351_s30, [#allocation36]  }
 0x282   :  { %s4521_s19 = scalar_lea.hbm %s5888_s25, 256 }
 0x283   :  { %p4522_p2 = scmp.ne.s32.totalorder %s5888_s25, %s4521_s19  ;;  %p4525_p3 = scmp.lt.u32.totalorder %s4521_s19, %s5888_s25 }
 0x285   :  { %p4527_p4 = pnand %p4525_p3, %p4522_p2 }
 0x287   :  { %4530 = shalt.err (!%p4527_p4)
}
 0x288   :  { %s4531_s6 = scalar_lea.vmem %s370_s18, 256  ;;  %p4536_p6 = scmp.lt.s32.totalorder %s370_s18, %s370_s18 }
 0x289   :  { %p4532_p5 = scmp.ne.s32.totalorder %s370_s18, %s4531_s6  ;;  %p4537_p7 = scmp.lt.s32.totalorder %s4531_s6, %s4531_s6 }
 0x28b   :  { %p4538_p8 = por %p4537_p7, %p4536_p6 }
 0x28d   :  { %p4539_p9 = pnand %p4538_p8, %p4532_p5 }
 0x28f   :  { %4542 = shalt.err (!%p4539_p9)
}
 0x290   :  { %s5889_s2 = sld [smem:[#allocation96_spill]]  ;;  %s4834_s8 = smov [#allocation43]  }
 0x291   :  { %375 = dma.hbm_to_vmem [thread:$0]  %s5888_s25, 256, %s370_s18, [#allocation39], %s4800_s22, %s4800_s22, %s4801_s23  }
 0x292   :  { %s392_s7 = sshll.u32 %s4834_s8, 4  ;;  %s4835_s20 = smov [#allocation46]   ;;  %s393_s7 = int_to_ptr.vmem [resolvable:$true] %s392_s7 }
 0x293   :  { %s413_s3 = sshll.u32 %s4835_s20, 4  ;;  %s414_s3 = int_to_ptr.vmem [resolvable:$true] %s413_s3 }
 0x296   :  { %s4543_s10 = scalar_lea.hbm %s5889_s2, 16 }
 0x297   :  { %p4544_p10 = scmp.ne.s32.totalorder %s5889_s2, %s4543_s10  ;;  %p4547_p11 = scmp.lt.u32.totalorder %s4543_s10, %s5889_s2 }
 0x299   :  { %p4549_p12 = pnand %p4547_p11, %p4544_p10 }
 0x29b   :  { %4552 = shalt.err (!%p4549_p12)
}
 0x29c   :  { %s4553_s9 = scalar_lea.vmem %s393_s7, 16  ;;  %s4557_s29 = scalar_lea.vmem %s393_s7, 32 }
 0x29d   :  { %p4554_p13 = scmp.ne.s32.totalorder %s393_s7, %s4553_s9  ;;  %p4558_p0 = scmp.lt.s32.totalorder %s393_s7, %s393_s7 }
 0x29e   :  { %p4559_p1 = scmp.lt.s32.totalorder %s4557_s29, %s4553_s9 }
 0x2a0   :  { %p4560_p2 = por %p4559_p1, %p4558_p0 }
 0x2a2   :  { %p4561_p3 = pnand %p4560_p2, %p4554_p13 }
 0x2a4   :  { %4564 = shalt.err (!%p4561_p3)
}
 0x2a5   :  { %s5890_s11 = sld [smem:[#allocation97_spill]] }
 0x2a6   :  { %395 = dma.hbm_to_vmem [thread:$0]  %s5889_s2, 16, %s393_s7, [#allocation42]  }
 0x2ab   :  { %s4565_s17 = scalar_lea.hbm %s5890_s11, 256 }
 0x2ac   :  { %p4566_p4 = scmp.ne.s32.totalorder %s5890_s11, %s4565_s17  ;;  %p4569_p5 = scmp.lt.u32.totalorder %s4565_s17, %s5890_s11 }
 0x2ae   :  { %p4571_p6 = pnand %p4569_p5, %p4566_p4 }
 0x2b0   :  { %4574 = shalt.err (!%p4571_p6)
}
 0x2b1   :  { %s4575_s4 = scalar_lea.vmem %s414_s3, 256  ;;  %p4580_p8 = scmp.lt.s32.totalorder %s414_s3, %s414_s3 }
 0x2b2   :  { %p4576_p7 = scmp.ne.s32.totalorder %s414_s3, %s4575_s4  ;;  %p4581_p9 = scmp.lt.s32.totalorder %s4575_s4, %s4575_s4 }
 0x2b4   :  { %p4582_p10 = por %p4581_p9, %p4580_p8 }
 0x2b6   :  { %p4583_p11 = pnand %p4582_p10, %p4576_p7 }
 0x2b8   :  { %4586 = shalt.err (!%p4583_p11)
}
 0x2b9   :  { %s5891_s14 = sld [smem:[#allocation99_spill]]  ;;  %s4836_s5 = smov [#allocation49]  }
 0x2ba   :  { %419 = dma.hbm_to_vmem [thread:$0]  %s5890_s11, 256, %s414_s3, [#allocation45], %s4800_s22, %s4800_s22, %s4801_s23  }
 0x2bb   :  { %s436_s21 = sshll.u32 %s4836_s5, 4  ;;  %s4837_s16 = smov [#allocation52]   ;;  %s437_s21 = int_to_ptr.vmem [resolvable:$true] %s436_s21 }
 0x2bc   :  { %s456_s30 = sshll.u32 %s4837_s16, 4  ;;  %s457_s30 = int_to_ptr.vmem [resolvable:$true] %s456_s30 }
 0x2bf   :  { %s4587_s24 = scalar_lea.hbm %s5891_s14, 16 }
 0x2c0   :  { %p4588_p12 = scmp.ne.s32.totalorder %s5891_s14, %s4587_s24  ;;  %p4591_p13 = scmp.lt.u32.totalorder %s4587_s24, %s5891_s14 }
 0x2c2   :  { %p4593_p0 = pnand %p4591_p13, %p4588_p12 }
 0x2c4   :  { %4596 = shalt.err (!%p4593_p0)
}
 0x2c5   :  { %s4597_s18 = scalar_lea.vmem %s437_s21, 16  ;;  %s4601_s26 = scalar_lea.vmem %s437_s21, 32 }
 0x2c6   :  { %p4598_p1 = scmp.ne.s32.totalorder %s437_s21, %s4597_s18  ;;  %p4602_p2 = scmp.lt.s32.totalorder %s437_s21, %s437_s21 }
 0x2c7   :  { %p4603_p3 = scmp.lt.s32.totalorder %s4601_s26, %s4597_s18 }
 0x2c9   :  { %p4604_p4 = por %p4603_p3, %p4602_p2 }
 0x2cb   :  { %p4605_p5 = pnand %p4604_p4, %p4598_p1 }
 0x2cd   :  { %4608 = shalt.err (!%p4605_p5)
}
 0x2ce   :  { %s5892_s28 = sld [smem:[#allocation101_spill]] }
 0x2cf   :  { %439 = dma.hbm_to_vmem [thread:$0]  %s5891_s14, 16, %s437_s21, [#allocation48]  }
 0x2d4   :  { %s4609_s1 = scalar_lea.hbm %s5892_s28, 16 }
 0x2d5   :  { %p4610_p6 = scmp.ne.s32.totalorder %s5892_s28, %s4609_s1  ;;  %p4613_p7 = scmp.lt.u32.totalorder %s4609_s1, %s5892_s28 }
 0x2d7   :  { %p4615_p8 = pnand %p4613_p7, %p4610_p6 }
 0x2d9   :  { %4618 = shalt.err (!%p4615_p8)
}
 0x2da   :  { %s4619_s25 = scalar_lea.vmem %s457_s30, 16  ;;  %s4623_s19 = scalar_lea.vmem %s457_s30, 32 }
 0x2db   :  { %p4620_p9 = scmp.ne.s32.totalorder %s457_s30, %s4619_s25  ;;  %p4624_p10 = scmp.lt.s32.totalorder %s457_s30, %s457_s30 }
 0x2dc   :  { %p4625_p11 = scmp.lt.s32.totalorder %s4623_s19, %s4619_s25 }
 0x2de   :  { %p4626_p12 = por %p4625_p11, %p4624_p10 }
 0x2e0   :  { %p4627_p13 = pnand %p4626_p12, %p4620_p9 }
 0x2e2   :  { %4630 = shalt.err (!%p4627_p13)
}
 0x2e3   :  { %s5893_s6 = sld [smem:[#allocation103_spill]]  ;;  %s4838_s2 = smov [#allocation55]  }
 0x2e4   :  { %459 = dma.hbm_to_vmem [thread:$0]  %s5892_s28, 16, %s457_s30, [#allocation51]  }
 0x2e5   :  { %s475_s8 = sshll.u32 %s4838_s2, 4  ;;  %s4839_s7 = smov [#allocation58]   ;;  %s476_s8 = int_to_ptr.vmem [resolvable:$true] %s475_s8 }
 0x2e6   :  { %s498_s20 = sshll.u32 %s4839_s7, 4  ;;  %s499_s20 = int_to_ptr.vmem [resolvable:$true] %s498_s20 }
 0x2e9   :  { %s4631_s3 = scalar_lea.hbm %s5893_s6, 256 }
 0x2ea   :  { %p4632_p0 = scmp.ne.s32.totalorder %s5893_s6, %s4631_s3  ;;  %p4635_p1 = scmp.lt.u32.totalorder %s4631_s3, %s5893_s6 }
 0x2ec   :  { %p4637_p2 = pnand %p4635_p1, %p4632_p0 }
 0x2ee   :  { %4640 = shalt.err (!%p4637_p2)
}
 0x2ef   :  { %s4641_s10 = scalar_lea.vmem %s476_s8, 256  ;;  %p4646_p4 = scmp.lt.s32.totalorder %s476_s8, %s476_s8 }
 0x2f0   :  { %p4642_p3 = scmp.ne.s32.totalorder %s476_s8, %s4641_s10  ;;  %p4647_p5 = scmp.lt.s32.totalorder %s4641_s10, %s4641_s10 }
 0x2f2   :  { %p4648_p6 = por %p4647_p5, %p4646_p4 }
 0x2f4   :  { %p4649_p7 = pnand %p4648_p6, %p4642_p3 }
 0x2f6   :  { %4652 = shalt.err (!%p4649_p7)
}
 0x2f7   :  { %481 = dma.hbm_to_vmem [thread:$0]  %s5893_s6, 256, %s476_s8, [#allocation54], %s4800_s22, %s4800_s22, %s4801_s23  }
 0x2f8   :  { %s4653_s9 = scalar_lea.hbm %s5033_s27, 16 }
 0x2f9   :  { %p4654_p8 = scmp.ne.s32.totalorder %s5033_s27, %s4653_s9  ;;  %p4657_p9 = scmp.lt.u32.totalorder %s4653_s9, %s5033_s27 }
 0x2fb   :  { %p4659_p10 = pnand %p4657_p9, %p4654_p8 }
 0x2fd   :  { %4662 = shalt.err (!%p4659_p10)
}
 0x2fe   :  { %s4663_s29 = scalar_lea.vmem %s499_s20, 16  ;;  %s4667_s11 = scalar_lea.vmem %s499_s20, 32 }
 0x2ff   :  { %p4664_p11 = scmp.ne.s32.totalorder %s499_s20, %s4663_s29  ;;  %p4668_p12 = scmp.lt.s32.totalorder %s499_s20, %s499_s20 }
 0x300   :  { %p4669_p13 = scmp.lt.s32.totalorder %s4667_s11, %s4663_s29 }
 0x302   :  { %p4670_p0 = por %p4669_p13, %p4668_p12 }
 0x304   :  { %p4671_p1 = pnand %p4670_p0, %p4664_p11 }
 0x306   :  { %4674 = shalt.err (!%p4671_p1)
}
 0x307   :  { %501 = dma.hbm_to_vmem [thread:$0]  %s5033_s27, 16, %s499_s20, [#allocation57]  }
 0x308   :  { %4719 = dma.done.wait [#allocation3], 64  }
 0x309   :  { %4720 = vsyncadd [#allocation3], 4294967232 }
 0x30a   :  { %4721 = dma.done.wait [#allocation6], 256  }
 0x30b   :  { %4722 = vsyncadd [#allocation6], 4294967040 }
 0x30c   :  { %4723 = dma.done.wait [#allocation9], 192  }
 0x30d   :  { %4724 = vsyncadd [#allocation9], 4294967104 }
 0x30e   :  { %4725 = dma.done.wait [#allocation12], 384  }
 0x30f   :  { %4726 = vsyncadd [#allocation12], 4294966912 }
 0x310   :  { %4727 = dma.done.wait [#allocation15], 288  }
 0x311   :  { %4728 = vsyncadd [#allocation15], 4294967008 }
 0x312   :  { %4729 = dma.done.wait [#allocation18], 64  }
 0x313   :  { %4730 = vsyncadd [#allocation18], 4294967232 }
 0x314   :  { %4731 = dma.done.wait [#allocation21], 640  }
 0x315   :  { %4732 = vsyncadd [#allocation21], 4294966656 }
 0x316   :  { %4733 = dma.done.wait [#allocation24], 832  }
 0x317   :  { %4734 = vsyncadd [#allocation24], 4294966464 }
 0x318   :  { %4735 = dma.done.wait [#allocation27], 1056  }
 0x319   :  { %4736 = vsyncadd [#allocation27], 4294966240 }
 0x31a   :  { %4737 = dma.done.wait [#allocation30], 128  }
 0x31b   :  { %4738 = vsyncadd [#allocation30], 4294967168 }
 0x31c   :  { %4739 = dma.done.wait [#allocation33], 32  }
 0x31d   :  { %4740 = vsyncadd [#allocation33], 4294967264 }
 0x31e   :  { %4741 = dma.done.wait [#allocation36], 32  }
 0x31f   :  { %4742 = vsyncadd [#allocation36], 4294967264 }
 0x320   :  { %4743 = dma.done.wait [#allocation39], 272  }
 0x321   :  { %4744 = vsyncadd [#allocation39], 4294967024 }
 0x322   :  { %4745 = dma.done.wait [#allocation42], 32  }
 0x323   :  { %4746 = vsyncadd [#allocation42], 4294967264 }
 0x324   :  { %4747 = dma.done.wait [#allocation45], 512  }
 0x325   :  { %4748 = vsyncadd [#allocation45], 4294966784 }
 0x326   :  { %4749 = dma.done.wait [#allocation48], 32  }
 0x327   :  { %4750 = vsyncadd [#allocation48], 4294967264 }
 0x328   :  { %4751 = dma.done.wait [#allocation51], 32  }
 0x329   :  { %4752 = vsyncadd [#allocation51], 4294967264 }
 0x32a   :  { %4753 = dma.done.wait [#allocation54], 272  }
 0x32b   :  { %4754 = vsyncadd [#allocation54], 4294967024 }
 0x32c   :  { %4755 = dma.done.wait [#allocation57], 32  }
 0x32d   :  { %4756 = vsyncadd [#allocation57], 4294967264  ;;  %v4840_v0 = vmov 0.0   ;;  %vm4841_vm0 = vmmov 0   ;;  %vm675_vm1 = vcmask 1043456   ;;  %vm671_vm2 = vcmask 64512  }
 0x32e   :  { %3331 = vmatprep.subr.bf16.mxu0 %v4840_v0  ;;  %3333 = vmatprep.mubr.msk.bf16.mxu0 %vm4841_vm0, %v4840_v0  ;;  %v663_v1 = vld [vmem:[#allocation29] sm:$0xf]  ;;  %v720_v2 = vld [vmem:[#allocation31] sm:$0xf]  ;;  %v614_v5 = vld [vmem:[#allocation2] sm:$0xf]  ;;  %v838_v62 = vlaneseq }
 0x32f   :  { %3337 = vmatprep.subr.bf16.mxu1 %v4840_v0  ;;  %3339 = vmatprep.mubr.msk.bf16.mxu1 %vm4841_vm0, %v4840_v0  ;;  %v677_v3 = vsel %vm675_vm1, %v663_v1, 0  ;;  %v737_v4 = vsel %vm675_vm1, %v720_v2, 0  ;;  %v3753_v6 = vld [vmem:[#allocation5] sm:$0xff]   ;;  %v3754_v7 = vld [vmem:[#allocation20] sm:$0xff]   ;;  %v3755_v8 = vld [vmem:[#allocation20 + $0x8] sm:$0xff]   ;;  %vm788_vm3 = vcmask 261120  }
 0x330   :  { %3332 = vmatpush3.bf16.msra.mxu0 %v677_v3  ;;  %3338 = vmatpush3.bf16.msra.mxu1 %v737_v4  ;;  %v3756_v9 = vld [vmem:[#allocation20 + $0x10] ss:$0 sps:$4 sm:$0xff]   ;;  %v3131_v11 = vld [vmem:[#allocation32] ss:$0 sm:$0xff]  ;;  %v3133_v12 = vld [vmem:[#allocation34] ss:$0 sm:$0xff] }
 0x331   :  { %3343 = vmatprep.subr.bf16.mxu0 %v4840_v0  ;;  %3351 = vmatprep.subr.bf16.mxu1 %v4840_v0  ;;  %v5252_v10 = vsel %vm675_vm1, %v3756_v9, 0  ;;  %v5256_v14 = vld [vmem:[#allocation25] sm:$0xff]  ;;  %v5258_v15 = vld [vmem:[#allocation25 + $0x8] sm:$0xff]  ;;  %v5262_v21 = vld [vmem:[#allocation25 + $0x10] sm:$0xff]  ;;  %vm857_vm4 = vcmask 326656   ;;  %v839_v63 = vshrl.u32 %v838_v62, 7 }
 0x332   :  { %v654_v22 = vld [vmem:[#allocation26] sm:$0xff]  ;;  %v656_v23 = vld [vmem:[#allocation26 + $0x10] sm:$0xff]  ;;  %v5264_v26 = vld [vmem:[#allocation25 + $0x18] sm:$0xff]  ;;  %vm982_vm7 = vcmask 1041408   ;;  %vm1171_vm8 = vcmask 293888   ;;  %vm978_vm9 = vcmask 31744  }
 0x333   :  { %3334 = vmatmul.mubr.msk.bf16.vlgmr.msra.gmra.mrb[0].mxu0 %vm671_vm2, %v614_v5  ;;  %3340 = vmatmul.mubr.msk.bf16.vlgmr.msra.gmra.mrb[0].mxu1 %vm671_vm2, %v3753_v6  ;;  %v655_v27 = vld [vmem:[#allocation26 + $0x8] sm:$0xff]  ;;  %v657_v28 = vld [vmem:[#allocation26 + $0x18] sm:$0xff]  ;;  %v658_v34 = vld [vmem:[#allocation26 + $0x20] sm:$0xff]  ;;  %v5298_v1 = vsub.s32 0, %v839_v63  ;;  %vm1222_vm11 = vcmask 523264   ;;  %vm1729_vm14 = vcmask 253952  }
 0x334   :  { %3357 = vmatprep.mubr.msk.bf16.mxu1 %vm4841_vm0, %v4840_v0  ;;  %3347 = vmatprep.mubr.msk.bf16.mxu0 %vm4841_vm0, %v4840_v0  ;;  %v659_v35 = vld [vmem:[#allocation26 + $0x28] sm:$0xff]  ;;  %v660_v36 = vld [vmem:[#allocation26 + $0x30] sm:$0xff]  ;;  %v661_v40 = vld [vmem:[#allocation26 + $0x38] sm:$0xff]  ;;  %s4843_s27 = smov [#allocation59]  }
 0x335   :  { %3352 = vmatpush3.bf16.msra.mxu1 %v3754_v7  ;;  %v787_v57 = vld [vmem:[#allocation35] sm:$0x1]  ;;  %v5301_v5 = vld [vmem:[#allocation7] sm:$0xff]   ;;  %s3050_s22 = sshll.u32 %s4843_s27, 4  ;;  %s3051_s22 = int_to_ptr.vmem [resolvable:$true] %s3050_s22 }
 0x336   :  { %3353 = vmatprep.subr.bf16.mxu1 %v4840_v0  ;;  %s4675_s23 = scalar_lea.vmem %s3051_s22, 128  ;;  %p4680_p3 = scmp.lt.s32.totalorder %s3051_s22, %s3051_s22 }
 0x337   :  { %p4676_p2 = scmp.ne.s32.totalorder %s3051_s22, %s4675_s23  ;;  %p4681_p4 = scmp.lt.s32.totalorder %s4675_s23, %s4675_s23 }
 0x339   :  { %3354 = vmatpush3.bf16.msra.mxu1 %v3755_v8  ;;  %p4682_p5 = por %p4681_p4, %p4680_p3 }
 0x33a   :  { %3355 = vmatprep.subr.bf16.mxu1 %v4840_v0 }
 0x33b   :  { %p4683_p6 = pnand %p4682_p5, %p4676_p2 }
 0x33d   :  { %3356 = vmatpush3.bf16.msra.mxu1 %v5252_v10 }
 0x33e   :  { %3361 = vmatprep.subr.bf16.mxu1 %v4840_v0 }
 0x406   :  { %v713_v13 = vpop.f32.mrb[0].mxu0  ;;  %v773_v16 = vpop.f32.mrb[0].mxu1 }
 0x407   :  { %v5260_v17 = vadd.f32 %v3131_v11, %v713_v13  ;;  %v3335_v18 = vpop.f32.mrb[1].mxu0  ;;  %v774_v19 = vadd.f32 %v3133_v12, %v773_v16  ;;  %v3341_v20 = vpop.f32.mrb[1].mxu1  ;;  %v3197_v11 = vunpack.c.l.bf16 %v5301_v5  ;;  %v3198_v16 = vunpack.c.h.bf16 %v5301_v5 }
 0x408   :  { %v716_v24 = vpop.f32.mrb[2].mxu0  ;;  %v776_v25 = vpop.f32.mrb[2].mxu1 }
 0x409   :  { %v3336_v29 = vpop.f32.mrb[3].mxu0  ;;  %v781_v30 = vmul.f32 %v5260_v17, %v5256_v14  ;;  %v782_v31 = vmul.f32 %v5260_v17, %v5258_v15  ;;  %v777_v32 = vadd.f32 %v3133_v12, %v776_v25  ;;  %v3342_v33 = vpop.f32.mrb[3].mxu1  ;;  %v783_v37 = vmul.f32 %v5260_v17, %v5262_v21  ;;  %v632_v25 = vld [vmem:[#allocation16] sm:$0x3] }
 0x40a   :  { %v1084_v38 = vmul.f32 %v774_v19, %v654_v22  ;;  %v1086_v39 = vmul.f32 %v774_v19, %v656_v23  ;;  %v784_v45 = vmul.f32 %v5260_v17, %v5264_v26  ;;  %v1088_v46 = vmul.f32 %v774_v19, %v658_v34 }
 0x40b   :  { %v5272_v41 = vpack.c.bf16 %v782_v31, %v781_v30  ;;  %v5274_v42 = vpack.c.bf16 %v777_v32, %v774_v19  ;;  %v1085_v43 = vmul.f32 %v777_v32, %v655_v27  ;;  %v1087_v44 = vmul.f32 %v777_v32, %v657_v28  ;;  %v662_v28 = vld [vmem:[#allocation28] sm:$0x3] }
 0x40c   :  { %v1089_v47 = vmul.f32 %v777_v32, %v659_v35  ;;  %v1090_v48 = vmul.f32 %v774_v19, %v660_v36  ;;  %v1091_v52 = vmul.f32 %v777_v32, %v661_v40  ;;  %v786_v55 = vpack.c.bf16 %v784_v45, %v783_v37  ;;  %v5331_v40 = vld [vmem:[#allocation22 + $0x8] sm:$0xff]  }
 0x40d   :  { %v793_v49 = vsel %vm788_vm3, %v5272_v41, 0  ;;  %3358 = vmatmul.mubr.msk.bf16.vlgmr.msra.gmra.mrb[4].mxu1 %vm857_vm4, %v5274_v42  ;;  %v5282_v50 = vpack.c.bf16 %v1085_v43, %v1084_v38  ;;  %v5284_v51 = vpack.c.bf16 %v1087_v44, %v1086_v39  ;;  %v5312_v27 = vsel %vm788_vm3, %v632_v25, 0  ;;  %v5326_v39 = vld [vmem:[#allocation22] sm:$0xff]  }
 0x40e   :  { %3344 = vmatpush3.bf16.xpose.msra.mxu0 %v793_v49  ;;  %3363 = vmatprep.mubr.msk.bf16.mxu1 %vm4841_vm0, %v4840_v0  ;;  %v5288_v53 = vpack.c.bf16 %v1089_v47, %v1088_v46  ;;  %v5291_v54 = vpack.c.bf16 %v1091_v52, %v1090_v48  ;;  %v796_v56 = vsel %vm788_vm3, %v786_v55, 0  ;;  %v5317_v29 = vsel %vm982_vm7, %v662_v28, 0 }
 0x40f   :  { %3345 = vmatprep.subr.bf16.mxu0 %v4840_v0  ;;  %3362 = vmatpush3.bf16.xpose.msra.mxu1 %v5312_v27  ;;  %v719_v44 = vpack.c.bf16 %v5260_v17, %v5260_v17 }
 0x410   :  { %3373 = vmatprep.subr.bf16.mxu1 %v4840_v0 }
 0x416   :  { %3346 = vmatpush3.bf16.xpose.msra.mxu0 %v796_v56 }
 0x417   :  { %3367 = vmatprep.subr.bf16.mxu0 %v4840_v0 }
 0x41d   :  { %3348 = vmatmul.mubr.msk.bf16.vlgmr.msra.gmra.mrb[4].mxu0 %vm788_vm3, %v787_v57 }
 0x41e   :  { %3369 = vmatprep.mubr.msk.bf16.mxu0 %vm4841_vm0, %v4840_v0  ;;  %3368 = vmatpush3.bf16.msra.mxu0 %v5317_v29 }
 0x41f   :  { %3381 = vmatprep.subr.bf16.mxu0 %v4840_v0 }
 0x4e0   :  { %v898_v58 = vpop.f32.mrb[4].mxu1 }
 0x4e1   :  { %v3359_v59 = vpop.f32.mrb[5].mxu1 }
 0x4e2   :  { %v901_v60 = vpop.f32.mrb[6].mxu1 }
 0x4e3   :  { %v3360_v61 = vpop.f32.mrb[7].mxu1 }
 0x4e4   :  { %v5355_v61 = vsel %vm788_vm3, %v5282_v50, 0 }
 0x4f0   :  { %v832_v2 = vpop.f32.mrb[4].mxu0 }
 0x4f1   :  { %v841_v3 = vrot.slane %v832_v2, %v5298_v1  ;;  %v3349_v4 = vpop.f32.mrb[5].mxu0 }
 0x4f2   :  { %v835_v6 = vpop.f32.mrb[6].mxu0  ;;  %v5363_v4 = vsel %vm788_vm3, %v5284_v51, 0 }
 0x4f3   :  { %v899_v7 = vadd.f32 %v898_v58, %v841_v3  ;;  %v902_v8 = vadd.f32 %v901_v60, %v841_v3  ;;  %v3350_v9 = vpop.f32.mrb[7].mxu0  ;;  %v5369_v6 = vsel %vm788_vm3, %v5288_v53, 0 }
 0x4f5   :  { %v907_v12 = vmul.f32 0.2, %v899_v7  ;;  %v908_v13 = vmul.f32 0.2, %v902_v8  ;;  %vm905_vm5 = vcmp.ge.f32.partialorder %v899_v7, 0.0  ;;  %vm906_vm6 = vcmp.ge.f32.partialorder %v902_v8, 0.0 }
 0x4f7   :  { %v909_v18 = vsel %vm905_vm5, %v899_v7, %v907_v12  ;;  %v910_v19 = vsel %vm906_vm6, %v902_v8, %v908_v13  ;;  %v5375_v7 = vsel %vm788_vm3, %v5291_v54, 0  ;;  %v1096_v8 = vld [vmem:[#allocation37] sm:$0x1] }
 0x4f8   :  { %v911_v20 = vadd.f32 %v3197_v11, %v909_v18  ;;  %v912_v23 = vadd.f32 %v3198_v16, %v910_v19 }
 0x4fa   :  { %v913_v22 = vsel %vm788_vm3, %v911_v20, -inf  ;;  %v916_v24 = vsel %vm788_vm3, %v912_v23, -inf }
 0x4fb   :  { %914 = vmax.xlane.f32.xlu0 %v913_v22 }
 0x4ff   :  { %917 = vmax.xlane.f32.xlu0 %v916_v24 }
 0x588   :  { %v915_v30 = vpop.xlane.xlu0 %914 }
 0x589   :  { %v919_v31 = vsub.f32 %v911_v20, %v915_v30 }
 0x58b   :  { %v921_v32 = vmul.f32 1.442695, %v919_v31 }
 0x58c   :  { %v918_v33 = vpop.xlane.xlu0 %917 }
 0x58d   :  { %v920_v34 = vsub.f32 %v912_v23, %v918_v33  ;;  %3771 = vpow2.f32 %v921_v32  ;;  %v5395_v23 = vld [vmem:[#allocation8] sm:$0xf] }
 0x58e   :  { %v622_v30 = vunpack.c.l.bf16 %v5395_v23 }
 0x58f   :  { %v923_v35 = vmul.f32 1.442695, %v920_v34 }
 0x591   :  { %3773 = vpow2.f32 %v923_v35  ;;  %v633_v35 = vld [vmem:[#allocation17] sm:$0x3] }
 0x597   :  { %v3772_v36 = vpop.eup %3771 }
 0x59b   :  { %v3774_v37 = vpop.eup %3773 }
 0x59c   :  { %v925_v38 = vpack.c.bf16 %v3774_v37, %v3772_v36  ;;  %v5402_v36 = vsel %vm1222_vm11, %v633_v35, 0 }
 0x59e   :  { %3364 = vmatmul.mubr.msk.bf16.vlgmr.msra.gmra.mrb[8].mxu1 %vm788_vm3, %v925_v38 }
 0x59f   :  { %3374 = vmatpush3.bf16.msra.mxu1 %v5272_v41  ;;  %3377 = vmatprep.mubr.msk.bf16.mxu1 %vm4841_vm0, %v4840_v0  ;;  %v3759_v41 = vld [vmem:[#allocation22 + $0x10] ss:$0 sps:$4 sm:$0x33]  }
 0x5a0   :  { %3375 = vmatprep.subr.bf16.mxu1 %v4840_v0  ;;  %v5339_v43 = vsel %vm982_vm7, %v3759_v41, 0 }
 0x5a3   :  { %3376 = vmatpush3.bf16.msra.mxu1 %v786_v55 }
 0x5a4   :  { %3393 = vmatprep.subr.bf16.mxu1 %v4840_v0 }
 0x5a6   :  { %3378 = vmatmul.mubr.msk.bf16.vlgmr.msra.gmra.mrb[12].mxu1 %vm788_vm3, %v925_v38 }
 0x5a7   :  { %3394 = vmatpush3.bf16.msra.mxu1 %v5326_v39  ;;  %3399 = vmatprep.mubr.msk.bf16.mxu1 %vm4841_vm0, %v4840_v0 }
 0x5a8   :  { %3395 = vmatprep.subr.bf16.mxu1 %v4840_v0 }
 0x5ab   :  { %3396 = vmatpush3.bf16.msra.mxu1 %v5331_v40 }
 0x5ac   :  { %3397 = vmatprep.subr.bf16.mxu1 %v4840_v0 }
 0x5af   :  { %3398 = vmatpush3.bf16.msra.mxu1 %v5339_v43 }
 0x5b0   :  { %3403 = vmatprep.subr.bf16.mxu1 %v4840_v0 }
 0x5b2   :  { %3400 = vmatmul.mubr.msk.bf16.vlgmr.msra.gmra.mrb[16].mxu1 %vm1171_vm8, %v719_v44 }
 0x5b3   :  { %3405 = vmatprep.mubr.msk.bf16.mxu1 %vm4841_vm0, %v4840_v0 }
 0x5b8   :  { %3404 = vmatpush3.bf16.xpose.msra.mxu1 %v5402_v36 }
 0x5b9   :  { %3409 = vmatprep.subr.bf16.mxu1 %v4840_v0 }
 0x671   :  { %v966_v45 = vpop.f32.mrb[8].mxu1 }
 0x672   :  { %v973_v46 = vmax.f32 %v966_v45, 1e-20  ;;  %v3365_v47 = vpop.f32.mrb[9].mxu1  ;;  %v5406_v45 = vld [vmem:[#allocation23] sm:$0xff]  }
 0x673   :  { %v969_v48 = vpop.f32.mrb[10].mxu1  ;;  %v5411_v47 = vld [vmem:[#allocation23 + $0x8] sm:$0xff]  }
 0x674   :  { %v974_v49 = vmax.f32 %v969_v48, 1e-20  ;;  %v3366_v52 = vpop.f32.mrb[11].mxu1  ;;  %3775 = vrcp.f32 %v973_v46  ;;  %v3762_v48 = vld [vmem:[#allocation23 + $0x10] ss:$0 sps:$4 sm:$0xff]  }
 0x676   :  { %3777 = vrcp.f32 %v974_v49  ;;  %v5423_v49 = vsel %vm675_vm1, %v3762_v48, 0 }
 0x679   :  { %v5348_v55 = vpop.f32.mrb[12].mxu1 }
 0x67a   :  { %v3379_v56 = vpop.f32.mrb[13].mxu1 }
 0x67b   :  { %v5350_v57 = vpop.f32.mrb[14].mxu1 }
 0x67c   :  { %v3380_v17 = vpop.f32.mrb[15].mxu1 }
 0x67e   :  { %v3776_v58 = vpop.eup %3775 }
 0x680   :  { %v3778_v59 = vpop.eup %3777 }
 0x681   :  { %v977_v60 = vpack.c.bf16 %v3778_v59, %v3776_v58 }
 0x683   :  { %3370 = vmatmul.mubr.msk.bf16.vlgmr.msra.gmra.mrb[8].mxu0 %vm978_vm9, %v977_v60 }
 0x684   :  { %3382 = vmatpush3.bf16.xpose.msra.mxu0 %v5355_v61  ;;  %3389 = vmatprep.mubr.msk.bf16.mxu0 %vm4841_vm0, %v4840_v0 }
 0x685   :  { %v1212_v62 = vpop.f32.mrb[16].mxu1  ;;  %3383 = vmatprep.subr.bf16.mxu0 %v4840_v0 }
 0x686   :  { %v3401_v63 = vpop.f32.mrb[17].mxu1 }
 0x687   :  { %v1215_v2 = vpop.f32.mrb[18].mxu1 }
 0x688   :  { %v3402_v3 = vpop.f32.mrb[19].mxu1 }
 0x68c   :  { %3384 = vmatpush3.bf16.xpose.msra.mxu0 %v5363_v4 }
 0x68d   :  { %3385 = vmatprep.subr.bf16.mxu0 %v4840_v0 }
 0x694   :  { %3386 = vmatpush3.bf16.xpose.msra.mxu0 %v5369_v6 }
 0x695   :  { %3387 = vmatprep.subr.bf16.mxu0 %v4840_v0 }
 0x69c   :  { %3388 = vmatpush3.bf16.xpose.msra.mxu0 %v5375_v7 }
 0x69d   :  { %3415 = vmatprep.subr.bf16.mxu0 %v4840_v0 }
 0x6a3   :  { %3390 = vmatmul.mubr.msk.bf16.vlgmr.msra.gmra.mrb[12].mxu0 %vm788_vm3, %v1096_v8 }
 0x6a4   :  { %3416 = vmatpush3.bf16.msra.mxu0 %v5282_v50  ;;  %3423 = vmatprep.mubr.msk.bf16.mxu0 %vm4841_vm0, %v4840_v0 }
 0x6a5   :  { %3417 = vmatprep.subr.bf16.mxu0 %v4840_v0 }
 0x6a8   :  { %3418 = vmatpush3.bf16.msra.mxu0 %v5284_v51 }
 0x6a9   :  { %3419 = vmatprep.subr.bf16.mxu0 %v4840_v0 }
 0x6ac   :  { %3420 = vmatpush3.bf16.msra.mxu0 %v5288_v53 }
 0x6ad   :  { %3421 = vmatprep.subr.bf16.mxu0 %v4840_v0 }
 0x6b0   :  { %3422 = vmatpush3.bf16.msra.mxu0 %v5291_v54 }
 0x6b1   :  { %3439 = vmatprep.subr.bf16.mxu0 %v4840_v0 }
 0x756   :  { %v5390_v9 = vpop.f32.mrb[8].mxu0 }
 0x757   :  { %v3371_v12 = vpop.f32.mrb[9].mxu0 }
 0x758   :  { %v5392_v13 = vpop.f32.mrb[10].mxu0 }
 0x759   :  { %v3372_v18 = vpop.f32.mrb[11].mxu0 }
 0x776   :  { %v1146_v19 = vpop.f32.mrb[12].mxu0 }
 0x777   :  { %v1155_v20 = vrot.slane %v1146_v19, %v5298_v1  ;;  %v3391_v22 = vpop.f32.mrb[13].mxu0 }
 0x778   :  { %v1149_v24 = vpop.f32.mrb[14].mxu0 }
 0x779   :  { %v1213_v25 = vadd.f32 %v1212_v62, %v1155_v20  ;;  %v3392_v28 = vpop.f32.mrb[15].mxu0  ;;  %v1370_v20 = vld [vmem:[#allocation38] sm:$0x1] }
 0x77b   :  { %v1219_v31 = vmul.f32 0.2, %v1213_v25  ;;  %vm1218_vm10 = vcmp.ge.f32.partialorder %v1213_v25, 0.0 }
 0x77d   :  { %v1220_v32 = vsel %vm1218_vm10, %v1213_v25, %v1219_v31  ;;  %v5450_v31 = vld [vmem:[#allocation10] sm:$0xff]  }
 0x77e   :  { %v1221_v33 = vadd.f32 %v1220_v32, %v622_v30 }
 0x780   :  { %v1223_v34 = vsel %vm1222_vm11, %v1221_v33, -inf }
 0x781   :  { %1224 = vmax.xlane.f32.xlu1 %v1223_v34 }
 0x80e   :  { %v1225_v37 = vpop.xlane.xlu1 %1224 }
 0x80f   :  { %v1226_v38 = vsub.f32 %v1221_v33, %v1225_v37  ;;  %v3201_v37 = vunpack.c.l.bf16 %v5450_v31 }
 0x811   :  { %v1227_v41 = vmul.f32 1.442695, %v1226_v38  ;;  %v3202_v38 = vunpack.c.h.bf16 %v5450_v31  ;;  %v3769_v31 = vld [vmem:[#allocation55] sm:$0xff]  }
 0x813   :  { %3779 = vpow2.f32 %v1227_v41 }
 0x81d   :  { %v3780_v44 = vpop.eup %3779 }
 0x81e   :  { %v1229_v46 = vpack.c.bf16 %v3780_v44, %v3780_v44 }
 0x820   :  { %3406 = vmatmul.mubr.msk.bf16.vlgmr.msra.gmra.mrb[20].mxu1 %vm1222_vm11, %v1229_v46  ;;  %3424 = vmatmul.mubr.msk.bf16.vlgmr.msra.gmra.mrb[16].mxu0 %vm1222_vm11, %v1229_v46 }
 0x821   :  { %3440 = vmatpush3.bf16.msra.mxu0 %v5406_v45  ;;  %3445 = vmatprep.mubr.msk.bf16.mxu0 %vm4841_vm0, %v4840_v0 }
 0x822   :  { %3441 = vmatprep.subr.bf16.mxu0 %v4840_v0  ;;  %3410 = vmatpush3.bf16.msra.mxu1 %v5317_v29 }
 0x823   :  { %3411 = vmatprep.mubr.msk.bf16.mxu1 %vm4841_vm0, %v4840_v0  ;;  %3427 = vmatprep.subr.bf16.mxu1 %v4840_v0 }
 0x825   :  { %3442 = vmatpush3.bf16.msra.mxu0 %v5411_v47 }
 0x826   :  { %3443 = vmatprep.subr.bf16.mxu0 %v4840_v0 }
 0x829   :  { %3444 = vmatpush3.bf16.msra.mxu0 %v5423_v49 }
 0x82a   :  { %3449 = vmatprep.subr.bf16.mxu0 %v4840_v0 }
 0x82c   :  { %3446 = vmatmul.mubr.msk.bf16.vlgmr.msra.gmra.mrb[20].mxu0 %vm857_vm4, %v5274_v42 }
 0x82d   :  { %3451 = vmatprep.mubr.msk.bf16.mxu0 %vm4841_vm0, %v4840_v0 }
 0x8f3   :  { %v1270_v52 = vpop.f32.mrb[20].mxu1  ;;  %v5431_v56 = vpop.f32.mrb[16].mxu0 }
 0x8f4   :  { %v1276_v17 = vmax.f32 %v1270_v52, 1e-20  ;;  %v3407_v58 = vpop.f32.mrb[21].mxu1  ;;  %v3425_v59 = vpop.f32.mrb[17].mxu0 }
 0x8f5   :  { %v1273_v60 = vpop.f32.mrb[22].mxu1  ;;  %v1359_v62 = vpop.f32.mrb[18].mxu0 }
 0x8f6   :  { %3781 = vrcp.f32 %v1276_v17  ;;  %v3408_v63 = vpop.f32.mrb[23].mxu1  ;;  %v3426_v2 = vpop.f32.mrb[19].mxu0  ;;  %v629_v60 = vld [vmem:[#allocation13] sm:$0xff]  ;;  %v628_v62 = vld [vmem:[#allocation11 + $0x8] sm:$0xff] }
 0x8f7   :  { %v627_v63 = vld [vmem:[#allocation11] sm:$0xff]  ;;  %v634_v2 = vld [vmem:[#allocation19] sm:$0x3] }
 0x8ff   :  { %v1470_v3 = vpop.f32.mrb[20].mxu0 }
 0x900   :  { %v3782_v8 = vpop.eup %3781  ;;  %v3447_v12 = vpop.f32.mrb[21].mxu0 }
 0x901   :  { %v1278_v18 = vpack.c.bf16 %v3782_v8, %v3782_v8  ;;  %v1473_v19 = vpop.f32.mrb[22].mxu0 }
 0x902   :  { %v3448_v42 = vpop.f32.mrb[23].mxu0 }
 0x903   :  { %3412 = vmatmul.mubr.msk.bf16.vlgmr.msra.gmra.mrb[24].mxu1 %vm978_vm9, %v1278_v18 }
 0x904   :  { %3428 = vmatpush3.bf16.xpose.msra.mxu1 %v5355_v61  ;;  %3435 = vmatprep.mubr.msk.bf16.mxu1 %vm4841_vm0, %v4840_v0  ;;  %v4842_v61 = vmov 0  }
 0x905   :  { %3429 = vmatprep.subr.bf16.mxu1 %v4840_v0  ;;  %3751 = vset.pattern.permute.xlu1 %v4842_v61 }
 0x906   :  { %3752 = vset.pattern.permute.xlu0 %v4842_v61 }
 0x90c   :  { %3430 = vmatpush3.bf16.xpose.msra.mxu1 %v5363_v4 }
 0x90d   :  { %3431 = vmatprep.subr.bf16.mxu1 %v4840_v0 }
 0x914   :  { %3432 = vmatpush3.bf16.xpose.msra.mxu1 %v5369_v6 }
 0x915   :  { %3433 = vmatprep.subr.bf16.mxu1 %v4840_v0 }
 0x91c   :  { %3434 = vmatpush3.bf16.xpose.msra.mxu1 %v5375_v7 }
 0x91d   :  { %3455 = vmatprep.subr.bf16.mxu1 %v4840_v0 }
 0x923   :  { %3436 = vmatmul.mubr.msk.bf16.vlgmr.msra.gmra.mrb[28].mxu1 %vm788_vm3, %v1370_v20 }
 0x924   :  { %3456 = vmatpush3.bf16.msra.mxu1 %v5317_v29  ;;  %3457 = vmatprep.mubr.msk.bf16.mxu1 %vm4841_vm0, %v4840_v0 }
 0x925   :  { %3473 = vmatprep.subr.bf16.mxu1 %v4840_v0 }
 0x9d6   :  { %v1316_v4 = vpop.f32.mrb[24].mxu1 }
 0x9d7   :  { %v3413_v6 = vpop.f32.mrb[25].mxu1 }
 0x9d8   :  { %v1319_v22 = vpop.f32.mrb[26].mxu1 }
 0x9d9   :  { %v3414_v24 = vpop.f32.mrb[27].mxu1 }
 0x9f6   :  { %v1408_v7 = vpop.f32.mrb[28].mxu1 }
 0x9f7   :  { %v1417_v25 = vrot.slane %v1408_v7, %v5298_v1  ;;  %v3437_v28 = vpop.f32.mrb[29].mxu1 }
 0x9f8   :  { %v1411_v32 = vpop.f32.mrb[30].mxu1 }
 0x9f9   :  { %v1471_v33 = vadd.f32 %v1470_v3, %v1417_v25  ;;  %v1474_v34 = vadd.f32 %v1473_v19, %v1417_v25  ;;  %v3438_v35 = vpop.f32.mrb[31].mxu1  ;;  %v5461_v3 = vsel %vm1222_vm11, %v634_v2, 0 }
 0x9fa   :  { %3450 = vmatpush3.bf16.xpose.msra.mxu0 %v5461_v3 }
 0x9fb   :  { %v1479_v41 = vmul.f32 0.2, %v1471_v33  ;;  %v1480_v44 = vmul.f32 0.2, %v1474_v34  ;;  %vm1477_vm12 = vcmp.ge.f32.partialorder %v1471_v33, 0.0  ;;  %vm1478_vm13 = vcmp.ge.f32.partialorder %v1474_v34, 0.0  ;;  %3461 = vmatprep.subr.bf16.mxu0 %v4840_v0 }
 0x9fd   :  { %v1481_v46 = vsel %vm1477_vm12, %v1471_v33, %v1479_v41  ;;  %v1482_v48 = vsel %vm1478_vm13, %v1474_v34, %v1480_v44 }
 0x9fe   :  { %v1483_v52 = vadd.f32 %v3201_v37, %v1481_v46  ;;  %v1484_v17 = vadd.f32 %v3202_v38, %v1482_v48 }
 0xa00   :  { %v1485_v58 = vsel %vm1222_vm11, %v1483_v52, -inf  ;;  %v1488_v59 = vsel %vm1222_vm11, %v1484_v17, -inf }
 0xa01   :  { %1486 = vmax.xlane.f32.xlu1 %v1485_v58  ;;  %1489 = vmax.xlane.f32.xlu0 %v1488_v59 }
 0xa12   :  { %1364 = vperm.xlu1 %3751, %v629_v60  }
 0xa16   :  { %1075 = vperm.xlu1 %3751, %v628_v62  }
 0xa17   :  { %1070 = vperm.xlu0 %3752, %v627_v63  }
 0xa8e   :  { %v1487_v8 = vpop.xlane.xlu1 %1486  ;;  %v1490_v12 = vpop.xlane.xlu0 %1489 }
 0xa8f   :  { %v1491_v18 = vsub.f32 %v1483_v52, %v1487_v8  ;;  %v1492_v19 = vsub.f32 %v1484_v17, %v1490_v12 }
 0xa91   :  { %v1493_v42 = vmul.f32 1.442695, %v1491_v18  ;;  %v1495_v20 = vmul.f32 1.442695, %v1492_v19 }
 0xa92   :  { %v5465_v61 = vpop.permute.xlu1 %1364 }
 0xa93   :  { %3783 = vpow2.f32 %v1493_v42  ;;  %v1367_v6 = vmul.f32 %v5465_v61, %v1316_v4 }
 0xa94   :  { %3785 = vpow2.f32 %v1495_v20 }
 0xa95   :  { %v1368_v22 = vmul.f32 %v1367_v6, %v5431_v56 }
 0xa96   :  { %v5469_v24 = vpop.permute.xlu1 %1075  ;;  %v5471_v7 = vpop.permute.xlu0 %1070 }
 0xa97   :  { %v1079_v25 = vmul.f32 %v5469_v24, %v5392_v13  ;;  %v1078_v28 = vmul.f32 %v5471_v7, %v5390_v9  ;;  %v5502_v60 = vmax.f32 %v1368_v22, 0.0 }
 0xa99   :  { %v5478_v32 = vmul.f32 %v1079_v25, %v5350_v57  ;;  %v5481_v33 = vmul.f32 %v1078_v28, %v5348_v55  ;;  %v631_v55 = vld [vmem:[#allocation14 + $0x8] sm:$0xff]  ;;  %v1657_v62 = vpack.c.bf16 %v5502_v60, %v5502_v60 }
 0xa9b   :  { %v1083_v63 = vmax.f32 %v5478_v32, 0.0  ;;  %v1082_v2 = vmax.f32 %v5481_v33, 0.0 }
 0xa9d   :  { %v3784_v4 = vpop.eup %3783  ;;  %v1744_v8 = vpack.c.bf16 %v1083_v63, %v1082_v2 }
 0xa9e   :  { %v3786_v34 = vpop.eup %3785 }
 0xa9f   :  { %v1497_v35 = vpack.c.bf16 %v3786_v34, %v3784_v4  ;;  %v5532_v34 = vld [vmem:[#allocation41] ss:$0 sm:$0xff] }
 0xaa1   :  { %3452 = vmatmul.mubr.msk.bf16.vlgmr.msra.gmra.mrb[24].mxu0 %vm1222_vm11, %v1497_v35 }
 0xaa2   :  { %3462 = vmatpush3.bf16.msra.mxu0 %v5282_v50  ;;  %3469 = vmatprep.mubr.msk.bf16.mxu0 %vm4841_vm0, %v4840_v0  ;;  %v3763_v50 = vld [vmem:[#allocation40] sm:$0xff]  }
 0xaa3   :  { %3463 = vmatprep.subr.bf16.mxu0 %v4840_v0 }
 0xaa6   :  { %3464 = vmatpush3.bf16.msra.mxu0 %v5284_v51  ;;  %v3764_v51 = vld [vmem:[#allocation40 + $0x8] sm:$0xff]  }
 0xaa7   :  { %3465 = vmatprep.subr.bf16.mxu0 %v4840_v0 }
 0xaaa   :  { %3466 = vmatpush3.bf16.msra.mxu0 %v5288_v53  ;;  %v630_v53 = vld [vmem:[#allocation14] sm:$0xff] }
 0xaab   :  { %3467 = vmatprep.subr.bf16.mxu0 %v4840_v0  ;;  %1637 = vperm.xlu1 %3751, %v630_v53  }
 0xaae   :  { %3468 = vmatpush3.bf16.msra.mxu0 %v5291_v54 }
 0xaaf   :  { %3489 = vmatprep.subr.bf16.mxu0 %v4840_v0  ;;  %1642 = vperm.xlu1 %3751, %v631_v55  }
 0xab1   :  { %3470 = vmatmul.mubr.msk.bf16.vlgmr.msra.gmra.mrb[28].mxu0 %vm1222_vm11, %v1497_v35 }
 0xab2   :  { %3493 = vmatprep.mubr.msk.bf16.mxu0 %vm4841_vm0, %v4840_v0  ;;  %3490 = vmatpush3.bf16.msra.mxu0 %v3763_v50 }
 0xab3   :  { %3491 = vmatprep.subr.bf16.mxu0 %v4840_v0 }
 0xab6   :  { %3492 = vmatpush3.bf16.msra.mxu0 %v3764_v51 }
 0xab7   :  { %3505 = vmatprep.subr.bf16.mxu0 %v4840_v0 }
 0xb2a   :  { %v5522_v12 = vpop.permute.xlu1 %1637 }
 0xb2e   :  { %v5525_v20 = vpop.permute.xlu1 %1642 }
 0xb74   :  { %v1538_v54 = vpop.f32.mrb[24].mxu0 }
 0xb75   :  { %v1545_v57 = vmax.f32 %v1538_v54, 1e-20  ;;  %v3453_v9 = vpop.f32.mrb[25].mxu0 }
 0xb76   :  { %v1541_v13 = vpop.f32.mrb[26].mxu0 }
 0xb77   :  { %v1546_v56 = vmax.f32 %v1541_v13, 1e-20  ;;  %v3454_v41 = vpop.f32.mrb[27].mxu0  ;;  %3787 = vrcp.f32 %v1545_v57 }
 0xb79   :  { %3789 = vrcp.f32 %v1546_v56 }
 0xb81   :  { %v3788_v44 = vpop.eup %3787 }
 0xb83   :  { %v3790_v46 = vpop.eup %3789 }
 0xb84   :  { %v1628_v48 = vpop.f32.mrb[28].mxu0  ;;  %v1549_v52 = vpack.c.bf16 %v3790_v46, %v3788_v44 }
 0xb85   :  { %v3471_v17 = vpop.f32.mrb[29].mxu0 }
 0xb86   :  { %v1631_v58 = vpop.f32.mrb[30].mxu0  ;;  %3458 = vmatmul.mubr.msk.bf16.vlgmr.msra.gmra.mrb[32].mxu1 %vm978_vm9, %v1549_v52 }
 0xb87   :  { %v3472_v59 = vpop.f32.mrb[31].mxu0  ;;  %3474 = vmatpush3.bf16.msra.mxu1 %v3763_v50  ;;  %3477 = vmatprep.mubr.msk.bf16.mxu1 %vm4841_vm0, %v4840_v0 }
 0xb88   :  { %3475 = vmatprep.subr.bf16.mxu1 %v4840_v0 }
 0xb8b   :  { %3476 = vmatpush3.bf16.msra.mxu1 %v3764_v51 }
 0xb8c   :  { %3481 = vmatprep.subr.bf16.mxu1 %v4840_v0 }
 0xb8e   :  { %3478 = vmatmul.mubr.msk.bf16.vlgmr.msra.gmra.mrb[36].mxu1 %vm788_vm3, %v1657_v62 }
 0xb8f   :  { %3482 = vmatpush3.bf16.msra.mxu1 %v3763_v50  ;;  %3485 = vmatprep.mubr.msk.bf16.mxu1 %vm4841_vm0, %v4840_v0 }
 0xb90   :  { %3483 = vmatprep.subr.bf16.mxu1 %v4840_v0 }
 0xb93   :  { %3484 = vmatpush3.bf16.msra.mxu1 %v3764_v51 }
 0xb94   :  { %3497 = vmatprep.subr.bf16.mxu1 %v4840_v0 }
 0xb96   :  { %3486 = vmatmul.mubr.msk.bf16.vlgmr.msra.gmra.mrb[40].mxu1 %vm788_vm3, %v1744_v8 }
 0xb97   :  { %3501 = vmatprep.mubr.msk.bf16.mxu1 %vm4841_vm0, %v4840_v0 }
 0xc59   :  { %v1587_v18 = vpop.f32.mrb[32].mxu1 }
 0xc5a   :  { %v1645_v19 = vmul.f32 %v5522_v12, %v1587_v18  ;;  %v3459_v42 = vpop.f32.mrb[33].mxu1 }
 0xc5b   :  { %v1590_v6 = vpop.f32.mrb[34].mxu1 }
 0xc5c   :  { %v5527_v22 = vmul.f32 %v1645_v19, %v1628_v48  ;;  %v1646_v25 = vmul.f32 %v5525_v20, %v1590_v6  ;;  %v3460_v28 = vpop.f32.mrb[35].mxu1 }
 0xc5e   :  { %v5530_v4 = vmul.f32 %v1646_v25, %v1631_v58  ;;  %v1649_v35 = vmax.f32 %v5527_v22, 0.0 }
 0xc60   :  { %v1650_v50 = vmax.f32 %v5530_v4, 0.0 }
 0xc61   :  { %v1713_v51 = vpop.f32.mrb[36].mxu1 }
 0xc62   :  { %v1805_v53 = vpack.c.bf16 %v1650_v50, %v1649_v35  ;;  %v1714_v55 = vadd.f32 %v5532_v34, %v1713_v51  ;;  %v3479_v54 = vpop.f32.mrb[37].mxu1 }
 0xc63   :  { %v1716_v57 = vpop.f32.mrb[38].mxu1 }
 0xc64   :  { %3791 = vtanh.f32 %v1714_v55  ;;  %v3480_v9 = vpop.f32.mrb[39].mxu1  ;;  %3494 = vmatmul.mubr.msk.bf16.vlgmr.msra.gmra.mrb[32].mxu0 %vm788_vm3, %v1805_v53  ;;  %v1656_v53 = vld [vmem:[#allocation43] sm:$0x1] }
 0xc65   :  { %3509 = vmatprep.mubr.msk.bf16.mxu0 %vm4841_vm0, %v4840_v0 }
 0xc69   :  { %v1782_v13 = vpop.f32.mrb[40].mxu1 }
 0xc6a   :  { %v1783_v56 = vadd.f32 %v5532_v34, %v1782_v13  ;;  %v3487_v41 = vpop.f32.mrb[41].mxu1 }
 0xc6b   :  { %v1785_v44 = vpop.f32.mrb[42].mxu1 }
 0xc6c   :  { %3793 = vtanh.f32 %v1783_v56  ;;  %v1786_v46 = vadd.f32 %v5532_v34, %v1785_v44  ;;  %v3488_v48 = vpop.f32.mrb[43].mxu1 }
 0xc6e   :  { %v3792_v52 = vpop.eup %3791  ;;  %3795 = vtanh.f32 %v1786_v46 }
 0xc6f   :  { %v1720_v17 = vsel %vm788_vm3, %v3792_v52, 0.0 }
 0xc70   :  { %v1721_v58 = vrot.slane %v1720_v17, 4 }
 0xc72   :  { %v1722_v59 = vadd.f32 %v1721_v58, %v1720_v17  ;;  %v3765_v58 = vld [vmem:[#allocation44] sm:$0xff]  }
 0xc73   :  { %3498 = vmatpush3.bf16.msra.mxu1 %v3765_v58 }
 0xc74   :  { %v1723_v62 = vrot.slane %v1722_v59, 2  ;;  %3499 = vmatprep.subr.bf16.mxu1 %v4840_v0 }
 0xc76   :  { %v3794_v8 = vpop.eup %3793  ;;  %v1724_v18 = vadd.f32 %v1723_v62, %v1722_v59  ;;  %v3766_v59 = vld [vmem:[#allocation44 + $0x8] sm:$0xff]  }
 0xc77   :  { %v1791_v6 = vsel %vm788_vm3, %v3794_v8, 0.0  ;;  %3500 = vmatpush3.bf16.msra.mxu1 %v3766_v59 }
 0xc78   :  { %v3796_v19 = vpop.eup %3795  ;;  %v1725_v42 = vrot.slane %v1724_v18, 1  ;;  %3513 = vmatprep.subr.bf16.mxu1 %v4840_v0 }
 0xc79   :  { %v1792_v25 = vsel %vm788_vm3, %v3796_v19, 0.0 }
 0xc7a   :  { %v1726_v28 = vadd.f32 %v1725_v42, %v1724_v18  ;;  %v1793_v51 = vadd.f32 %v1792_v25, %v1791_v6 }
 0xc7c   :  { %v1727_v55 = vmul.f32 0.125, %v1726_v28  ;;  %v1794_v54 = vrot.slane %v1793_v51, 4 }
 0xc7e   :  { %v1728_v57 = vmul.f32 %v1727_v55, %v1656_v53  ;;  %v1795_v9 = vadd.f32 %v1794_v54, %v1793_v51 }
 0xc80   :  { %v1730_v13 = vsel %vm1729_vm14, %v1728_v57, 0.0  ;;  %v1796_v56 = vrot.slane %v1795_v9, 2 }
 0xc81   :  { %1731 = vadd.xlane.f32.xlu1 %v1730_v13 }
 0xc82   :  { %v1797_v41 = vadd.f32 %v1796_v56, %v1795_v9 }
 0xc84   :  { %v1798_v44 = vrot.slane %v1797_v41, 1 }
 0xc86   :  { %v1799_v46 = vadd.f32 %v1798_v44, %v1797_v41 }
 0xc88   :  { %v1800_v48 = vmul.f32 0.0625, %v1799_v46 }
 0xc8a   :  { %v1801_v52 = vmul.f32 %v1800_v48, %v1656_v53 }
 0xc8c   :  { %v1802_v17 = vsel %vm1729_vm14, %v1801_v52, 0.0 }
 0xc8d   :  { %1803 = vadd.xlane.f32.xlu0 %v1802_v17 }
 0xd0e   :  { %v1732_v62 = vpop.xlane.xlu1 %1731 }
 0xd0f   :  { %v1733_v8 = vsub.f32 %v1732_v62, %v1732_v62 }
 0xd11   :  { %v1734_v18 = vmul.f32 1.442695, %v1733_v8 }
 0xd13   :  { %3797 = vpow2.f32 %v1734_v18 }
 0xd1d   :  { %v3798_v19 = vpop.eup %3797 }
 0xd1e   :  { %3799 = vrcp.f32 %v3798_v19 }
 0xd28   :  { %v3800_v42 = vpop.eup %3799 }
 0xd29   :  { %v1737_v6 = vmul.f32 %v3800_v42, %v3798_v19 }
 0xd2b   :  { %v1741_v25 = vrot.slane %v1737_v6, %v5298_v1 }
 0xd2d   :  { %v1742_v28 = vmul.f32 %v1741_v25, %v5502_v60  ;;  %v3768_v25 = vld [vmem:[#allocation46 + $0x8] sm:$0xff]  }
 0xd2f   :  { %v1743_v51 = vmax.f32 %v1742_v28, 0.0  ;;  %v1804_v28 = vpop.xlane.xlu0 %1803 }
 0xd31   :  { %v1893_v55 = vpack.c.bf16 %v1743_v51, %v1743_v51 }
 0xd33   :  { %3502 = vmatmul.mubr.msk.bf16.vlgmr.msra.gmra.mrb[44].mxu1 %vm788_vm3, %v1893_v55 }
 0xd34   :  { %3517 = vmatprep.mubr.msk.bf16.mxu1 %vm4841_vm0, %v4840_v0 }
 0xd37   :  { %v1843_v54 = vpop.f32.mrb[32].mxu0 }
 0xd38   :  { %v1844_v57 = vadd.f32 %v5532_v34, %v1843_v54  ;;  %v3495_v9 = vpop.f32.mrb[33].mxu0 }
 0xd39   :  { %v1846_v13 = vpop.f32.mrb[34].mxu0 }
 0xd3a   :  { %3801 = vtanh.f32 %v1844_v57  ;;  %v1847_v56 = vadd.f32 %v5532_v34, %v1846_v13  ;;  %v3496_v41 = vpop.f32.mrb[35].mxu0  ;;  %v3767_v34 = vld [vmem:[#allocation46] sm:$0xff]  }
 0xd3b   :  { %3506 = vmatpush3.bf16.msra.mxu0 %v3767_v34 }
 0xd3c   :  { %3803 = vtanh.f32 %v1847_v56  ;;  %3507 = vmatprep.subr.bf16.mxu0 %v4840_v0 }
 0xd3f   :  { %3508 = vmatpush3.bf16.msra.mxu0 %v3768_v25 }
 0xd40   :  { %3521 = vmatprep.subr.bf16.mxu0 %v4840_v0 }
 0xd44   :  { %v3802_v44 = vpop.eup %3801 }
 0xd45   :  { %v1852_v60 = vsel %vm788_vm3, %v3802_v44, 0.0  ;;  %v3166_v44 = vld [vmem:[#allocation47] ss:$0 sm:$0xff] }
 0xd46   :  { %v3804_v46 = vpop.eup %3803 }
 0xd47   :  { %v1853_v48 = vsel %vm788_vm3, %v3804_v46, 0.0 }
 0xd48   :  { %v1854_v52 = vadd.f32 %v1853_v48, %v1852_v60 }
 0xd4a   :  { %v1855_v17 = vrot.slane %v1854_v52, 4 }
 0xd4c   :  { %v1856_v58 = vadd.f32 %v1855_v17, %v1854_v52 }
 0xd4e   :  { %v1857_v59 = vrot.slane %v1856_v58, 2 }
 0xd50   :  { %v1858_v62 = vadd.f32 %v1857_v59, %v1856_v58 }
 0xd52   :  { %v1859_v8 = vrot.slane %v1858_v62, 1 }
 0xd54   :  { %v1860_v18 = vadd.f32 %v1859_v8, %v1858_v62 }
 0xd56   :  { %v1861_v19 = vmul.f32 0.0625, %v1860_v18 }
 0xd58   :  { %v1862_v42 = vmul.f32 %v1861_v19, %v1656_v53 }
 0xd5a   :  { %v1863_v6 = vsel %vm1729_vm14, %v1862_v42, 0.0 }
 0xd5b   :  { %1864 = vadd.xlane.f32.xlu1 %v1863_v6 }
 0xde8   :  { %v1865_v51 = vpop.xlane.xlu1 %1864 }
 0xde9   :  { %v1866_v55 = vmax.f32 %v1804_v28, %v1865_v51 }
 0xdeb   :  { %v1867_v54 = vsub.f32 %v1804_v28, %v1866_v55  ;;  %v1870_v57 = vsub.f32 %v1865_v51, %v1866_v55 }
 0xded   :  { %v1868_v9 = vmul.f32 1.442695, %v1867_v54  ;;  %v1871_v13 = vmul.f32 1.442695, %v1870_v57  ;;  %v3170_v54 = vld [vmem:[#allocation49] ss:$0 sm:$0xff] }
 0xdef   :  { %3805 = vpow2.f32 %v1868_v9 }
 0xdf0   :  { %3807 = vpow2.f32 %v1871_v13 }
 0xdf9   :  { %v3806_v53 = vpop.eup %3805 }
 0xdfa   :  { %v3808_v56 = vpop.eup %3807 }
 0xdfb   :  { %v1873_v41 = vadd.f32 %v3808_v56, %v3806_v53 }
 0xdfd   :  { %3809 = vrcp.f32 %v1873_v41 }
 0xe06   :  { %v1954_v46 = vpop.f32.mrb[44].mxu1 }
 0xe07   :  { %v3810_v60 = vpop.eup %3809  ;;  %v5565_v48 = vadd.f32 %v3166_v44, %v1954_v46  ;;  %v3503_v52 = vpop.f32.mrb[45].mxu1  ;;  %v3854_v46 = vld [vmem:[#allocation26 + $0x10] sm:$0xff] }
 0xe08   :  { %v1875_v17 = vmul.f32 %v3810_v60, %v3806_v53  ;;  %v1882_v58 = vmul.f32 %v3810_v60, %v3808_v56  ;;  %v1957_v59 = vpop.f32.mrb[46].mxu1  ;;  %v3855_v52 = vld [vmem:[#allocation26 + $0x20] sm:$0xff] }
 0xe09   :  { %v3504_v62 = vpop.f32.mrb[47].mxu1  ;;  %v2030_v8 = vmul.f32 %v5565_v48, %v5256_v14  ;;  %v2031_v18 = vmul.f32 %v5565_v48, %v5258_v15  ;;  %v2032_v51 = vmul.f32 %v5565_v48, %v5262_v21  ;;  %v2033_v55 = vmul.f32 %v5565_v48, %v5264_v26  ;;  %v3852_v21 = vld [vmem:[#allocation20 + $0x8] sm:$0xff]  }
 0xe0a   :  { %v1879_v19 = vrot.slane %v1875_v17, %v5298_v1  ;;  %v1886_v42 = vrot.slane %v1882_v58, %v5298_v1  ;;  %v2036_v26 = vld [vmem:[#allocation50] sm:$0x1]  ;;  %v1960_v5 = vpack.c.bf16 %v5565_v48, %v5565_v48 }
 0xe0b   :  { %v5573_v6 = vpack.c.bf16 %v2031_v18, %v2030_v8  ;;  %v5590_v22 = vpack.c.bf16 %v2033_v55, %v2032_v51  ;;  %v3856_v59 = vld [vmem:[#allocation26 + $0x8] sm:$0xff]  ;;  %v3857_v8 = vld [vmem:[#allocation26 + $0x18] sm:$0xff] }
 0xe0c   :  { %v1880_v34 = vmul.f32 %v1879_v19, %v1082_v2  ;;  %v1881_v25 = vmul.f32 %v1879_v19, %v1083_v63  ;;  %v1887_v28 = vmul.f32 %v1886_v42, %v1649_v35  ;;  %v1888_v14 = vmul.f32 %v1886_v42, %v1650_v50  ;;  %v3851_v50 = vld [vmem:[#allocation20] sm:$0xff]  }
 0xe0d   :  { %v2041_v15 = vsel %vm788_vm3, %v5573_v6, 0  ;;  %v2044_v35 = vsel %vm788_vm3, %v5590_v22, 0  ;;  %v3858_v19 = vld [vmem:[#allocation26 + $0x28] sm:$0xff] }
 0xe0e   :  { %3514 = vmatpush3.bf16.xpose.msra.mxu1 %v2041_v15  ;;  %v1889_v33 = vadd.f32 %v1887_v28, %v1880_v34  ;;  %v1890_v2 = vadd.f32 %v1888_v14, %v1881_v25  ;;  %v3859_v34 = vld [vmem:[#allocation26 + $0x30] sm:$0xff]  ;;  %v3860_v28 = vld [vmem:[#allocation26 + $0x38] sm:$0xff] }
 0xe0f   :  { %3515 = vmatprep.subr.bf16.mxu1 %v4840_v0 }
 0xe10   :  { %v1891_v32 = vmax.f32 %v1889_v33, 0.0  ;;  %v1892_v63 = vmax.f32 %v1890_v2, 0.0 }
 0xe12   :  { %v1961_v4 = vpack.c.bf16 %v1892_v63, %v1891_v32 }
 0xe14   :  { %3510 = vmatmul.mubr.msk.bf16.vlgmr.msra.gmra.mrb[36].mxu0 %vm788_vm3, %v1961_v4 }
 0xe15   :  { %3522 = vmatpush3.bf16.msra.mxu0 %v3851_v50  ;;  %3527 = vmatprep.mubr.msk.bf16.mxu0 %vm4841_vm0, %v4840_v0 }
 0xe16   :  { %3516 = vmatpush3.bf16.xpose.msra.mxu1 %v2044_v35  ;;  %3523 = vmatprep.subr.bf16.mxu0 %v4840_v0 }
 0xe17   :  { %3537 = vmatprep.subr.bf16.mxu1 %v4840_v0 }
 0xe19   :  { %3524 = vmatpush3.bf16.msra.mxu0 %v3852_v21 }
 0xe1a   :  { %3525 = vmatprep.subr.bf16.mxu0 %v4840_v0 }
 0xe1d   :  { %3526 = vmatpush3.bf16.msra.mxu0 %v5252_v10  ;;  %3518 = vmatmul.mubr.msk.bf16.vlgmr.msra.gmra.mrb[48].mxu1 %vm788_vm3, %v2036_v26  ;;  %v3853_v10 = vld [vmem:[#allocation26] sm:$0xff] }
 0xe1e   :  { %3531 = vmatprep.subr.bf16.mxu0 %v4840_v0  ;;  %3538 = vmatpush3.bf16.msra.mxu1 %v5317_v29 }
 0xe1f   :  { %3539 = vmatprep.mubr.msk.bf16.mxu1 %vm4841_vm0, %v4840_v0  ;;  %3551 = vmatprep.subr.bf16.mxu1 %v4840_v0 }
 0xee7   :  { %v2022_v57 = vpop.f32.mrb[36].mxu0 }
 0xee8   :  { %v2023_v9 = vadd.f32 %v3170_v54, %v2022_v57  ;;  %v3511_v13 = vpop.f32.mrb[37].mxu0 }
 0xee9   :  { %v2025_v53 = vpop.f32.mrb[38].mxu0 }
 0xeea   :  { %v2026_v56 = vadd.f32 %v3170_v54, %v2025_v53  ;;  %v3512_v41 = vpop.f32.mrb[39].mxu0  ;;  %v2295_v44 = vmul.f32 %v3853_v10, %v2023_v9  ;;  %v2297_v60 = vmul.f32 %v3854_v46, %v2023_v9  ;;  %v2299_v17 = vmul.f32 %v3855_v52, %v2023_v9 }
 0xeeb   :  { %v2301_v25 = vmul.f32 %v3859_v34, %v2023_v9 }
 0xeec   :  { %v5607_v58 = vpack.c.bf16 %v2026_v56, %v2023_v9  ;;  %v2296_v62 = vmul.f32 %v3856_v59, %v2026_v56  ;;  %v2298_v18 = vmul.f32 %v3857_v8, %v2026_v56  ;;  %v2300_v42 = vmul.f32 %v3858_v19, %v2026_v56 }
 0xeed   :  { %v2302_v14 = vmul.f32 %v3860_v28, %v2026_v56 }
 0xeee   :  { %3528 = vmatmul.mubr.msk.bf16.vlgmr.msra.gmra.mrb[40].mxu0 %vm857_vm4, %v5607_v58  ;;  %v5611_v15 = vpack.c.bf16 %v2296_v62, %v2295_v44  ;;  %v5613_v51 = vpack.c.bf16 %v2298_v18, %v2297_v60  ;;  %v5615_v55 = vpack.c.bf16 %v2300_v42, %v2299_v17 }
 0xeef   :  { %3532 = vmatpush3.bf16.xpose.msra.mxu0 %v5312_v27  ;;  %3533 = vmatprep.mubr.msk.bf16.mxu0 %vm4841_vm0, %v4840_v0  ;;  %v5620_v33 = vpack.c.bf16 %v2302_v14, %v2301_v25 }
 0xef0   :  { %3543 = vmatprep.subr.bf16.mxu0 %v4840_v0  ;;  %v2080_v2 = vpop.f32.mrb[48].mxu1 }
 0xef1   :  { %v3519_v32 = vpop.f32.mrb[49].mxu1  ;;  %v2089_v35 = vrot.slane %v2080_v2, %v5298_v1 }
 0xef2   :  { %v2083_v63 = vpop.f32.mrb[50].mxu1 }
 0xef3   :  { %v3520_v4 = vpop.f32.mrb[51].mxu1 }
 0xfc1   :  { %v2127_v50 = vpop.f32.mrb[40].mxu0 }
 0xfc2   :  { %v2128_v21 = vadd.f32 %v2127_v50, %v2089_v35  ;;  %v3529_v26 = vpop.f32.mrb[41].mxu0  ;;  %v5664_v50 = vsel %vm788_vm3, %v5613_v51, 0 }
 0xfc3   :  { %v2130_v54 = vpop.f32.mrb[42].mxu0  ;;  %v5676_v26 = vsel %vm788_vm3, %v5620_v33, 0 }
 0xfc4   :  { %vm2134_vm15 = vcmp.ge.f32.partialorder %v2128_v21, 0.0  ;;  %v2136_v57 = vmul.f32 0.2, %v2128_v21  ;;  %v2131_v27 = vadd.f32 %v2130_v54, %v2089_v35  ;;  %v3530_v9 = vpop.f32.mrb[43].mxu0  ;;  %v2307_v54 = vld [vmem:[#allocation52] sm:$0x1] }
 0xfc6   :  { %vm2135_vm1 = vcmp.ge.f32.partialorder %v2131_v27, 0.0  ;;  %v2137_v13 = vmul.f32 0.2, %v2131_v27  ;;  %v2138_v53 = vsel %vm2134_vm15, %v2128_v21, %v2136_v57  ;;  %v5670_v21 = vsel %vm788_vm3, %v5615_v55, 0 }
 0xfc7   :  { %v2140_v56 = vadd.f32 %v3197_v11, %v2138_v53 }
 0xfc8   :  { %v2139_v41 = vsel %vm2135_vm1, %v2131_v27, %v2137_v13 }
 0xfc9   :  { %v2142_v10 = vsel %vm788_vm3, %v2140_v56, -inf  ;;  %v2141_v44 = vadd.f32 %v3198_v16, %v2139_v41 }
 0xfca   :  { %2143 = vmax.xlane.f32.xlu1 %v2142_v10 }
 0xfcb   :  { %v2145_v46 = vsel %vm788_vm3, %v2141_v44, -inf }
 0xfce   :  { %2146 = vmax.xlane.f32.xlu1 %v2145_v46 }
0x1057   :  { %v2144_v60 = vpop.xlane.xlu1 %2143 }
0x1058   :  { %v2148_v52 = vsub.f32 %v2140_v56, %v2144_v60 }
0x105a   :  { %v2150_v17 = vmul.f32 1.442695, %v2148_v52 }
0x105b   :  { %v2147_v59 = vpop.xlane.xlu1 %2146 }
0x105c   :  { %v2149_v62 = vsub.f32 %v2141_v44, %v2147_v59  ;;  %3811 = vpow2.f32 %v2150_v17 }
0x105e   :  { %v2152_v8 = vmul.f32 1.442695, %v2149_v62 }
0x1060   :  { %3813 = vpow2.f32 %v2152_v8 }
0x1066   :  { %v3812_v18 = vpop.eup %3811 }
0x106a   :  { %v3814_v11 = vpop.eup %3813 }
0x106b   :  { %v2154_v19 = vpack.c.bf16 %v3814_v11, %v3812_v18 }
0x106d   :  { %3534 = vmatmul.mubr.msk.bf16.vlgmr.msra.gmra.mrb[44].mxu0 %vm788_vm3, %v2154_v19 }
0x106e   :  { %3544 = vmatpush3.bf16.msra.mxu0 %v5573_v6  ;;  %3547 = vmatprep.mubr.msk.bf16.mxu0 %vm4841_vm0, %v4840_v0 }
0x106f   :  { %3545 = vmatprep.subr.bf16.mxu0 %v4840_v0 }
0x1072   :  { %3546 = vmatpush3.bf16.msra.mxu0 %v5590_v22 }
0x1073   :  { %3563 = vmatprep.subr.bf16.mxu0 %v4840_v0 }
0x1075   :  { %3548 = vmatmul.mubr.msk.bf16.vlgmr.msra.gmra.mrb[48].mxu0 %vm788_vm3, %v2154_v19 }
0x1076   :  { %3564 = vmatpush3.bf16.msra.mxu0 %v5326_v39  ;;  %3569 = vmatprep.mubr.msk.bf16.mxu0 %vm4841_vm0, %v4840_v0 }
0x1077   :  { %3565 = vmatprep.subr.bf16.mxu0 %v4840_v0 }
0x107a   :  { %3566 = vmatpush3.bf16.msra.mxu0 %v5331_v40 }
0x107b   :  { %3567 = vmatprep.subr.bf16.mxu0 %v4840_v0 }
0x107e   :  { %3568 = vmatpush3.bf16.msra.mxu0 %v5339_v43 }
0x107f   :  { %3573 = vmatprep.subr.bf16.mxu0 %v4840_v0 }
0x1081   :  { %3570 = vmatmul.mubr.msk.bf16.vlgmr.msra.gmra.mrb[52].mxu0 %vm1171_vm8, %v1960_v5 }
0x1082   :  { %3575 = vmatprep.mubr.msk.bf16.mxu0 %vm4841_vm0, %v4840_v0 }
0x1087   :  { %3574 = vmatpush3.bf16.xpose.msra.mxu0 %v5402_v36  ;;  %v5656_v36 = vsel %vm788_vm3, %v5611_v15, 0 }
0x1088   :  { %3579 = vmatprep.subr.bf16.mxu0 %v4840_v0 }
0x1140   :  { %v2192_v16 = vpop.f32.mrb[44].mxu0 }
0x1141   :  { %v2199_v39 = vmax.f32 %v2192_v16, 1e-20  ;;  %v3535_v40 = vpop.f32.mrb[45].mxu0 }
0x1142   :  { %v2195_v6 = vpop.f32.mrb[46].mxu0 }
0x1143   :  { %v2200_v22 = vmax.f32 %v2195_v6, 1e-20  ;;  %v3536_v43 = vpop.f32.mrb[47].mxu0  ;;  %3815 = vrcp.f32 %v2199_v39 }
0x1145   :  { %3817 = vrcp.f32 %v2200_v22 }
0x1148   :  { %v2282_v48 = vpop.f32.mrb[48].mxu0 }
0x1149   :  { %v3549_v42 = vpop.f32.mrb[49].mxu0 }
0x114a   :  { %v2285_v34 = vpop.f32.mrb[50].mxu0 }
0x114b   :  { %v3550_v25 = vpop.f32.mrb[51].mxu0 }
0x114d   :  { %v3816_v28 = vpop.eup %3815 }
0x114f   :  { %v3818_v14 = vpop.eup %3817 }
0x1150   :  { %v2203_v2 = vpack.c.bf16 %v3818_v14, %v3816_v28 }
0x1152   :  { %3540 = vmatmul.mubr.msk.bf16.vlgmr.msra.gmra.mrb[52].mxu1 %vm978_vm9, %v2203_v2 }
0x1153   :  { %3552 = vmatpush3.bf16.xpose.msra.mxu1 %v5656_v36  ;;  %3559 = vmatprep.mubr.msk.bf16.mxu1 %vm4841_vm0, %v4840_v0 }
0x1154   :  { %v2404_v32 = vpop.f32.mrb[52].mxu0  ;;  %3553 = vmatprep.subr.bf16.mxu1 %v4840_v0 }
0x1155   :  { %v3571_v63 = vpop.f32.mrb[53].mxu0 }
0x1156   :  { %v2407_v4 = vpop.f32.mrb[54].mxu0 }
0x1157   :  { %v3572_v35 = vpop.f32.mrb[55].mxu0 }
0x115b   :  { %3554 = vmatpush3.bf16.xpose.msra.mxu1 %v5664_v50 }
0x115c   :  { %3555 = vmatprep.subr.bf16.mxu1 %v4840_v0 }
0x1163   :  { %3556 = vmatpush3.bf16.xpose.msra.mxu1 %v5670_v21 }
0x1164   :  { %3557 = vmatprep.subr.bf16.mxu1 %v4840_v0 }
0x116b   :  { %3558 = vmatpush3.bf16.xpose.msra.mxu1 %v5676_v26 }
0x116c   :  { %3585 = vmatprep.subr.bf16.mxu1 %v4840_v0 }
0x1172   :  { %3560 = vmatmul.mubr.msk.bf16.vlgmr.msra.gmra.mrb[56].mxu1 %vm788_vm3, %v2307_v54 }
0x1173   :  { %3586 = vmatpush3.bf16.msra.mxu1 %v5611_v15  ;;  %3593 = vmatprep.mubr.msk.bf16.mxu1 %vm4841_vm0, %v4840_v0 }
0x1174   :  { %3587 = vmatprep.subr.bf16.mxu1 %v4840_v0 }
0x1177   :  { %3588 = vmatpush3.bf16.msra.mxu1 %v5613_v51 }
0x1178   :  { %3589 = vmatprep.subr.bf16.mxu1 %v4840_v0 }
0x117b   :  { %3590 = vmatpush3.bf16.msra.mxu1 %v5615_v55 }
0x117c   :  { %3591 = vmatprep.subr.bf16.mxu1 %v4840_v0 }
0x117f   :  { %3592 = vmatpush3.bf16.msra.mxu1 %v5620_v33 }
0x1180   :  { %3609 = vmatprep.subr.bf16.mxu1 %v4840_v0 }
0x1225   :  { %v2241_v57 = vpop.f32.mrb[52].mxu1 }
0x1226   :  { %v2289_v27 = vmul.f32 %v2241_v57, %v5471_v7  ;;  %v3541_v9 = vpop.f32.mrb[53].mxu1 }
0x1227   :  { %v2244_v13 = vpop.f32.mrb[54].mxu1 }
0x1228   :  { %v5692_v53 = vmul.f32 %v2289_v27, %v2282_v48  ;;  %v2290_v56 = vmul.f32 %v2244_v13, %v5469_v24  ;;  %v3542_v41 = vpop.f32.mrb[55].mxu1 }
0x122a   :  { %v5695_v10 = vmul.f32 %v2290_v56, %v2285_v34 }
0x1245   :  { %v2357_v44 = vpop.f32.mrb[56].mxu1 }
0x1246   :  { %v2366_v46 = vrot.slane %v2357_v44, %v5298_v1  ;;  %v3561_v60 = vpop.f32.mrb[57].mxu1 }
0x1247   :  { %v2360_v52 = vpop.f32.mrb[58].mxu1 }
0x1248   :  { %v2405_v17 = vadd.f32 %v2404_v32, %v2366_v46  ;;  %v3562_v59 = vpop.f32.mrb[59].mxu1 }
0x124a   :  { %v2411_v62 = vmul.f32 0.2, %v2405_v17  ;;  %vm2410_vm2 = vcmp.ge.f32.partialorder %v2405_v17, 0.0 }
0x124c   :  { %v2412_v8 = vsel %vm2410_vm2, %v2405_v17, %v2411_v62 }
0x124d   :  { %v2413_v7 = vadd.f32 %v2412_v8, %v622_v30 }
0x124f   :  { %v2414_v18 = vsel %vm1222_vm11, %v2413_v7, -inf }
0x1250   :  { %2415 = vmax.xlane.f32.xlu1 %v2414_v18 }
0x12dd   :  { %v2416_v24 = vpop.xlane.xlu1 %2415 }
0x12de   :  { %v2417_v11 = vsub.f32 %v2413_v7, %v2416_v24 }
0x12e0   :  { %v2418_v19 = vmul.f32 1.442695, %v2417_v11 }
0x12e2   :  { %3819 = vpow2.f32 %v2418_v19 }
0x12ec   :  { %v3820_v5 = vpop.eup %3819 }
0x12ed   :  { %v2420_v16 = vpack.c.bf16 %v3820_v5, %v3820_v5 }
0x12ef   :  { %3576 = vmatmul.mubr.msk.bf16.vlgmr.msra.gmra.mrb[56].mxu0 %vm1222_vm11, %v2420_v16  ;;  %3594 = vmatmul.mubr.msk.bf16.vlgmr.msra.gmra.mrb[60].mxu1 %vm1222_vm11, %v2420_v16 }
0x12f0   :  { %3610 = vmatpush3.bf16.msra.mxu1 %v5406_v45  ;;  %3615 = vmatprep.mubr.msk.bf16.mxu1 %vm4841_vm0, %v4840_v0 }
0x12f1   :  { %3611 = vmatprep.subr.bf16.mxu1 %v4840_v0  ;;  %3580 = vmatpush3.bf16.msra.mxu0 %v5317_v29 }
0x12f2   :  { %3581 = vmatprep.mubr.msk.bf16.mxu0 %vm4841_vm0, %v4840_v0  ;;  %3597 = vmatprep.subr.bf16.mxu0 %v4840_v0 }
0x12f4   :  { %3612 = vmatpush3.bf16.msra.mxu1 %v5411_v47 }
0x12f5   :  { %3613 = vmatprep.subr.bf16.mxu1 %v4840_v0 }
0x12f8   :  { %3614 = vmatpush3.bf16.msra.mxu1 %v5423_v49 }
0x12f9   :  { %3619 = vmatprep.subr.bf16.mxu1 %v4840_v0 }
0x12fb   :  { %3616 = vmatmul.mubr.msk.bf16.vlgmr.msra.gmra.mrb[64].mxu1 %vm857_vm4, %v5607_v58 }
0x12fc   :  { %3621 = vmatprep.mubr.msk.bf16.mxu1 %vm4841_vm0, %v4840_v0 }
0x1301   :  { %3620 = vmatpush3.bf16.xpose.msra.mxu1 %v5461_v3  ;;  %v2553_v3 = vld [vmem:[#allocation53] sm:$0x1] }
0x1302   :  { %3631 = vmatprep.subr.bf16.mxu1 %v4840_v0 }
0x13c2   :  { %v2458_v23 = vpop.f32.mrb[56].mxu0  ;;  %v2544_v30 = vpop.f32.mrb[60].mxu1 }
0x13c3   :  { %v2464_v45 = vmax.f32 %v2458_v23, 1e-20  ;;  %v3577_v47 = vpop.f32.mrb[57].mxu0  ;;  %v3595_v39 = vpop.f32.mrb[61].mxu1 }
0x13c4   :  { %v2461_v40 = vpop.f32.mrb[58].mxu0  ;;  %v2547_v6 = vpop.f32.mrb[62].mxu1 }
0x13c5   :  { %3821 = vrcp.f32 %v2464_v45  ;;  %v3578_v49 = vpop.f32.mrb[59].mxu0  ;;  %v3596_v22 = vpop.f32.mrb[63].mxu1  ;;  %v2294_v40 = vmax.f32 %v5695_v10, 0.0  ;;  %v2293_v6 = vmax.f32 %v5692_v53, 0.0 }
0x13c7   :  { %v2894_v49 = vpack.c.bf16 %v2294_v40, %v2293_v6 }
0x13ce   :  { %v2635_v43 = vpop.f32.mrb[64].mxu1 }
0x13cf   :  { %v3822_v48 = vpop.eup %3821  ;;  %v3617_v58 = vpop.f32.mrb[65].mxu1 }
0x13d0   :  { %v2466_v42 = vpack.c.bf16 %v3822_v48, %v3822_v48  ;;  %v2638_v34 = vpop.f32.mrb[66].mxu1 }
0x13d1   :  { %v3618_v25 = vpop.f32.mrb[67].mxu1 }
0x13d2   :  { %3582 = vmatmul.mubr.msk.bf16.vlgmr.msra.gmra.mrb[60].mxu0 %vm978_vm9, %v2466_v42 }
0x13d3   :  { %3598 = vmatpush3.bf16.xpose.msra.mxu0 %v5656_v36  ;;  %3605 = vmatprep.mubr.msk.bf16.mxu0 %vm4841_vm0, %v4840_v0 }
0x13d4   :  { %3599 = vmatprep.subr.bf16.mxu0 %v4840_v0 }
0x13db   :  { %3600 = vmatpush3.bf16.xpose.msra.mxu0 %v5664_v50 }
0x13dc   :  { %3601 = vmatprep.subr.bf16.mxu0 %v4840_v0 }
0x13e3   :  { %3602 = vmatpush3.bf16.xpose.msra.mxu0 %v5670_v21 }
0x13e4   :  { %3603 = vmatprep.subr.bf16.mxu0 %v4840_v0 }
0x13eb   :  { %3604 = vmatpush3.bf16.xpose.msra.mxu0 %v5676_v26 }
0x13ec   :  { %3625 = vmatprep.subr.bf16.mxu0 %v4840_v0 }
0x13f2   :  { %3606 = vmatmul.mubr.msk.bf16.vlgmr.msra.gmra.mrb[64].mxu0 %vm788_vm3, %v2553_v3  ;;  %v3189_v3 = vld [vmem:[#allocation56] ss:$0 sm:$0xff] }
0x13f3   :  { %3626 = vmatpush3.bf16.msra.mxu0 %v5317_v29  ;;  %3627 = vmatprep.mubr.msk.bf16.mxu0 %vm4841_vm0, %v4840_v0 }
0x13f4   :  { %3643 = vmatprep.subr.bf16.mxu0 %v4840_v0 }
0x14a5   :  { %v2504_v28 = vpop.f32.mrb[60].mxu0 }
0x14a6   :  { %v2550_v14 = vmul.f32 %v2504_v28, %v5465_v61  ;;  %v3583_v2 = vpop.f32.mrb[61].mxu0 }
0x14a7   :  { %v2507_v36 = vpop.f32.mrb[62].mxu0 }
0x14a8   :  { %v5738_v32 = vmul.f32 %v2550_v14, %v2544_v30  ;;  %v3584_v63 = vpop.f32.mrb[63].mxu0 }
0x14aa   :  { %v5766_v47 = vmax.f32 %v5738_v32, 0.0 }
0x14ac   :  { %v2809_v39 = vpack.c.bf16 %v5766_v47, %v5766_v47 }
0x14c5   :  { %v2591_v4 = vpop.f32.mrb[64].mxu0 }
0x14c6   :  { %v2600_v35 = vrot.slane %v2591_v4, %v5298_v1  ;;  %v3607_v50 = vpop.f32.mrb[65].mxu0 }
0x14c7   :  { %v2594_v21 = vpop.f32.mrb[66].mxu0 }
0x14c8   :  { %v2636_v26 = vadd.f32 %v2635_v43, %v2600_v35  ;;  %v2639_v29 = vadd.f32 %v2638_v34, %v2600_v35  ;;  %v3608_v54 = vpop.f32.mrb[67].mxu0 }
0x14ca   :  { %v2644_v57 = vmul.f32 0.2, %v2636_v26  ;;  %v2645_v27 = vmul.f32 0.2, %v2639_v29  ;;  %vm2643_vm4 = vcmp.ge.f32.partialorder %v2639_v29, 0.0  ;;  %vm2642_vm5 = vcmp.ge.f32.partialorder %v2636_v26, 0.0 }
0x14cc   :  { %v2647_v9 = vsel %vm2643_vm4, %v2639_v29, %v2645_v27  ;;  %v2646_v13 = vsel %vm2642_vm5, %v2636_v26, %v2644_v57 }
0x14cd   :  { %v2649_v61 = vadd.f32 %v3202_v38, %v2647_v9  ;;  %v2648_v56 = vadd.f32 %v3201_v37, %v2646_v13  ;;  %v3770_v37 = vld [vmem:[#allocation55 + $0x8] sm:$0xff]  }
0x14cf   :  { %v2653_v41 = vsel %vm1222_vm11, %v2649_v61, -inf  ;;  %v2650_v44 = vsel %vm1222_vm11, %v2648_v56, -inf }
0x14d0   :  { %2654 = vmax.xlane.f32.xlu1 %v2653_v41  ;;  %2651 = vmax.xlane.f32.xlu0 %v2650_v44 }
0x155d   :  { %v2655_v46 = vpop.xlane.xlu1 %2654  ;;  %v2652_v60 = vpop.xlane.xlu0 %2651 }
0x155e   :  { %v2657_v52 = vsub.f32 %v2649_v61, %v2655_v46  ;;  %v2656_v17 = vsub.f32 %v2648_v56, %v2652_v60 }
0x1560   :  { %v2660_v59 = vmul.f32 1.442695, %v2657_v52  ;;  %v2658_v62 = vmul.f32 1.442695, %v2656_v17 }
0x1562   :  { %3823 = vpow2.f32 %v2660_v59 }
0x1563   :  { %3825 = vpow2.f32 %v2658_v62 }
0x156c   :  { %v3824_v8 = vpop.eup %3823 }
0x156d   :  { %v3826_v7 = vpop.eup %3825 }
0x156e   :  { %v2662_v38 = vpack.c.bf16 %v3824_v8, %v3826_v7 }
0x1570   :  { %3622 = vmatmul.mubr.msk.bf16.vlgmr.msra.gmra.mrb[68].mxu1 %vm1222_vm11, %v2662_v38 }
0x1571   :  { %3632 = vmatpush3.bf16.msra.mxu1 %v5611_v15  ;;  %3639 = vmatprep.mubr.msk.bf16.mxu1 %vm4841_vm0, %v4840_v0 }
0x1572   :  { %3633 = vmatprep.subr.bf16.mxu1 %v4840_v0 }
0x1575   :  { %3634 = vmatpush3.bf16.msra.mxu1 %v5613_v51 }
0x1576   :  { %3635 = vmatprep.subr.bf16.mxu1 %v4840_v0 }
0x1579   :  { %3636 = vmatpush3.bf16.msra.mxu1 %v5615_v55 }
0x157a   :  { %3637 = vmatprep.subr.bf16.mxu1 %v4840_v0 }
0x157d   :  { %3638 = vmatpush3.bf16.msra.mxu1 %v5620_v33 }
0x157e   :  { %3659 = vmatprep.subr.bf16.mxu1 %v4840_v0 }
0x1580   :  { %3640 = vmatmul.mubr.msk.bf16.vlgmr.msra.gmra.mrb[72].mxu1 %vm1222_vm11, %v2662_v38 }
0x1581   :  { %3663 = vmatprep.mubr.msk.bf16.mxu1 %vm4841_vm0, %v4840_v0  ;;  %3660 = vmatpush3.bf16.msra.mxu1 %v3769_v31 }
0x1582   :  { %3661 = vmatprep.subr.bf16.mxu1 %v4840_v0 }
0x1585   :  { %3662 = vmatpush3.bf16.msra.mxu1 %v3770_v37 }
0x1643   :  { %v2700_v15 = vpop.f32.mrb[68].mxu1 }
0x1644   :  { %v2707_v51 = vmax.f32 %v2700_v15, 1e-20  ;;  %v3623_v55 = vpop.f32.mrb[69].mxu1 }
0x1645   :  { %v2703_v18 = vpop.f32.mrb[70].mxu1 }
0x1646   :  { %v2708_v24 = vmax.f32 %v2703_v18, 1e-20  ;;  %v3624_v11 = vpop.f32.mrb[71].mxu1  ;;  %3827 = vrcp.f32 %v2707_v51  ;;  %v2808_v51 = vld [vmem:[#allocation58] sm:$0x1] }
0x1648   :  { %3829 = vrcp.f32 %v2708_v24 }
0x1650   :  { %v3828_v33 = vpop.eup %3827 }
0x1652   :  { %v3830_v19 = vpop.eup %3829 }
0x1653   :  { %v2790_v5 = vpop.f32.mrb[72].mxu1  ;;  %v2711_v16 = vpack.c.bf16 %v3830_v19, %v3828_v33 }
0x1654   :  { %v3641_v23 = vpop.f32.mrb[73].mxu1 }
0x1655   :  { %v2793_v30 = vpop.f32.mrb[74].mxu1  ;;  %3628 = vmatmul.mubr.msk.bf16.vlgmr.msra.gmra.mrb[68].mxu0 %vm978_vm9, %v2711_v16 }
0x1656   :  { %v3642_v45 = vpop.f32.mrb[75].mxu1  ;;  %3644 = vmatpush3.bf16.msra.mxu0 %v3769_v31  ;;  %3647 = vmatprep.mubr.msk.bf16.mxu0 %vm4841_vm0, %v4840_v0 }
0x1657   :  { %3645 = vmatprep.subr.bf16.mxu0 %v4840_v0 }
0x165a   :  { %3646 = vmatpush3.bf16.msra.mxu0 %v3770_v37 }
0x165b   :  { %3651 = vmatprep.subr.bf16.mxu0 %v4840_v0 }
0x165d   :  { %3648 = vmatmul.mubr.msk.bf16.vlgmr.msra.gmra.mrb[72].mxu0 %vm788_vm3, %v2809_v39 }
0x165e   :  { %3652 = vmatpush3.bf16.msra.mxu0 %v3769_v31  ;;  %3655 = vmatprep.mubr.msk.bf16.mxu0 %vm4841_vm0, %v4840_v0 }
0x165f   :  { %3653 = vmatprep.subr.bf16.mxu0 %v4840_v0 }
0x1662   :  { %3654 = vmatpush3.bf16.msra.mxu0 %v3770_v37 }
0x1665   :  { %3656 = vmatmul.mubr.msk.bf16.vlgmr.msra.gmra.mrb[76].mxu0 %vm788_vm3, %v2894_v49 }
0x1728   :  { %v2749_v22 = vpop.f32.mrb[68].mxu0 }
0x1729   :  { %v2797_v43 = vmul.f32 %v2749_v22, %v5522_v12  ;;  %v3629_v48 = vpop.f32.mrb[69].mxu0 }
0x172a   :  { %v2752_v58 = vpop.f32.mrb[70].mxu0 }
0x172b   :  { %v5784_v42 = vmul.f32 %v2797_v43, %v2790_v5  ;;  %v2798_v34 = vmul.f32 %v2752_v58, %v5525_v20  ;;  %v3630_v0 = vpop.f32.mrb[71].mxu0 }
0x172d   :  { %v5787_v25 = vmul.f32 %v2798_v34, %v2793_v30  ;;  %v2801_v28 = vmax.f32 %v5784_v42, 0.0 }
0x172f   :  { %v2802_v14 = vmax.f32 %v5787_v25, 0.0 }
0x1730   :  { %v2865_v2 = vpop.f32.mrb[72].mxu0 }
0x1731   :  { %v2955_v12 = vpack.c.bf16 %v2802_v14, %v2801_v28  ;;  %v2866_v36 = vadd.f32 %v3189_v3, %v2865_v2  ;;  %v3649_v32 = vpop.f32.mrb[73].mxu0 }
0x1732   :  { %v2868_v63 = vpop.f32.mrb[74].mxu0 }
0x1733   :  { %3831 = vtanh.f32 %v2866_v36  ;;  %v3650_v4 = vpop.f32.mrb[75].mxu0  ;;  %3664 = vmatmul.mubr.msk.bf16.vlgmr.msra.gmra.mrb[76].mxu1 %vm788_vm3, %v2955_v12 }
0x1738   :  { %v2932_v20 = vpop.f32.mrb[76].mxu0 }
0x1739   :  { %v2933_v35 = vadd.f32 %v3189_v3, %v2932_v20  ;;  %v3657_v50 = vpop.f32.mrb[77].mxu0 }
0x173a   :  { %v2935_v21 = vpop.f32.mrb[78].mxu0 }
0x173b   :  { %3833 = vtanh.f32 %v2933_v35  ;;  %v2936_v26 = vadd.f32 %v3189_v3, %v2935_v21  ;;  %v3658_v29 = vpop.f32.mrb[79].mxu0 }
0x173d   :  { %v3832_v54 = vpop.eup %3831  ;;  %3835 = vtanh.f32 %v2936_v26 }
0x173e   :  { %v2872_v57 = vsel %vm788_vm3, %v3832_v54, 0.0 }
0x173f   :  { %v2873_v27 = vrot.slane %v2872_v57, 4 }
0x1741   :  { %v2874_v9 = vadd.f32 %v2873_v27, %v2872_v57 }
0x1743   :  { %v2875_v56 = vrot.slane %v2874_v9, 2 }
0x1745   :  { %v3834_v13 = vpop.eup %3833  ;;  %v2876_v52 = vadd.f32 %v2875_v56, %v2874_v9 }
0x1746   :  { %v2941_v41 = vsel %vm788_vm3, %v3834_v13, 0.0 }
0x1747   :  { %v3836_v61 = vpop.eup %3835  ;;  %v2877_v62 = vrot.slane %v2876_v52, 1 }
0x1748   :  { %v2942_v44 = vsel %vm788_vm3, %v3836_v61, 0.0 }
0x1749   :  { %v2943_v46 = vadd.f32 %v2942_v44, %v2941_v41  ;;  %v2878_v38 = vadd.f32 %v2877_v62, %v2876_v52 }
0x174b   :  { %v2944_v60 = vrot.slane %v2943_v46, 4  ;;  %v2879_v15 = vmul.f32 0.125, %v2878_v38 }
0x174d   :  { %v2945_v17 = vadd.f32 %v2944_v60, %v2943_v46  ;;  %v2880_v24 = vmul.f32 %v2879_v15, %v2808_v51 }
0x174f   :  { %v2946_v59 = vrot.slane %v2945_v17, 2  ;;  %v2881_v11 = vsel %vm1729_vm14, %v2880_v24, 0.0 }
0x1751   :  { %v2947_v8 = vadd.f32 %v2946_v59, %v2945_v17 }
0x1753   :  { %v2948_v7 = vrot.slane %v2947_v8, 1 }
0x1755   :  { %v2949_v31 = vadd.f32 %v2948_v7, %v2947_v8 }
0x1757   :  { %v2950_v37 = vmul.f32 0.0625, %v2949_v31 }
0x1759   :  { %v2951_v55 = vmul.f32 %v2950_v37, %v2808_v51 }
0x175b   :  { %v2952_v18 = vsel %vm1729_vm14, %v2951_v55, 0.0 }
0x175c   :  { %2953 = vadd.xlane.f32.xlu0 %v2952_v18 }
0x1760   :  { %2882 = vadd.xlane.f32.xlu0 %v2881_v11 }
0x17e9   :  { %v2954_v33 = vpop.xlane.xlu0 %2953 }
0x17ed   :  { %v2883_v19 = vpop.xlane.xlu0 %2882 }
0x17ee   :  { %v2884_v5 = vsub.f32 %v2883_v19, %v2883_v19 }
0x17f0   :  { %v2885_v16 = vmul.f32 1.442695, %v2884_v5 }
0x17f2   :  { %3837 = vpow2.f32 %v2885_v16 }
0x17fc   :  { %v3838_v23 = vpop.eup %3837 }
0x17fd   :  { %3839 = vrcp.f32 %v3838_v23 }
0x1806   :  { %v2993_v30 = vpop.f32.mrb[76].mxu1 }
0x1807   :  { %v3840_v45 = vpop.eup %3839  ;;  %v2994_v39 = vadd.f32 %v3189_v3, %v2993_v30  ;;  %v3665_v49 = vpop.f32.mrb[77].mxu1 }
0x1808   :  { %v2996_v22 = vpop.f32.mrb[78].mxu1  ;;  %v2888_v43 = vmul.f32 %v3840_v45, %v3838_v23 }
0x1809   :  { %3841 = vtanh.f32 %v2994_v39  ;;  %v2997_v48 = vadd.f32 %v3189_v3, %v2996_v22  ;;  %v3666_v58 = vpop.f32.mrb[79].mxu1 }
0x180a   :  { %v2892_v34 = vrot.slane %v2888_v43, %v5298_v1 }
0x180b   :  { %3843 = vtanh.f32 %v2997_v48 }
0x180c   :  { %v2893_v0 = vmul.f32 %v2892_v34, %v5766_v47 }
0x180e   :  { %3041 = vst.msk [vmem:[#allocation59] sm:$0xff] %vm788_vm3, %v2893_v0 }
0x1813   :  { %v3842_v2 = vpop.eup %3841 }
0x1814   :  { %v3002_v36 = vsel %vm788_vm3, %v3842_v2, 0.0 }
0x1815   :  { %v3844_v12 = vpop.eup %3843 }
0x1816   :  { %v3003_v32 = vsel %vm788_vm3, %v3844_v12, 0.0 }
0x1817   :  { %v3004_v63 = vadd.f32 %v3003_v32, %v3002_v36 }
0x1819   :  { %v3005_v4 = vrot.slane %v3004_v63, 4 }
0x181b   :  { %v3006_v20 = vadd.f32 %v3005_v4, %v3004_v63 }
0x181d   :  { %v3007_v35 = vrot.slane %v3006_v20, 2 }
0x181f   :  { %v3008_v50 = vadd.f32 %v3007_v35, %v3006_v20 }
0x1821   :  { %v3009_v3 = vrot.slane %v3008_v50, 1 }
0x1823   :  { %v3010_v21 = vadd.f32 %v3009_v3, %v3008_v50 }
0x1825   :  { %v3011_v26 = vmul.f32 0.0625, %v3010_v21 }
0x1827   :  { %v3012_v29 = vmul.f32 %v3011_v26, %v2808_v51 }
0x1829   :  { %v3013_v54 = vsel %vm1729_vm14, %v3012_v29, 0.0 }
0x182a   :  { %3014 = vadd.xlane.f32.xlu1 %v3013_v54 }
0x182b   :  { %4686 = shalt.err (!%p4683_p6)
}
0x182c   :  { %s4687_s17 = scalar_lea.hbm %s5038_s13, 128 }
0x182d   :  { %p4688_p7 = scmp.ne.s32.totalorder %s5038_s13, %s4687_s17  ;;  %p4691_p8 = scmp.lt.u32.totalorder %s4687_s17, %s5038_s13 }
0x182f   :  { %p4693_p9 = pnand %p4691_p8, %p4688_p7 }
0x1831   :  { %4696 = shalt.err (!%p4693_p9)
}
0x1832   :  { %3053 = dma.vmem_to_hbm [thread:$0]  %s3051_s22, 128, %s5038_s13, [#allocation4]  }
0x1833   :  { %s4844_s13 = smov [#allocation60]  }
0x1834   :  { %s3059_s4 = sshll.u32 %s4844_s13, 4  ;;  %s3060_s4 = int_to_ptr.vmem [resolvable:$true] %s3059_s4 }
0x1835   :  { %s4697_s14 = scalar_lea.vmem %s3060_s4, 256  ;;  %p4702_p11 = scmp.lt.s32.totalorder %s3060_s4, %s3060_s4 }
0x1836   :  { %p4698_p10 = scmp.ne.s32.totalorder %s3060_s4, %s4697_s14  ;;  %p4703_p12 = scmp.lt.s32.totalorder %s4697_s14, %s4697_s14 }
0x1838   :  { %p4704_p13 = por %p4703_p12, %p4702_p11 }
0x183a   :  { %p4705_p0 = pnand %p4704_p13, %p4698_p10 }
0x18b7   :  { %v3015_v47 = vpop.xlane.xlu1 %3014 }
0x18b8   :  { %v3016_v57 = vmax.f32 %v2954_v33, %v3015_v47 }
0x18ba   :  { %v3017_v27 = vsub.f32 %v2954_v33, %v3016_v57  ;;  %v3020_v9 = vsub.f32 %v3015_v47, %v3016_v57 }
0x18bc   :  { %v3018_v13 = vmul.f32 1.442695, %v3017_v27  ;;  %v3021_v61 = vmul.f32 1.442695, %v3020_v9 }
0x18be   :  { %3845 = vpow2.f32 %v3018_v13 }
0x18bf   :  { %3847 = vpow2.f32 %v3021_v61 }
0x18c8   :  { %v3846_v56 = vpop.eup %3845 }
0x18c9   :  { %v3848_v41 = vpop.eup %3847 }
0x18ca   :  { %v3023_v44 = vadd.f32 %v3848_v41, %v3846_v56 }
0x18cc   :  { %3849 = vrcp.f32 %v3023_v44 }
0x18d6   :  { %v3850_v46 = vpop.eup %3849 }
0x18d7   :  { %v3032_v60 = vmul.f32 %v3850_v46, %v3848_v41  ;;  %v3025_v52 = vmul.f32 %v3850_v46, %v3846_v56 }
0x18d9   :  { %v3029_v17 = vrot.slane %v3025_v52, %v5298_v1  ;;  %v3036_v59 = vrot.slane %v3032_v60, %v5298_v1 }
0x18db   :  { %v3030_v62 = vmul.f32 %v3029_v17, %v2293_v6  ;;  %v3031_v8 = vmul.f32 %v3029_v17, %v2294_v40  ;;  %v3037_v7 = vmul.f32 %v3036_v59, %v2801_v28  ;;  %v3038_v38 = vmul.f32 %v3036_v59, %v2802_v14 }
0x18dd   :  { %v3039_v31 = vadd.f32 %v3037_v7, %v3030_v62  ;;  %v3040_v37 = vadd.f32 %v3038_v38, %v3031_v8 }
0x18df   :  { %3042 = vst.msk [vmem:[#allocation60] sm:$0xff] %vm788_vm3, %v3039_v31  ;;  %3043 = vst.msk [vmem:[#allocation60 + $0x8] sm:$0xff] %vm788_vm3, %v3040_v37 }
0x18e0   :  { %4708 = shalt.err (!%p4705_p0)
}
0x18e1   :  { %s4709_s5 = scalar_lea.hbm %s5043_s12, 256 }
0x18e2   :  { %p4710_p1 = scmp.ne.s32.totalorder %s5043_s12, %s4709_s5  ;;  %p4713_p2 = scmp.lt.u32.totalorder %s4709_s5, %s5043_s12 }
0x18e4   :  { %p4715_p3 = pnand %p4713_p2, %p4710_p1 }
0x18e6   :  { %4718 = shalt.err (!%p4715_p3)
}
0x18e7   :  { %3065 = dma.vmem_to_hbm [thread:$0]  %s3060_s4, 256, %s5043_s12, [#allocation61], %s4804_s0, %s4804_s0, %s4805_s15  }
0x18e8   :  { %4757 = dma.done.wait [#allocation4], 128  }
0x18e9   :  { %4758 = vsyncadd [#allocation4], 4294967168 }
0x18ea   :  { %4759 = dma.done.wait [#allocation61], 256  }
0x18eb   :  { %4760 = vsyncadd [#allocation61], 4294967040 }
0x18ec   :  { %3072 = vsyncpa [#allocation3], 1 }
0x18ed   :  { %3073 = vsyncpa [#allocation6], 1 }
0x18ee   :  { %3074 = vsyncpa [#allocation9], 1 }
0x18ef   :  { %3075 = vsyncpa [#allocation12], 1 }
0x18f0   :  { %3076 = vsyncpa [#allocation15], 1 }
0x18f1   :  { %3077 = vsyncpa [#allocation18], 1 }
0x18f2   :  { %3078 = vsyncpa [#allocation21], 1 }
0x18f3   :  { %3079 = vsyncpa [#allocation24], 1 }
0x18f4   :  { %3080 = vsyncpa [#allocation27], 1 }
0x18f5   :  { %3081 = vsyncpa [#allocation30], 1 }
0x18f6   :  { %3082 = vsyncpa [#allocation33], 1 }
0x18f7   :  { %3083 = vsyncpa [#allocation36], 1 }
0x18f8   :  { %3084 = vsyncpa [#allocation39], 1 }
0x18f9   :  { %3085 = vsyncpa [#allocation42], 1 }
0x18fa   :  { %3086 = vsyncpa [#allocation45], 1 }
0x18fb   :  { %3087 = vsyncpa [#allocation48], 1 }
0x18fc   :  { %3088 = vsyncpa [#allocation51], 1 }
0x18fd   :  { %3089 = vsyncpa [#allocation54], 1 }
0x18fe   :  { %3090 = vsyncpa [#allocation57], 1 }
0x18ff   :  { %3091 = vsyncpa [#allocation4], 1 }
0x1900   :  { %3092 = vsyncpa [#allocation61], 1 }

</bundles_post_ra>
